<compile_context>
chip_gen: v7x
topology: tpu7x:2x2x1
jax: 0.10.0
libtpu: 0.0.40
codegen_flags: <defaults>
</compile_context>

<pallas_src>
import functools

import jax
import jax.numpy as jnp
from jax.experimental import pallas as pl
from jax.experimental.pallas import tpu as pltpu


def _upskip_kernel(xu_ref, skip_ref, cmask_ref,
                   w1_ref, g1_ref, b1_ref,
                   w2_ref, g2_ref, b2_ref,
                   w3_ref, g3_ref, b3_ref,
                   w4_ref, g4_ref, b4_ref,
                   o_ref, pad_ref, *, Ho, Wo):
    """Fused UpSkip forward for one batch sample.

    xu_ref   : (Cx, Ho*Wo)  bf16  already-upsampled input (separable, wrapper)
    skip_ref : (Cs, Ho*Wo)  bf16  skip connection
    cmask_ref: (2, Ho*Wo)   bf16  column-validity masks for taps dx=0 and dx=2
    w*_ref   : (9, Cout, Cin) bf16 conv weights, tap index t = dy*3 + dx
    g*_ref, b*_ref : (Cout, 1) f32 GroupNorm affine
    o_ref    : (Cout4, Ho*Wo) f32
    pad_ref  : (Cmax, Ho*Wo + 2*(Wo+1)) bf16 zero-halo flat activation scratch
    """
    L = Ho * Wo
    P = Wo + 1                      # halo width in flattened (row-major) coords
    Cx = xu_ref.shape[0]
    Cs = skip_ref.shape[0]
    Cmax = pad_ref.shape[0]

    # Zero only the halo columns; the interior is fully overwritten below.
    halo_zeros = jnp.zeros((Cmax, P), pad_ref.dtype)
    pad_ref[:, 0:P] = halo_zeros
    pad_ref[:, P + L:P + L + P] = halo_zeros

    # Channel "concat" = two writes into the padded VMEM buffer.
    pad_ref[0:Cx, P:P + L] = xu_ref[...]
    pad_ref[Cx:Cx + Cs, P:P + L] = skip_ref[...]

    layers = (
        (w1_ref, g1_ref, b1_ref, "silu"),
        (w2_ref, g2_ref, b2_ref, "mish"),
        (w3_ref, g3_ref, b3_ref, "silu"),
        (w4_ref, g4_ref, b4_ref, "mish"),
    )

    for li, (w_ref, g_ref, b_ref, act) in enumerate(layers):
        cout, cin = w_ref.shape[1], w_ref.shape[2]

        # 3x3 SAME conv = 9 per-tap matmuls over shifted lane slices of the
        # padded flat buffer (shift = (dy-1)*Wo + (dx-1)); the static column
        # masks zero the lanes that wrapped a spatial row.  f32 accumulation.
        acc = None
        for dy in range(3):
            for dx in range(3):
                start = P + (dy - 1) * Wo + (dx - 1)
                win = pad_ref[0:cin, start:start + L]
                if dx == 0:
                    win = win * cmask_ref[0:1, :]
                elif dx == 2:
                    win = win * cmask_ref[1:2, :]
                part = jnp.dot(w_ref[dy * 3 + dx], win,
                               preferred_element_type=jnp.float32)
                acc = part if acc is None else acc + part

        # GroupNorm(num_groups=1) over all of (C, H, W): mean, then centered
        # sum-of-squares (no E[x^2]-E[x]^2 cancellation); affine folded in.
        inv_cnt = 1.0 / float(cout * L)
        mean = jnp.sum(acc) * inv_cnt
        diff = acc - mean
        var = jnp.sum(diff * diff) * inv_cnt
        scale = g_ref[...] * jax.lax.rsqrt(var + 1e-5)
        y = diff * scale + b_ref[...]

        # Activation.
        if act == "silu":
            y = y * jax.nn.sigmoid(y)
        else:
            # mish(y) = y*tanh(softplus(y)) = y*n/(n+2), n = e^y (e^y + 2);
            # single EUP exp + EUP approx reciprocal, overflow-guarded.
            e = jnp.exp(jnp.minimum(y, 25.0))
            n = e * (e + 2.0)
            y = jnp.where(y > 25.0, y,
                          y * n * pl.reciprocal(n + 2.0, approx=True))

        if li == len(layers) - 1:
            o_ref[...] = y
        else:
            pad_ref[0:cout, P:P + L] = y.astype(pad_ref.dtype)


def _bilinear_interp_matrix(out_size, in_size):
    """(out_size, in_size) bilinear interpolation matrix, align_corners=True."""
    scale = (in_size - 1) / max(out_size - 1, 1)
    src = jnp.arange(out_size, dtype=jnp.float32) * scale
    lo = jnp.clip(jnp.floor(src).astype(jnp.int32), 0, in_size - 1)
    hi = jnp.clip(lo + 1, 0, in_size - 1)
    frac = src - lo.astype(jnp.float32)
    eye = jnp.eye(in_size, dtype=jnp.float32)
    return eye[lo] * (1.0 - frac)[:, None] + eye[hi] * frac[:, None]


def upskip_forward(params, x_nchw, skip_nchw):
    """params: list of 4 (w_oihw, gamma, beta) tuples (convs have no bias)."""
    N, Cx, H, W = x_nchw.shape
    Ns, Cs, Ho, Wo = skip_nchw.shape
    assert Ns == N and Ho == 2 * H and Wo == 2 * W
    L = Ho * Wo
    P = Wo + 1
    cmax = Cx + Cs
    assert params[0][0].shape[1] == cmax

    # Separable bilinear x2 upsample (align_corners=True): apply the (Ho,H)
    # row matrix and the (Wo,W) col matrix to the small low-res input in the
    # wrapper (two tiny einsums) instead of a dense (H*W, Ho*Wo) kron matmul.
    rh = _bilinear_interp_matrix(Ho, H)                     # (Ho, H)
    cw = _bilinear_interp_matrix(Wo, W)                     # (Wo, W)
    xf = x_nchw.astype(jnp.float32)
    xu = jnp.einsum('oh,nchw->ncow', rh, xf)                # (N, Cx, Ho, W)
    xu = jnp.einsum('pw,ncow->ncop', cw, xu)                # (N, Cx, Ho, Wo)
    xu_flat = xu.reshape(N, Cx, L).astype(jnp.bfloat16)     # bf16 MXU operand
    skip_flat = skip_nchw.reshape(N, Cs, L).astype(jnp.bfloat16)

    # Column-validity masks for the two horizontal taps that can wrap a row.
    col = jnp.arange(L, dtype=jnp.int32) % Wo
    cmask = jnp.stack([col >= 1, col <= Wo - 2]).astype(jnp.bfloat16)  # (2, L)

    # Conv weights -> (9, Cout, Cin) bf16 with the layer's *true* Cin;
    # GroupNorm affine -> (Cout, 1) f32.
    flat_params = []
    for w_oihw, gamma, beta in params:
        cout, cin = w_oihw.shape[0], w_oihw.shape[1]
        w_taps = jnp.transpose(w_oihw, (2, 3, 0, 1)).reshape(9, cout, cin)
        flat_params += [w_taps.astype(jnp.bfloat16),
                        gamma.reshape(cout, 1).astype(jnp.float32),
                        beta.reshape(cout, 1).astype(jnp.float32)]
    cout_final = params[-1][0].shape[0]

    def _const_spec(shape):
        if len(shape) == 2:
            return pl.BlockSpec(shape, lambda n: (0, 0))
        return pl.BlockSpec(shape, lambda n: (0, 0, 0))

    in_specs = [
        pl.BlockSpec((None, Cx, L), lambda n: (n, 0, 0)),   # upsampled x
        pl.BlockSpec((None, Cs, L), lambda n: (n, 0, 0)),   # skip
        _const_spec(cmask.shape),                           # column masks
    ]
    # Constant index maps keep weights/affine VMEM-resident across the grid.
    in_specs += [_const_spec(p.shape) for p in flat_params]

    kernel = functools.partial(_upskip_kernel, Ho=Ho, Wo=Wo)
    out_flat = pl.pallas_call(
        kernel,
        out_shape=jax.ShapeDtypeStruct((N, cout_final, L), jnp.float32),
        grid=(N,),
        in_specs=in_specs,
        out_specs=pl.BlockSpec((None, cout_final, L), lambda n: (n, 0, 0)),
        scratch_shapes=[
            pltpu.VMEM((cmax, L + 2 * P), jnp.bfloat16),    # padded activations
        ],
        compiler_params=pltpu.CompilerParams(
            dimension_semantics=("parallel",)),
    )(xu_flat, skip_flat, cmask, *flat_params)
    return out_flat.reshape(N, cout_final, Ho, Wo)


def init_params(key, in_channels, out_channels):
    """Deterministic synthetic params; layer order: silu, mish, silu, mish."""
    mid = in_channels // 2
    specs = [(in_channels, in_channels),
             (in_channels, in_channels),
             (in_channels, mid),
             (mid, out_channels)]
    params = []
    for i, (cin, cout) in enumerate(specs):
        kw, kg, kb = jax.random.split(jax.random.fold_in(key, i), 3)
        w = 0.1 * jax.random.normal(kw, (cout, cin, 3, 3), jnp.float32)
        gamma = 1.0 + 0.05 * jax.random.normal(kg, (cout,), jnp.float32)
        beta = 0.05 * jax.random.normal(kb, (cout,), jnp.float32)
        params.append((w, gamma, beta))
    return params


# ---------------- pure-JAX reference (numerical validation only) --------------
def _upsample_bilinear_x2_ref(x_nchw):
    N, C, H, W = x_nchw.shape
    Ho, Wo = 2 * H, 2 * W

    def coords(out_size, in_size):
        scale = (in_size - 1) / max(out_size - 1, 1)
        src = jnp.arange(out_size, dtype=jnp.float32) * scale
        lo = jnp.clip(jnp.floor(src).astype(jnp.int32), 0, in_size - 1)
        hi = jnp.clip(lo + 1, 0, in_size - 1)
        return lo, hi, src - lo.astype(jnp.float32)

    hlo, hhi, fh = coords(Ho, H)
    wlo, whi, fw = coords(Wo, W)
    rows = (x_nchw[:, :, hlo, :] * (1.0 - fh)[None, None, :, None]
            + x_nchw[:, :, hhi, :] * fh[None, None, :, None])
    return (rows[:, :, :, wlo] * (1.0 - fw)[None, None, None, :]
            + rows[:, :, :, whi] * fw[None, None, None, :])


def _ref_conv_gn_act(x_nchw, w_oihw, gamma, beta, act):
    # bf16 conv operands with f32 accumulation, matching the kernel (the
    # review sanctions validating against a bf16-cast reference).
    y = jax.lax.conv_general_dilated(
        x_nchw.astype(jnp.bfloat16), w_oihw.astype(jnp.bfloat16),
        window_strides=(1, 1), padding="SAME",
        dimension_numbers=("NCHW", "OIHW", "NCHW"),
        preferred_element_type=jnp.float32)
    mean = jnp.mean(y, axis=(1, 2, 3), keepdims=True)
    var = jnp.mean(jnp.square(y - mean), axis=(1, 2, 3), keepdims=True)
    y = (y - mean) * jax.lax.rsqrt(var + 1e-5)
    y = y * gamma[None, :, None, None] + beta[None, :, None, None]
    if act == "silu":
        return y * jax.nn.sigmoid(y)
    return y * jnp.tanh(jax.nn.softplus(y))


def upskip_ref(params, x_nchw, skip_nchw):
    h = jnp.concatenate([_upsample_bilinear_x2_ref(x_nchw), skip_nchw], axis=1)
    for (w, g, b), act in zip(params, ("silu", "mish", "silu", "mish")):
        h = _ref_conv_gn_act(h, w, g, b, act)
    return h


if __name__ == "__main__":
    key = jax.random.PRNGKey(0)
    kx, ks, kp = jax.random.split(key, 3)

    in_channels, out_channels = 8, 4
    # Concat of upsampled x and skip_x along channels must equal in_channels.
    x = jax.random.normal(kx, (2, 4, 8, 8), jnp.float32)          # NCHW
    skip_x = jax.random.normal(ks, (2, 4, 16, 16), jnp.float32)   # NCHW
    params = init_params(kp, in_channels, out_channels)

    out = jax.block_until_ready(upskip_forward(params, x, skip_x))
    ref = jax.block_until_ready(upskip_ref(params, x, skip_x))

    assert out.shape == (2, out_channels, 16, 16), out.shape
    max_err = float(jnp.max(jnp.abs(out - ref)))
    assert jnp.allclose(out, ref, atol=2e-2, rtol=2e-2), max_err
    print("KERNEL_OK")
</pallas_src>

<mosaic_0001>
module attributes {stable_mosaic.version = 11 : i64} {
  func.func @_upskip_kernel(%arg0: i32, %arg1: memref<1x4x256xbf16, #tpu.memory_space<vmem>>, %arg2: memref<1x4x256xbf16, #tpu.memory_space<vmem>>, %arg3: memref<2x256xbf16, #tpu.memory_space<vmem>>, %arg4: memref<9x8x8xbf16, #tpu.memory_space<vmem>>, %arg5: memref<8x1xf32, #tpu.memory_space<vmem>>, %arg6: memref<8x1xf32, #tpu.memory_space<vmem>>, %arg7: memref<9x8x8xbf16, #tpu.memory_space<vmem>>, %arg8: memref<8x1xf32, #tpu.memory_space<vmem>>, %arg9: memref<8x1xf32, #tpu.memory_space<vmem>>, %arg10: memref<9x4x8xbf16, #tpu.memory_space<vmem>>, %arg11: memref<4x1xf32, #tpu.memory_space<vmem>>, %arg12: memref<4x1xf32, #tpu.memory_space<vmem>>, %arg13: memref<9x4x4xbf16, #tpu.memory_space<vmem>>, %arg14: memref<4x1xf32, #tpu.memory_space<vmem>>, %arg15: memref<4x1xf32, #tpu.memory_space<vmem>>, %arg16: memref<1x4x256xf32, #tpu.memory_space<vmem>>, %arg17: memref<8x290xbf16, #tpu.memory_space<vmem>>) attributes {dimension_semantics = [#tpu.dimension_semantics<parallel>], iteration_bounds = array<i64: 2>, scalar_prefetch = 0 : i64, scratch_operands = 1 : i64, tpu.core_type = #tpu.core_type<tc>, window_params = [{transform_indices = @transform_0, window_bounds = array<i64: 1, 4, 256>}, {transform_indices = @transform_1, window_bounds = array<i64: 1, 4, 256>}, {pipeline_mode = #tpu.pipeline_mode<synchronous>, transform_indices = @transform_2, window_bounds = array<i64: 2, 256>}, {pipeline_mode = #tpu.pipeline_mode<synchronous>, transform_indices = @transform_3, window_bounds = array<i64: 9, 8, 8>}, {pipeline_mode = #tpu.pipeline_mode<synchronous>, transform_indices = @transform_4, window_bounds = array<i64: 8, 1>}, {pipeline_mode = #tpu.pipeline_mode<synchronous>, transform_indices = @transform_5, window_bounds = array<i64: 8, 1>}, {pipeline_mode = #tpu.pipeline_mode<synchronous>, transform_indices = @transform_6, window_bounds = array<i64: 9, 8, 8>}, {pipeline_mode = #tpu.pipeline_mode<synchronous>, transform_indices = @transform_7, window_bounds = array<i64: 8, 1>}, {pipeline_mode = #tpu.pipeline_mode<synchronous>, transform_indices = @transform_8, window_bounds = array<i64: 8, 1>}, {pipeline_mode = #tpu.pipeline_mode<synchronous>, transform_indices = @transform_9, window_bounds = array<i64: 9, 4, 8>}, {pipeline_mode = #tpu.pipeline_mode<synchronous>, transform_indices = @transform_10, window_bounds = array<i64: 4, 1>}, {pipeline_mode = #tpu.pipeline_mode<synchronous>, transform_indices = @transform_11, window_bounds = array<i64: 4, 1>}, {pipeline_mode = #tpu.pipeline_mode<synchronous>, transform_indices = @transform_12, window_bounds = array<i64: 9, 4, 4>}, {pipeline_mode = #tpu.pipeline_mode<synchronous>, transform_indices = @transform_13, window_bounds = array<i64: 4, 1>}, {pipeline_mode = #tpu.pipeline_mode<synchronous>, transform_indices = @transform_14, window_bounds = array<i64: 4, 1>}, {transform_indices = @transform_15, window_bounds = array<i64: 1, 4, 256>}]} {
    %cst = arith.constant 0.000000e+00 : bf16
    %0 = vector.broadcast %cst : bf16 to vector<8x17xbf16>
    %c0 = arith.constant 0 : index
    %c0_0 = arith.constant 0 : index
    %1 = vector.load %arg17[%c0, %c0_0] : memref<8x290xbf16, #tpu.memory_space<vmem>>, vector<8x17xbf16>
    tpu.vector_store %arg17[%c0, %c0_0], %0 {strides = array<i32>} : memref<8x290xbf16, #tpu.memory_space<vmem>>, vector<8x17xbf16>,
    %c0_1 = arith.constant 0 : index
    %c273 = arith.constant 273 : index
    %2 = vector.load %arg17[%c0_1, %c273] : memref<8x290xbf16, #tpu.memory_space<vmem>>, vector<8x17xbf16>
    tpu.vector_store %arg17[%c0_1, %c273], %0 {strides = array<i32>} : memref<8x290xbf16, #tpu.memory_space<vmem>>, vector<8x17xbf16>,
    %c0_2 = arith.constant 0 : index
    %c0_3 = arith.constant 0 : index
    %c0_4 = arith.constant 0 : index
    %3 = vector.load %arg1[%c0_2, %c0_3, %c0_4] : memref<1x4x256xbf16, #tpu.memory_space<vmem>>, vector<1x4x256xbf16>
    %4 = vector.shape_cast %3 : vector<1x4x256xbf16> to vector<4x256xbf16>
    %c0_5 = arith.constant 0 : index
    %c17 = arith.constant 17 : index
    %5 = vector.load %arg17[%c0_5, %c17] : memref<8x290xbf16, #tpu.memory_space<vmem>>, vector<4x256xbf16>
    tpu.vector_store %arg17[%c0_5, %c17], %4 {strides = array<i32>} : memref<8x290xbf16, #tpu.memory_space<vmem>>, vector<4x256xbf16>,
    %c0_6 = arith.constant 0 : index
    %c0_7 = arith.constant 0 : index
    %c0_8 = arith.constant 0 : index
    %6 = vector.load %arg2[%c0_6, %c0_7, %c0_8] : memref<1x4x256xbf16, #tpu.memory_space<vmem>>, vector<1x4x256xbf16>
    %7 = vector.shape_cast %6 : vector<1x4x256xbf16> to vector<4x256xbf16>
    %c4 = arith.constant 4 : index
    %c17_9 = arith.constant 17 : index
    %8 = vector.load %arg17[%c4, %c17_9] : memref<8x290xbf16, #tpu.memory_space<vmem>>, vector<4x256xbf16>
    tpu.vector_store %arg17[%c4, %c17_9], %7 {strides = array<i32>} : memref<8x290xbf16, #tpu.memory_space<vmem>>, vector<4x256xbf16>,
    %c0_10 = arith.constant 0 : index
    %c0_11 = arith.constant 0 : index
    %9 = vector.load %arg17[%c0_10, %c0_11] : memref<8x290xbf16, #tpu.memory_space<vmem>>, vector<8x256xbf16>
    %c0_12 = arith.constant 0 : index
    %c0_13 = arith.constant 0 : index
    %10 = vector.load %arg3[%c0_12, %c0_13] : memref<2x256xbf16, #tpu.memory_space<vmem>>, vector<1x256xbf16>
    %11 = vector.broadcast %10 : vector<1x256xbf16> to vector<8x256xbf16>
    %12 = arith.mulf %9, %11 : vector<8x256xbf16>
    %c0_14 = arith.constant 0 : index
    %c0_15 = arith.constant 0 : index
    %c0_16 = arith.constant 0 : index
    %13 = vector.load %arg4[%c0_14, %c0_15, %c0_16] : memref<9x8x8xbf16, #tpu.memory_space<vmem>>, vector<1x8x8xbf16>
    %14 = vector.shape_cast %13 : vector<1x8x8xbf16> to vector<8x8xbf16>
    %cst_17 = arith.constant dense<0.000000e+00> : vector<8x256xf32>
    %15 = tpu.matmul %14, %12, %cst_17 {dimension_numbers = #tpu.dot_dimension_numbers<[1], [0], [0], [1], [0, 0, 1, 1], [], []>} : vector<8x8xbf16>, vector<8x256xbf16>, vector<8x256xf32> -> vector<8x256xf32>
    %c0_18 = arith.constant 0 : index
    %c1 = arith.constant 1 : index
    %16 = vector.load %arg17[%c0_18, %c1] : memref<8x290xbf16, #tpu.memory_space<vmem>>, vector<8x256xbf16>
    %c1_19 = arith.constant 1 : index
    %c0_20 = arith.constant 0 : index
    %c0_21 = arith.constant 0 : index
    %17 = vector.load %arg4[%c1_19, %c0_20, %c0_21] : memref<9x8x8xbf16, #tpu.memory_space<vmem>>, vector<1x8x8xbf16>
    %18 = vector.shape_cast %17 : vector<1x8x8xbf16> to vector<8x8xbf16>
    %cst_22 = arith.constant dense<0.000000e+00> : vector<8x256xf32>
    %19 = tpu.matmul %18, %16, %cst_22 {dimension_numbers = #tpu.dot_dimension_numbers<[1], [0], [0], [1], [0, 0, 1, 1], [], []>} : vector<8x8xbf16>, vector<8x256xbf16>, vector<8x256xf32> -> vector<8x256xf32>
    %20 = arith.addf %15, %19 : vector<8x256xf32>
    %c0_23 = arith.constant 0 : index
    %c2 = arith.constant 2 : index
    %21 = vector.load %arg17[%c0_23, %c2] : memref<8x290xbf16, #tpu.memory_space<vmem>>, vector<8x256xbf16>
    %c1_24 = arith.constant 1 : index
    %c0_25 = arith.constant 0 : index
    %22 = vector.load %arg3[%c1_24, %c0_25] : memref<2x256xbf16, #tpu.memory_space<vmem>>, vector<1x256xbf16>
    %23 = vector.broadcast %22 : vector<1x256xbf16> to vector<8x256xbf16>
    %24 = arith.mulf %21, %23 : vector<8x256xbf16>
    %c2_26 = arith.constant 2 : index
    %c0_27 = arith.constant 0 : index
    %c0_28 = arith.constant 0 : index
    %25 = vector.load %arg4[%c2_26, %c0_27, %c0_28] : memref<9x8x8xbf16, #tpu.memory_space<vmem>>, vector<1x8x8xbf16>
    %26 = vector.shape_cast %25 : vector<1x8x8xbf16> to vector<8x8xbf16>
    %cst_29 = arith.constant dense<0.000000e+00> : vector<8x256xf32>
    %27 = tpu.matmul %26, %24, %cst_29 {dimension_numbers = #tpu.dot_dimension_numbers<[1], [0], [0], [1], [0, 0, 1, 1], [], []>} : vector<8x8xbf16>, vector<8x256xbf16>, vector<8x256xf32> -> vector<8x256xf32>
    %28 = arith.addf %20, %27 : vector<8x256xf32>
    %c0_30 = arith.constant 0 : index
    %c16 = arith.constant 16 : index
    %29 = vector.load %arg17[%c0_30, %c16] : memref<8x290xbf16, #tpu.memory_space<vmem>>, vector<8x256xbf16>
    %c0_31 = arith.constant 0 : index
    %c0_32 = arith.constant 0 : index
    %30 = vector.load %arg3[%c0_31, %c0_32] : memref<2x256xbf16, #tpu.memory_space<vmem>>, vector<1x256xbf16>
    %31 = vector.broadcast %30 : vector<1x256xbf16> to vector<8x256xbf16>
    %32 = arith.mulf %29, %31 : vector<8x256xbf16>
    %c3 = arith.constant 3 : index
    %c0_33 = arith.constant 0 : index
    %c0_34 = arith.constant 0 : index
    %33 = vector.load %arg4[%c3, %c0_33, %c0_34] : memref<9x8x8xbf16, #tpu.memory_space<vmem>>, vector<1x8x8xbf16>
    %34 = vector.shape_cast %33 : vector<1x8x8xbf16> to vector<8x8xbf16>
    %cst_35 = arith.constant dense<0.000000e+00> : vector<8x256xf32>
    %35 = tpu.matmul %34, %32, %cst_35 {dimension_numbers = #tpu.dot_dimension_numbers<[1], [0], [0], [1], [0, 0, 1, 1], [], []>} : vector<8x8xbf16>, vector<8x256xbf16>, vector<8x256xf32> -> vector<8x256xf32>
    %36 = arith.addf %28, %35 : vector<8x256xf32>
    %c0_36 = arith.constant 0 : index
    %c17_37 = arith.constant 17 : index
    %37 = vector.load %arg17[%c0_36, %c17_37] : memref<8x290xbf16, #tpu.memory_space<vmem>>, vector<8x256xbf16>
    %c4_38 = arith.constant 4 : index
    %c0_39 = arith.constant 0 : index
    %c0_40 = arith.constant 0 : index
    %38 = vector.load %arg4[%c4_38, %c0_39, %c0_40] : memref<9x8x8xbf16, #tpu.memory_space<vmem>>, vector<1x8x8xbf16>
    %39 = vector.shape_cast %38 : vector<1x8x8xbf16> to vector<8x8xbf16>
    %cst_41 = arith.constant dense<0.000000e+00> : vector<8x256xf32>
    %40 = tpu.matmul %39, %37, %cst_41 {dimension_numbers = #tpu.dot_dimension_numbers<[1], [0], [0], [1], [0, 0, 1, 1], [], []>} : vector<8x8xbf16>, vector<8x256xbf16>, vector<8x256xf32> -> vector<8x256xf32>
    %41 = arith.addf %36, %40 : vector<8x256xf32>
    %c0_42 = arith.constant 0 : index
    %c18 = arith.constant 18 : index
    %42 = vector.load %arg17[%c0_42, %c18] : memref<8x290xbf16, #tpu.memory_space<vmem>>, vector<8x256xbf16>
    %c1_43 = arith.constant 1 : index
    %c0_44 = arith.constant 0 : index
    %43 = vector.load %arg3[%c1_43, %c0_44] : memref<2x256xbf16, #tpu.memory_space<vmem>>, vector<1x256xbf16>
    %44 = vector.broadcast %43 : vector<1x256xbf16> to vector<8x256xbf16>
    %45 = arith.mulf %42, %44 : vector<8x256xbf16>
    %c5 = arith.constant 5 : index
    %c0_45 = arith.constant 0 : index
    %c0_46 = arith.constant 0 : index
    %46 = vector.load %arg4[%c5, %c0_45, %c0_46] : memref<9x8x8xbf16, #tpu.memory_space<vmem>>, vector<1x8x8xbf16>
    %47 = vector.shape_cast %46 : vector<1x8x8xbf16> to vector<8x8xbf16>
    %cst_47 = arith.constant dense<0.000000e+00> : vector<8x256xf32>
    %48 = tpu.matmul %47, %45, %cst_47 {dimension_numbers = #tpu.dot_dimension_numbers<[1], [0], [0], [1], [0, 0, 1, 1], [], []>} : vector<8x8xbf16>, vector<8x256xbf16>, vector<8x256xf32> -> vector<8x256xf32>
    %49 = arith.addf %41, %48 : vector<8x256xf32>
    %c0_48 = arith.constant 0 : index
    %c32 = arith.constant 32 : index
    %50 = vector.load %arg17[%c0_48, %c32] : memref<8x290xbf16, #tpu.memory_space<vmem>>, vector<8x256xbf16>
    %c0_49 = arith.constant 0 : index
    %c0_50 = arith.constant 0 : index
    %51 = vector.load %arg3[%c0_49, %c0_50] : memref<2x256xbf16, #tpu.memory_space<vmem>>, vector<1x256xbf16>
    %52 = vector.broadcast %51 : vector<1x256xbf16> to vector<8x256xbf16>
    %53 = arith.mulf %50, %52 : vector<8x256xbf16>
    %c6 = arith.constant 6 : index
    %c0_51 = arith.constant 0 : index
    %c0_52 = arith.constant 0 : index
    %54 = vector.load %arg4[%c6, %c0_51, %c0_52] : memref<9x8x8xbf16, #tpu.memory_space<vmem>>, vector<1x8x8xbf16>
    %55 = vector.shape_cast %54 : vector<1x8x8xbf16> to vector<8x8xbf16>
    %cst_53 = arith.constant dense<0.000000e+00> : vector<8x256xf32>
    %56 = tpu.matmul %55, %53, %cst_53 {dimension_numbers = #tpu.dot_dimension_numbers<[1], [0], [0], [1], [0, 0, 1, 1], [], []>} : vector<8x8xbf16>, vector<8x256xbf16>, vector<8x256xf32> -> vector<8x256xf32>
    %57 = arith.addf %49, %56 : vector<8x256xf32>
    %c0_54 = arith.constant 0 : index
    %c33 = arith.constant 33 : index
    %58 = vector.load %arg17[%c0_54, %c33] : memref<8x290xbf16, #tpu.memory_space<vmem>>, vector<8x256xbf16>
    %c7 = arith.constant 7 : index
    %c0_55 = arith.constant 0 : index
    %c0_56 = arith.constant 0 : index
    %59 = vector.load %arg4[%c7, %c0_55, %c0_56] : memref<9x8x8xbf16, #tpu.memory_space<vmem>>, vector<1x8x8xbf16>
    %60 = vector.shape_cast %59 : vector<1x8x8xbf16> to vector<8x8xbf16>
    %cst_57 = arith.constant dense<0.000000e+00> : vector<8x256xf32>
    %61 = tpu.matmul %60, %58, %cst_57 {dimension_numbers = #tpu.dot_dimension_numbers<[1], [0], [0], [1], [0, 0, 1, 1], [], []>} : vector<8x8xbf16>, vector<8x256xbf16>, vector<8x256xf32> -> vector<8x256xf32>
    %62 = arith.addf %57, %61 : vector<8x256xf32>
    %c0_58 = arith.constant 0 : index
    %c34 = arith.constant 34 : index
    %63 = vector.load %arg17[%c0_58, %c34] : memref<8x290xbf16, #tpu.memory_space<vmem>>, vector<8x256xbf16>
    %c1_59 = arith.constant 1 : index
    %c0_60 = arith.constant 0 : index
    %64 = vector.load %arg3[%c1_59, %c0_60] : memref<2x256xbf16, #tpu.memory_space<vmem>>, vector<1x256xbf16>
    %65 = vector.broadcast %64 : vector<1x256xbf16> to vector<8x256xbf16>
    %66 = arith.mulf %63, %65 : vector<8x256xbf16>
    %c8 = arith.constant 8 : index
    %c0_61 = arith.constant 0 : index
    %c0_62 = arith.constant 0 : index
    %67 = vector.load %arg4[%c8, %c0_61, %c0_62] : memref<9x8x8xbf16, #tpu.memory_space<vmem>>, vector<1x8x8xbf16>
    %68 = vector.shape_cast %67 : vector<1x8x8xbf16> to vector<8x8xbf16>
    %cst_63 = arith.constant dense<0.000000e+00> : vector<8x256xf32>
    %69 = tpu.matmul %68, %66, %cst_63 {dimension_numbers = #tpu.dot_dimension_numbers<[1], [0], [0], [1], [0, 0, 1, 1], [], []>} : vector<8x8xbf16>, vector<8x256xbf16>, vector<8x256xf32> -> vector<8x256xf32>
    %70 = arith.addf %62, %69 : vector<8x256xf32>
    %71 = vector.shape_cast %70 : vector<8x256xf32> to vector<1x8x256xf32>
    %cst_64 = arith.constant dense<0.000000e+00> : vector<1xf32>
    %72 = vector.multi_reduction <add>, %71, %cst_64 [1, 2] : vector<1x8x256xf32> to vector<1xf32>
    %73 = vector.shape_cast %72 : vector<1xf32> to vector<1x1x1xf32>
    %74 = vector.extract %73[0, 0, 0] : f32 from vector<1x1x1xf32>
    %cst_65 = arith.constant 4.8828125E-4 : f32
    %75 = arith.mulf %74, %cst_65 : f32
    %76 = vector.broadcast %75 : f32 to vector<8x256xf32>
    %77 = arith.subf %70, %76 : vector<8x256xf32>
    %78 = arith.mulf %77, %77 : vector<8x256xf32>
    %79 = vector.shape_cast %78 : vector<8x256xf32> to vector<1x8x256xf32>
    %cst_66 = arith.constant dense<0.000000e+00> : vector<1xf32>
    %80 = vector.multi_reduction <add>, %79, %cst_66 [1, 2] : vector<1x8x256xf32> to vector<1xf32>
    %81 = vector.shape_cast %80 : vector<1xf32> to vector<1x1x1xf32>
    %82 = vector.extract %81[0, 0, 0] : f32 from vector<1x1x1xf32>
    %cst_67 = arith.constant 4.8828125E-4 : f32
    %83 = arith.mulf %82, %cst_67 : f32
    %c0_68 = arith.constant 0 : index
    %c0_69 = arith.constant 0 : index
    %84 = vector.load %arg5[%c0_68, %c0_69] : memref<8x1xf32, #tpu.memory_space<vmem>>, vector<8x1xf32>
    %cst_70 = arith.constant 9.99999974E-6 : f32
    %85 = arith.addf %83, %cst_70 : f32
    %86 = math.rsqrt %85 : f32
    %87 = vector.broadcast %86 : f32 to vector<8x1xf32>
    %88 = arith.mulf %84, %87 : vector<8x1xf32>
    %89 = vector.broadcast %88 : vector<8x1xf32> to vector<8x256xf32>
    %90 = arith.mulf %77, %89 : vector<8x256xf32>
    %c0_71 = arith.constant 0 : index
    %c0_72 = arith.constant 0 : index
    %91 = vector.load %arg6[%c0_71, %c0_72] : memref<8x1xf32, #tpu.memory_space<vmem>>, vector<8x1xf32>
    %92 = vector.broadcast %91 : vector<8x1xf32> to vector<8x256xf32>
    %93 = arith.addf %90, %92 : vector<8x256xf32>
    %94 = arith.negf %93 : vector<8x256xf32>
    %95 = math.exp %94 : vector<8x256xf32>
    %cst_73 = arith.constant 1.000000e+00 : f32
    %96 = vector.broadcast %cst_73 : f32 to vector<8x256xf32>
    %97 = arith.addf %96, %95 : vector<8x256xf32>
    %98 = arith.divf %96, %97 : vector<8x256xf32>
    %99 = arith.mulf %93, %98 : vector<8x256xf32>
    %100 = arith.truncf %99 : vector<8x256xf32> to vector<8x256xbf16>
    %c0_74 = arith.constant 0 : index
    %c17_75 = arith.constant 17 : index
    %101 = vector.load %arg17[%c0_74, %c17_75] : memref<8x290xbf16, #tpu.memory_space<vmem>>, vector<8x256xbf16>
    tpu.vector_store %arg17[%c0_74, %c17_75], %100 {strides = array<i32>} : memref<8x290xbf16, #tpu.memory_space<vmem>>, vector<8x256xbf16>,
    %c0_76 = arith.constant 0 : index
    %c0_77 = arith.constant 0 : index
    %102 = vector.load %arg17[%c0_76, %c0_77] : memref<8x290xbf16, #tpu.memory_space<vmem>>, vector<8x256xbf16>
    %c0_78 = arith.constant 0 : index
    %c0_79 = arith.constant 0 : index
    %103 = vector.load %arg3[%c0_78, %c0_79] : memref<2x256xbf16, #tpu.memory_space<vmem>>, vector<1x256xbf16>
    %104 = vector.broadcast %103 : vector<1x256xbf16> to vector<8x256xbf16>
    %105 = arith.mulf %102, %104 : vector<8x256xbf16>
    %c0_80 = arith.constant 0 : index
    %c0_81 = arith.constant 0 : index
    %c0_82 = arith.constant 0 : index
    %106 = vector.load %arg7[%c0_80, %c0_81, %c0_82] : memref<9x8x8xbf16, #tpu.memory_space<vmem>>, vector<1x8x8xbf16>
    %107 = vector.shape_cast %106 : vector<1x8x8xbf16> to vector<8x8xbf16>
    %cst_83 = arith.constant dense<0.000000e+00> : vector<8x256xf32>
    %108 = tpu.matmul %107, %105, %cst_83 {dimension_numbers = #tpu.dot_dimension_numbers<[1], [0], [0], [1], [0, 0, 1, 1], [], []>} : vector<8x8xbf16>, vector<8x256xbf16>, vector<8x256xf32> -> vector<8x256xf32>
    %c0_84 = arith.constant 0 : index
    %c1_85 = arith.constant 1 : index
    %109 = vector.load %arg17[%c0_84, %c1_85] : memref<8x290xbf16, #tpu.memory_space<vmem>>, vector<8x256xbf16>
    %c1_86 = arith.constant 1 : index
    %c0_87 = arith.constant 0 : index
    %c0_88 = arith.constant 0 : index
    %110 = vector.load %arg7[%c1_86, %c0_87, %c0_88] : memref<9x8x8xbf16, #tpu.memory_space<vmem>>, vector<1x8x8xbf16>
    %111 = vector.shape_cast %110 : vector<1x8x8xbf16> to vector<8x8xbf16>
    %cst_89 = arith.constant dense<0.000000e+00> : vector<8x256xf32>
    %112 = tpu.matmul %111, %109, %cst_89 {dimension_numbers = #tpu.dot_dimension_numbers<[1], [0], [0], [1], [0, 0, 1, 1], [], []>} : vector<8x8xbf16>, vector<8x256xbf16>, vector<8x256xf32> -> vector<8x256xf32>
    %113 = arith.addf %108, %112 : vector<8x256xf32>
    %c0_90 = arith.constant 0 : index
    %c2_91 = arith.constant 2 : index
    %114 = vector.load %arg17[%c0_90, %c2_91] : memref<8x290xbf16, #tpu.memory_space<vmem>>, vector<8x256xbf16>
    %c1_92 = arith.constant 1 : index
    %c0_93 = arith.constant 0 : index
    %115 = vector.load %arg3[%c1_92, %c0_93] : memref<2x256xbf16, #tpu.memory_space<vmem>>, vector<1x256xbf16>
    %116 = vector.broadcast %115 : vector<1x256xbf16> to vector<8x256xbf16>
    %117 = arith.mulf %114, %116 : vector<8x256xbf16>
    %c2_94 = arith.constant 2 : index
    %c0_95 = arith.constant 0 : index
    %c0_96 = arith.constant 0 : index
    %118 = vector.load %arg7[%c2_94, %c0_95, %c0_96] : memref<9x8x8xbf16, #tpu.memory_space<vmem>>, vector<1x8x8xbf16>
    %119 = vector.shape_cast %118 : vector<1x8x8xbf16> to vector<8x8xbf16>
    %cst_97 = arith.constant dense<0.000000e+00> : vector<8x256xf32>
    %120 = tpu.matmul %119, %117, %cst_97 {dimension_numbers = #tpu.dot_dimension_numbers<[1], [0], [0], [1], [0, 0, 1, 1], [], []>} : vector<8x8xbf16>, vector<8x256xbf16>, vector<8x256xf32> -> vector<8x256xf32>
    %121 = arith.addf %113, %120 : vector<8x256xf32>
    %c0_98 = arith.constant 0 : index
    %c16_99 = arith.constant 16 : index
    %122 = vector.load %arg17[%c0_98, %c16_99] : memref<8x290xbf16, #tpu.memory_space<vmem>>, vector<8x256xbf16>
    %c0_100 = arith.constant 0 : index
    %c0_101 = arith.constant 0 : index
    %123 = vector.load %arg3[%c0_100, %c0_101] : memref<2x256xbf16, #tpu.memory_space<vmem>>, vector<1x256xbf16>
    %124 = vector.broadcast %123 : vector<1x256xbf16> to vector<8x256xbf16>
    %125 = arith.mulf %122, %124 : vector<8x256xbf16>
    %c3_102 = arith.constant 3 : index
    %c0_103 = arith.constant 0 : index
    %c0_104 = arith.constant 0 : index
    %126 = vector.load %arg7[%c3_102, %c0_103, %c0_104] : memref<9x8x8xbf16, #tpu.memory_space<vmem>>, vector<1x8x8xbf16>
    %127 = vector.shape_cast %126 : vector<1x8x8xbf16> to vector<8x8xbf16>
    %cst_105 = arith.constant dense<0.000000e+00> : vector<8x256xf32>
    %128 = tpu.matmul %127, %125, %cst_105 {dimension_numbers = #tpu.dot_dimension_numbers<[1], [0], [0], [1], [0, 0, 1, 1], [], []>} : vector<8x8xbf16>, vector<8x256xbf16>, vector<8x256xf32> -> vector<8x256xf32>
    %129 = arith.addf %121, %128 : vector<8x256xf32>
    %c0_106 = arith.constant 0 : index
    %c17_107 = arith.constant 17 : index
    %130 = vector.load %arg17[%c0_106, %c17_107] : memref<8x290xbf16, #tpu.memory_space<vmem>>, vector<8x256xbf16>
    %c4_108 = arith.constant 4 : index
    %c0_109 = arith.constant 0 : index
    %c0_110 = arith.constant 0 : index
    %131 = vector.load %arg7[%c4_108, %c0_109, %c0_110] : memref<9x8x8xbf16, #tpu.memory_space<vmem>>, vector<1x8x8xbf16>
    %132 = vector.shape_cast %131 : vector<1x8x8xbf16> to vector<8x8xbf16>
    %cst_111 = arith.constant dense<0.000000e+00> : vector<8x256xf32>
    %133 = tpu.matmul %132, %130, %cst_111 {dimension_numbers = #tpu.dot_dimension_numbers<[1], [0], [0], [1], [0, 0, 1, 1], [], []>} : vector<8x8xbf16>, vector<8x256xbf16>, vector<8x256xf32> -> vector<8x256xf32>
    %134 = arith.addf %129, %133 : vector<8x256xf32>
    %c0_112 = arith.constant 0 : index
    %c18_113 = arith.constant 18 : index
    %135 = vector.load %arg17[%c0_112, %c18_113] : memref<8x290xbf16, #tpu.memory_space<vmem>>, vector<8x256xbf16>
    %c1_114 = arith.constant 1 : index
    %c0_115 = arith.constant 0 : index
    %136 = vector.load %arg3[%c1_114, %c0_115] : memref<2x256xbf16, #tpu.memory_space<vmem>>, vector<1x256xbf16>
    %137 = vector.broadcast %136 : vector<1x256xbf16> to vector<8x256xbf16>
    %138 = arith.mulf %135, %137 : vector<8x256xbf16>
    %c5_116 = arith.constant 5 : index
    %c0_117 = arith.constant 0 : index
    %c0_118 = arith.constant 0 : index
    %139 = vector.load %arg7[%c5_116, %c0_117, %c0_118] : memref<9x8x8xbf16, #tpu.memory_space<vmem>>, vector<1x8x8xbf16>
    %140 = vector.shape_cast %139 : vector<1x8x8xbf16> to vector<8x8xbf16>
    %cst_119 = arith.constant dense<0.000000e+00> : vector<8x256xf32>
    %141 = tpu.matmul %140, %138, %cst_119 {dimension_numbers = #tpu.dot_dimension_numbers<[1], [0], [0], [1], [0, 0, 1, 1], [], []>} : vector<8x8xbf16>, vector<8x256xbf16>, vector<8x256xf32> -> vector<8x256xf32>
    %142 = arith.addf %134, %141 : vector<8x256xf32>
    %c0_120 = arith.constant 0 : index
    %c32_121 = arith.constant 32 : index
    %143 = vector.load %arg17[%c0_120, %c32_121] : memref<8x290xbf16, #tpu.memory_space<vmem>>, vector<8x256xbf16>
    %c0_122 = arith.constant 0 : index
    %c0_123 = arith.constant 0 : index
    %144 = vector.load %arg3[%c0_122, %c0_123] : memref<2x256xbf16, #tpu.memory_space<vmem>>, vector<1x256xbf16>
    %145 = vector.broadcast %144 : vector<1x256xbf16> to vector<8x256xbf16>
    %146 = arith.mulf %143, %145 : vector<8x256xbf16>
    %c6_124 = arith.constant 6 : index
    %c0_125 = arith.constant 0 : index
    %c0_126 = arith.constant 0 : index
    %147 = vector.load %arg7[%c6_124, %c0_125, %c0_126] : memref<9x8x8xbf16, #tpu.memory_space<vmem>>, vector<1x8x8xbf16>
    %148 = vector.shape_cast %147 : vector<1x8x8xbf16> to vector<8x8xbf16>
    %cst_127 = arith.constant dense<0.000000e+00> : vector<8x256xf32>
    %149 = tpu.matmul %148, %146, %cst_127 {dimension_numbers = #tpu.dot_dimension_numbers<[1], [0], [0], [1], [0, 0, 1, 1], [], []>} : vector<8x8xbf16>, vector<8x256xbf16>, vector<8x256xf32> -> vector<8x256xf32>
    %150 = arith.addf %142, %149 : vector<8x256xf32>
    %c0_128 = arith.constant 0 : index
    %c33_129 = arith.constant 33 : index
    %151 = vector.load %arg17[%c0_128, %c33_129] : memref<8x290xbf16, #tpu.memory_space<vmem>>, vector<8x256xbf16>
    %c7_130 = arith.constant 7 : index
    %c0_131 = arith.constant 0 : index
    %c0_132 = arith.constant 0 : index
    %152 = vector.load %arg7[%c7_130, %c0_131, %c0_132] : memref<9x8x8xbf16, #tpu.memory_space<vmem>>, vector<1x8x8xbf16>
    %153 = vector.shape_cast %152 : vector<1x8x8xbf16> to vector<8x8xbf16>
    %cst_133 = arith.constant dense<0.000000e+00> : vector<8x256xf32>
    %154 = tpu.matmul %153, %151, %cst_133 {dimension_numbers = #tpu.dot_dimension_numbers<[1], [0], [0], [1], [0, 0, 1, 1], [], []>} : vector<8x8xbf16>, vector<8x256xbf16>, vector<8x256xf32> -> vector<8x256xf32>
    %155 = arith.addf %150, %154 : vector<8x256xf32>
    %c0_134 = arith.constant 0 : index
    %c34_135 = arith.constant 34 : index
    %156 = vector.load %arg17[%c0_134, %c34_135] : memref<8x290xbf16, #tpu.memory_space<vmem>>, vector<8x256xbf16>
    %c1_136 = arith.constant 1 : index
    %c0_137 = arith.constant 0 : index
    %157 = vector.load %arg3[%c1_136, %c0_137] : memref<2x256xbf16, #tpu.memory_space<vmem>>, vector<1x256xbf16>
    %158 = vector.broadcast %157 : vector<1x256xbf16> to vector<8x256xbf16>
    %159 = arith.mulf %156, %158 : vector<8x256xbf16>
    %c8_138 = arith.constant 8 : index
    %c0_139 = arith.constant 0 : index
    %c0_140 = arith.constant 0 : index
    %160 = vector.load %arg7[%c8_138, %c0_139, %c0_140] : memref<9x8x8xbf16, #tpu.memory_space<vmem>>, vector<1x8x8xbf16>
    %161 = vector.shape_cast %160 : vector<1x8x8xbf16> to vector<8x8xbf16>
    %cst_141 = arith.constant dense<0.000000e+00> : vector<8x256xf32>
    %162 = tpu.matmul %161, %159, %cst_141 {dimension_numbers = #tpu.dot_dimension_numbers<[1], [0], [0], [1], [0, 0, 1, 1], [], []>} : vector<8x8xbf16>, vector<8x256xbf16>, vector<8x256xf32> -> vector<8x256xf32>
    %163 = arith.addf %155, %162 : vector<8x256xf32>
    %164 = vector.shape_cast %163 : vector<8x256xf32> to vector<1x8x256xf32>
    %cst_142 = arith.constant dense<0.000000e+00> : vector<1xf32>
    %165 = vector.multi_reduction <add>, %164, %cst_142 [1, 2] : vector<1x8x256xf32> to vector<1xf32>
    %166 = vector.shape_cast %165 : vector<1xf32> to vector<1x1x1xf32>
    %167 = vector.extract %166[0, 0, 0] : f32 from vector<1x1x1xf32>
    %cst_143 = arith.constant 4.8828125E-4 : f32
    %168 = arith.mulf %167, %cst_143 : f32
    %169 = vector.broadcast %168 : f32 to vector<8x256xf32>
    %170 = arith.subf %163, %169 : vector<8x256xf32>
    %171 = arith.mulf %170, %170 : vector<8x256xf32>
    %172 = vector.shape_cast %171 : vector<8x256xf32> to vector<1x8x256xf32>
    %cst_144 = arith.constant dense<0.000000e+00> : vector<1xf32>
    %173 = vector.multi_reduction <add>, %172, %cst_144 [1, 2] : vector<1x8x256xf32> to vector<1xf32>
    %174 = vector.shape_cast %173 : vector<1xf32> to vector<1x1x1xf32>
    %175 = vector.extract %174[0, 0, 0] : f32 from vector<1x1x1xf32>
    %cst_145 = arith.constant 4.8828125E-4 : f32
    %176 = arith.mulf %175, %cst_145 : f32
    %c0_146 = arith.constant 0 : index
    %c0_147 = arith.constant 0 : index
    %177 = vector.load %arg8[%c0_146, %c0_147] : memref<8x1xf32, #tpu.memory_space<vmem>>, vector<8x1xf32>
    %cst_148 = arith.constant 9.99999974E-6 : f32
    %178 = arith.addf %176, %cst_148 : f32
    %179 = math.rsqrt %178 : f32
    %180 = vector.broadcast %179 : f32 to vector<8x1xf32>
    %181 = arith.mulf %177, %180 : vector<8x1xf32>
    %182 = vector.broadcast %181 : vector<8x1xf32> to vector<8x256xf32>
    %183 = arith.mulf %170, %182 : vector<8x256xf32>
    %c0_149 = arith.constant 0 : index
    %c0_150 = arith.constant 0 : index
    %184 = vector.load %arg9[%c0_149, %c0_150] : memref<8x1xf32, #tpu.memory_space<vmem>>, vector<8x1xf32>
    %185 = vector.broadcast %184 : vector<8x1xf32> to vector<8x256xf32>
    %186 = arith.addf %183, %185 : vector<8x256xf32>
    %cst_151 = arith.constant 2.500000e+01 : f32
    %187 = vector.broadcast %cst_151 : f32 to vector<8x256xf32>
    %188 = arith.minimumf %186, %187 : vector<8x256xf32>
    %189 = math.exp %188 : vector<8x256xf32>
    %cst_152 = arith.constant 2.000000e+00 : f32
    %190 = vector.broadcast %cst_152 : f32 to vector<8x256xf32>
    %191 = arith.addf %189, %190 : vector<8x256xf32>
    %192 = arith.mulf %189, %191 : vector<8x256xf32>
    %cst_153 = arith.constant 2.500000e+01 : f32
    %193 = vector.broadcast %cst_153 : f32 to vector<8x256xf32>
    %194 = arith.cmpf ogt, %186, %193 : vector<8x256xf32>
    %195 = arith.mulf %186, %192 : vector<8x256xf32>
    %cst_154 = arith.constant 2.000000e+00 : f32
    %196 = vector.broadcast %cst_154 : f32 to vector<8x256xf32>
    %197 = arith.addf %192, %196 : vector<8x256xf32>
    %198 = tpu.reciprocal %197 {approx = true} : vector<8x256xf32> -> vector<8x256xf32>
    %199 = arith.mulf %195, %198 : vector<8x256xf32>
    %200 = arith.select %194, %186, %199 : vector<8x256xi1>, vector<8x256xf32>
    %201 = arith.truncf %200 : vector<8x256xf32> to vector<8x256xbf16>
    %c0_155 = arith.constant 0 : index
    %c17_156 = arith.constant 17 : index
    %202 = vector.load %arg17[%c0_155, %c17_156] : memref<8x290xbf16, #tpu.memory_space<vmem>>, vector<8x256xbf16>
    tpu.vector_store %arg17[%c0_155, %c17_156], %201 {strides = array<i32>} : memref<8x290xbf16, #tpu.memory_space<vmem>>, vector<8x256xbf16>,
    %c0_157 = arith.constant 0 : index
    %c0_158 = arith.constant 0 : index
    %203 = vector.load %arg17[%c0_157, %c0_158] : memref<8x290xbf16, #tpu.memory_space<vmem>>, vector<8x256xbf16>
    %c0_159 = arith.constant 0 : index
    %c0_160 = arith.constant 0 : index
    %204 = vector.load %arg3[%c0_159, %c0_160] : memref<2x256xbf16, #tpu.memory_space<vmem>>, vector<1x256xbf16>
    %205 = vector.broadcast %204 : vector<1x256xbf16> to vector<8x256xbf16>
    %206 = arith.mulf %203, %205 : vector<8x256xbf16>
    %c0_161 = arith.constant 0 : index
    %c0_162 = arith.constant 0 : index
    %c0_163 = arith.constant 0 : index
    %207 = vector.load %arg10[%c0_161, %c0_162, %c0_163] : memref<9x4x8xbf16, #tpu.memory_space<vmem>>, vector<1x4x8xbf16>
    %208 = vector.shape_cast %207 : vector<1x4x8xbf16> to vector<4x8xbf16>
    %cst_164 = arith.constant dense<0.000000e+00> : vector<4x256xf32>
    %209 = tpu.matmul %208, %206, %cst_164 {dimension_numbers = #tpu.dot_dimension_numbers<[1], [0], [0], [1], [0, 0, 1, 1], [], []>} : vector<4x8xbf16>, vector<8x256xbf16>, vector<4x256xf32> -> vector<4x256xf32>
    %c0_165 = arith.constant 0 : index
    %c1_166 = arith.constant 1 : index
    %210 = vector.load %arg17[%c0_165, %c1_166] : memref<8x290xbf16, #tpu.memory_space<vmem>>, vector<8x256xbf16>
    %c1_167 = arith.constant 1 : index
    %c0_168 = arith.constant 0 : index
    %c0_169 = arith.constant 0 : index
    %211 = vector.load %arg10[%c1_167, %c0_168, %c0_169] : memref<9x4x8xbf16, #tpu.memory_space<vmem>>, vector<1x4x8xbf16>
    %212 = vector.shape_cast %211 : vector<1x4x8xbf16> to vector<4x8xbf16>
    %cst_170 = arith.constant dense<0.000000e+00> : vector<4x256xf32>
    %213 = tpu.matmul %212, %210, %cst_170 {dimension_numbers = #tpu.dot_dimension_numbers<[1], [0], [0], [1], [0, 0, 1, 1], [], []>} : vector<4x8xbf16>, vector<8x256xbf16>, vector<4x256xf32> -> vector<4x256xf32>
    %214 = arith.addf %209, %213 : vector<4x256xf32>
    %c0_171 = arith.constant 0 : index
    %c2_172 = arith.constant 2 : index
    %215 = vector.load %arg17[%c0_171, %c2_172] : memref<8x290xbf16, #tpu.memory_space<vmem>>, vector<8x256xbf16>
    %c1_173 = arith.constant 1 : index
    %c0_174 = arith.constant 0 : index
    %216 = vector.load %arg3[%c1_173, %c0_174] : memref<2x256xbf16, #tpu.memory_space<vmem>>, vector<1x256xbf16>
    %217 = vector.broadcast %216 : vector<1x256xbf16> to vector<8x256xbf16>
    %218 = arith.mulf %215, %217 : vector<8x256xbf16>
    %c2_175 = arith.constant 2 : index
    %c0_176 = arith.constant 0 : index
    %c0_177 = arith.constant 0 : index
    %219 = vector.load %arg10[%c2_175, %c0_176, %c0_177] : memref<9x4x8xbf16, #tpu.memory_space<vmem>>, vector<1x4x8xbf16>
    %220 = vector.shape_cast %219 : vector<1x4x8xbf16> to vector<4x8xbf16>
    %cst_178 = arith.constant dense<0.000000e+00> : vector<4x256xf32>
    %221 = tpu.matmul %220, %218, %cst_178 {dimension_numbers = #tpu.dot_dimension_numbers<[1], [0], [0], [1], [0, 0, 1, 1], [], []>} : vector<4x8xbf16>, vector<8x256xbf16>, vector<4x256xf32> -> vector<4x256xf32>
    %222 = arith.addf %214, %221 : vector<4x256xf32>
    %c0_179 = arith.constant 0 : index
    %c16_180 = arith.constant 16 : index
    %223 = vector.load %arg17[%c0_179, %c16_180] : memref<8x290xbf16, #tpu.memory_space<vmem>>, vector<8x256xbf16>
    %c0_181 = arith.constant 0 : index
    %c0_182 = arith.constant 0 : index
    %224 = vector.load %arg3[%c0_181, %c0_182] : memref<2x256xbf16, #tpu.memory_space<vmem>>, vector<1x256xbf16>
    %225 = vector.broadcast %224 : vector<1x256xbf16> to vector<8x256xbf16>
    %226 = arith.mulf %223, %225 : vector<8x256xbf16>
    %c3_183 = arith.constant 3 : index
    %c0_184 = arith.constant 0 : index
    %c0_185 = arith.constant 0 : index
    %227 = vector.load %arg10[%c3_183, %c0_184, %c0_185] : memref<9x4x8xbf16, #tpu.memory_space<vmem>>, vector<1x4x8xbf16>
    %228 = vector.shape_cast %227 : vector<1x4x8xbf16> to vector<4x8xbf16>
    %cst_186 = arith.constant dense<0.000000e+00> : vector<4x256xf32>
    %229 = tpu.matmul %228, %226, %cst_186 {dimension_numbers = #tpu.dot_dimension_numbers<[1], [0], [0], [1], [0, 0, 1, 1], [], []>} : vector<4x8xbf16>, vector<8x256xbf16>, vector<4x256xf32> -> vector<4x256xf32>
    %230 = arith.addf %222, %229 : vector<4x256xf32>
    %c0_187 = arith.constant 0 : index
    %c17_188 = arith.constant 17 : index
    %231 = vector.load %arg17[%c0_187, %c17_188] : memref<8x290xbf16, #tpu.memory_space<vmem>>, vector<8x256xbf16>
    %c4_189 = arith.constant 4 : index
    %c0_190 = arith.constant 0 : index
    %c0_191 = arith.constant 0 : index
    %232 = vector.load %arg10[%c4_189, %c0_190, %c0_191] : memref<9x4x8xbf16, #tpu.memory_space<vmem>>, vector<1x4x8xbf16>
    %233 = vector.shape_cast %232 : vector<1x4x8xbf16> to vector<4x8xbf16>
    %cst_192 = arith.constant dense<0.000000e+00> : vector<4x256xf32>
    %234 = tpu.matmul %233, %231, %cst_192 {dimension_numbers = #tpu.dot_dimension_numbers<[1], [0], [0], [1], [0, 0, 1, 1], [], []>} : vector<4x8xbf16>, vector<8x256xbf16>, vector<4x256xf32> -> vector<4x256xf32>
    %235 = arith.addf %230, %234 : vector<4x256xf32>
    %c0_193 = arith.constant 0 : index
    %c18_194 = arith.constant 18 : index
    %236 = vector.load %arg17[%c0_193, %c18_194] : memref<8x290xbf16, #tpu.memory_space<vmem>>, vector<8x256xbf16>
    %c1_195 = arith.constant 1 : index
    %c0_196 = arith.constant 0 : index
    %237 = vector.load %arg3[%c1_195, %c0_196] : memref<2x256xbf16, #tpu.memory_space<vmem>>, vector<1x256xbf16>
    %238 = vector.broadcast %237 : vector<1x256xbf16> to vector<8x256xbf16>
    %239 = arith.mulf %236, %238 : vector<8x256xbf16>
    %c5_197 = arith.constant 5 : index
    %c0_198 = arith.constant 0 : index
    %c0_199 = arith.constant 0 : index
    %240 = vector.load %arg10[%c5_197, %c0_198, %c0_199] : memref<9x4x8xbf16, #tpu.memory_space<vmem>>, vector<1x4x8xbf16>
    %241 = vector.shape_cast %240 : vector<1x4x8xbf16> to vector<4x8xbf16>
    %cst_200 = arith.constant dense<0.000000e+00> : vector<4x256xf32>
    %242 = tpu.matmul %241, %239, %cst_200 {dimension_numbers = #tpu.dot_dimension_numbers<[1], [0], [0], [1], [0, 0, 1, 1], [], []>} : vector<4x8xbf16>, vector<8x256xbf16>, vector<4x256xf32> -> vector<4x256xf32>
    %243 = arith.addf %235, %242 : vector<4x256xf32>
    %c0_201 = arith.constant 0 : index
    %c32_202 = arith.constant 32 : index
    %244 = vector.load %arg17[%c0_201, %c32_202] : memref<8x290xbf16, #tpu.memory_space<vmem>>, vector<8x256xbf16>
    %c0_203 = arith.constant 0 : index
    %c0_204 = arith.constant 0 : index
    %245 = vector.load %arg3[%c0_203, %c0_204] : memref<2x256xbf16, #tpu.memory_space<vmem>>, vector<1x256xbf16>
    %246 = vector.broadcast %245 : vector<1x256xbf16> to vector<8x256xbf16>
    %247 = arith.mulf %244, %246 : vector<8x256xbf16>
    %c6_205 = arith.constant 6 : index
    %c0_206 = arith.constant 0 : index
    %c0_207 = arith.constant 0 : index
    %248 = vector.load %arg10[%c6_205, %c0_206, %c0_207] : memref<9x4x8xbf16, #tpu.memory_space<vmem>>, vector<1x4x8xbf16>
    %249 = vector.shape_cast %248 : vector<1x4x8xbf16> to vector<4x8xbf16>
    %cst_208 = arith.constant dense<0.000000e+00> : vector<4x256xf32>
    %250 = tpu.matmul %249, %247, %cst_208 {dimension_numbers = #tpu.dot_dimension_numbers<[1], [0], [0], [1], [0, 0, 1, 1], [], []>} : vector<4x8xbf16>, vector<8x256xbf16>, vector<4x256xf32> -> vector<4x256xf32>
    %251 = arith.addf %243, %250 : vector<4x256xf32>
    %c0_209 = arith.constant 0 : index
    %c33_210 = arith.constant 33 : index
    %252 = vector.load %arg17[%c0_209, %c33_210] : memref<8x290xbf16, #tpu.memory_space<vmem>>, vector<8x256xbf16>
    %c7_211 = arith.constant 7 : index
    %c0_212 = arith.constant 0 : index
    %c0_213 = arith.constant 0 : index
    %253 = vector.load %arg10[%c7_211, %c0_212, %c0_213] : memref<9x4x8xbf16, #tpu.memory_space<vmem>>, vector<1x4x8xbf16>
    %254 = vector.shape_cast %253 : vector<1x4x8xbf16> to vector<4x8xbf16>
    %cst_214 = arith.constant dense<0.000000e+00> : vector<4x256xf32>
    %255 = tpu.matmul %254, %252, %cst_214 {dimension_numbers = #tpu.dot_dimension_numbers<[1], [0], [0], [1], [0, 0, 1, 1], [], []>} : vector<4x8xbf16>, vector<8x256xbf16>, vector<4x256xf32> -> vector<4x256xf32>
    %256 = arith.addf %251, %255 : vector<4x256xf32>
    %c0_215 = arith.constant 0 : index
    %c34_216 = arith.constant 34 : index
    %257 = vector.load %arg17[%c0_215, %c34_216] : memref<8x290xbf16, #tpu.memory_space<vmem>>, vector<8x256xbf16>
    %c1_217 = arith.constant 1 : index
    %c0_218 = arith.constant 0 : index
    %258 = vector.load %arg3[%c1_217, %c0_218] : memref<2x256xbf16, #tpu.memory_space<vmem>>, vector<1x256xbf16>
    %259 = vector.broadcast %258 : vector<1x256xbf16> to vector<8x256xbf16>
    %260 = arith.mulf %257, %259 : vector<8x256xbf16>
    %c8_219 = arith.constant 8 : index
    %c0_220 = arith.constant 0 : index
    %c0_221 = arith.constant 0 : index
    %261 = vector.load %arg10[%c8_219, %c0_220, %c0_221] : memref<9x4x8xbf16, #tpu.memory_space<vmem>>, vector<1x4x8xbf16>
    %262 = vector.shape_cast %261 : vector<1x4x8xbf16> to vector<4x8xbf16>
    %cst_222 = arith.constant dense<0.000000e+00> : vector<4x256xf32>
    %263 = tpu.matmul %262, %260, %cst_222 {dimension_numbers = #tpu.dot_dimension_numbers<[1], [0], [0], [1], [0, 0, 1, 1], [], []>} : vector<4x8xbf16>, vector<8x256xbf16>, vector<4x256xf32> -> vector<4x256xf32>
    %264 = arith.addf %256, %263 : vector<4x256xf32>
    %265 = vector.shape_cast %264 : vector<4x256xf32> to vector<1x4x256xf32>
    %cst_223 = arith.constant dense<0.000000e+00> : vector<1xf32>
    %266 = vector.multi_reduction <add>, %265, %cst_223 [1, 2] : vector<1x4x256xf32> to vector<1xf32>
    %267 = vector.shape_cast %266 : vector<1xf32> to vector<1x1x1xf32>
    %268 = vector.extract %267[0, 0, 0] : f32 from vector<1x1x1xf32>
    %cst_224 = arith.constant 9.765625E-4 : f32
    %269 = arith.mulf %268, %cst_224 : f32
    %270 = vector.broadcast %269 : f32 to vector<4x256xf32>
    %271 = arith.subf %264, %270 : vector<4x256xf32>
    %272 = arith.mulf %271, %271 : vector<4x256xf32>
    %273 = vector.shape_cast %272 : vector<4x256xf32> to vector<1x4x256xf32>
    %cst_225 = arith.constant dense<0.000000e+00> : vector<1xf32>
    %274 = vector.multi_reduction <add>, %273, %cst_225 [1, 2] : vector<1x4x256xf32> to vector<1xf32>
    %275 = vector.shape_cast %274 : vector<1xf32> to vector<1x1x1xf32>
    %276 = vector.extract %275[0, 0, 0] : f32 from vector<1x1x1xf32>
    %cst_226 = arith.constant 9.765625E-4 : f32
    %277 = arith.mulf %276, %cst_226 : f32
    %c0_227 = arith.constant 0 : index
    %c0_228 = arith.constant 0 : index
    %278 = vector.load %arg11[%c0_227, %c0_228] : memref<4x1xf32, #tpu.memory_space<vmem>>, vector<4x1xf32>
    %cst_229 = arith.constant 9.99999974E-6 : f32
    %279 = arith.addf %277, %cst_229 : f32
    %280 = math.rsqrt %279 : f32
    %281 = vector.broadcast %280 : f32 to vector<4x1xf32>
    %282 = arith.mulf %278, %281 : vector<4x1xf32>
    %283 = vector.broadcast %282 : vector<4x1xf32> to vector<4x256xf32>
    %284 = arith.mulf %271, %283 : vector<4x256xf32>
    %c0_230 = arith.constant 0 : index
    %c0_231 = arith.constant 0 : index
    %285 = vector.load %arg12[%c0_230, %c0_231] : memref<4x1xf32, #tpu.memory_space<vmem>>, vector<4x1xf32>
    %286 = vector.broadcast %285 : vector<4x1xf32> to vector<4x256xf32>
    %287 = arith.addf %284, %286 : vector<4x256xf32>
    %288 = arith.negf %287 : vector<4x256xf32>
    %289 = math.exp %288 : vector<4x256xf32>
    %cst_232 = arith.constant 1.000000e+00 : f32
    %290 = vector.broadcast %cst_232 : f32 to vector<4x256xf32>
    %291 = arith.addf %290, %289 : vector<4x256xf32>
    %292 = arith.divf %290, %291 : vector<4x256xf32>
    %293 = arith.mulf %287, %292 : vector<4x256xf32>
    %294 = arith.truncf %293 : vector<4x256xf32> to vector<4x256xbf16>
    %c0_233 = arith.constant 0 : index
    %c17_234 = arith.constant 17 : index
    %295 = vector.load %arg17[%c0_233, %c17_234] : memref<8x290xbf16, #tpu.memory_space<vmem>>, vector<4x256xbf16>
    tpu.vector_store %arg17[%c0_233, %c17_234], %294 {strides = array<i32>} : memref<8x290xbf16, #tpu.memory_space<vmem>>, vector<4x256xbf16>,
    %c0_235 = arith.constant 0 : index
    %c0_236 = arith.constant 0 : index
    %296 = vector.load %arg17[%c0_235, %c0_236] : memref<8x290xbf16, #tpu.memory_space<vmem>>, vector<4x256xbf16>
    %c0_237 = arith.constant 0 : index
    %c0_238 = arith.constant 0 : index
    %297 = vector.load %arg3[%c0_237, %c0_238] : memref<2x256xbf16, #tpu.memory_space<vmem>>, vector<1x256xbf16>
    %298 = vector.broadcast %297 : vector<1x256xbf16> to vector<4x256xbf16>
    %299 = arith.mulf %296, %298 : vector<4x256xbf16>
    %c0_239 = arith.constant 0 : index
    %c0_240 = arith.constant 0 : index
    %c0_241 = arith.constant 0 : index
    %300 = vector.load %arg13[%c0_239, %c0_240, %c0_241] : memref<9x4x4xbf16, #tpu.memory_space<vmem>>, vector<1x4x4xbf16>
    %301 = vector.shape_cast %300 : vector<1x4x4xbf16> to vector<4x4xbf16>
    %cst_242 = arith.constant dense<0.000000e+00> : vector<4x256xf32>
    %302 = tpu.matmul %301, %299, %cst_242 {dimension_numbers = #tpu.dot_dimension_numbers<[1], [0], [0], [1], [0, 0, 1, 1], [], []>} : vector<4x4xbf16>, vector<4x256xbf16>, vector<4x256xf32> -> vector<4x256xf32>
    %c0_243 = arith.constant 0 : index
    %c1_244 = arith.constant 1 : index
    %303 = vector.load %arg17[%c0_243, %c1_244] : memref<8x290xbf16, #tpu.memory_space<vmem>>, vector<4x256xbf16>
    %c1_245 = arith.constant 1 : index
    %c0_246 = arith.constant 0 : index
    %c0_247 = arith.constant 0 : index
    %304 = vector.load %arg13[%c1_245, %c0_246, %c0_247] : memref<9x4x4xbf16, #tpu.memory_space<vmem>>, vector<1x4x4xbf16>
    %305 = vector.shape_cast %304 : vector<1x4x4xbf16> to vector<4x4xbf16>
    %cst_248 = arith.constant dense<0.000000e+00> : vector<4x256xf32>
    %306 = tpu.matmul %305, %303, %cst_248 {dimension_numbers = #tpu.dot_dimension_numbers<[1], [0], [0], [1], [0, 0, 1, 1], [], []>} : vector<4x4xbf16>, vector<4x256xbf16>, vector<4x256xf32> -> vector<4x256xf32>
    %307 = arith.addf %302, %306 : vector<4x256xf32>
    %c0_249 = arith.constant 0 : index
    %c2_250 = arith.constant 2 : index
    %308 = vector.load %arg17[%c0_249, %c2_250] : memref<8x290xbf16, #tpu.memory_space<vmem>>, vector<4x256xbf16>
    %c1_251 = arith.constant 1 : index
    %c0_252 = arith.constant 0 : index
    %309 = vector.load %arg3[%c1_251, %c0_252] : memref<2x256xbf16, #tpu.memory_space<vmem>>, vector<1x256xbf16>
    %310 = vector.broadcast %309 : vector<1x256xbf16> to vector<4x256xbf16>
    %311 = arith.mulf %308, %310 : vector<4x256xbf16>
    %c2_253 = arith.constant 2 : index
    %c0_254 = arith.constant 0 : index
    %c0_255 = arith.constant 0 : index
    %312 = vector.load %arg13[%c2_253, %c0_254, %c0_255] : memref<9x4x4xbf16, #tpu.memory_space<vmem>>, vector<1x4x4xbf16>
    %313 = vector.shape_cast %312 : vector<1x4x4xbf16> to vector<4x4xbf16>
    %cst_256 = arith.constant dense<0.000000e+00> : vector<4x256xf32>
    %314 = tpu.matmul %313, %311, %cst_256 {dimension_numbers = #tpu.dot_dimension_numbers<[1], [0], [0], [1], [0, 0, 1, 1], [], []>} : vector<4x4xbf16>, vector<4x256xbf16>, vector<4x256xf32> -> vector<4x256xf32>
    %315 = arith.addf %307, %314 : vector<4x256xf32>
    %c0_257 = arith.constant 0 : index
    %c16_258 = arith.constant 16 : index
    %316 = vector.load %arg17[%c0_257, %c16_258] : memref<8x290xbf16, #tpu.memory_space<vmem>>, vector<4x256xbf16>
    %c0_259 = arith.constant 0 : index
    %c0_260 = arith.constant 0 : index
    %317 = vector.load %arg3[%c0_259, %c0_260] : memref<2x256xbf16, #tpu.memory_space<vmem>>, vector<1x256xbf16>
    %318 = vector.broadcast %317 : vector<1x256xbf16> to vector<4x256xbf16>
    %319 = arith.mulf %316, %318 : vector<4x256xbf16>
    %c3_261 = arith.constant 3 : index
    %c0_262 = arith.constant 0 : index
    %c0_263 = arith.constant 0 : index
    %320 = vector.load %arg13[%c3_261, %c0_262, %c0_263] : memref<9x4x4xbf16, #tpu.memory_space<vmem>>, vector<1x4x4xbf16>
    %321 = vector.shape_cast %320 : vector<1x4x4xbf16> to vector<4x4xbf16>
    %cst_264 = arith.constant dense<0.000000e+00> : vector<4x256xf32>
    %322 = tpu.matmul %321, %319, %cst_264 {dimension_numbers = #tpu.dot_dimension_numbers<[1], [0], [0], [1], [0, 0, 1, 1], [], []>} : vector<4x4xbf16>, vector<4x256xbf16>, vector<4x256xf32> -> vector<4x256xf32>
    %323 = arith.addf %315, %322 : vector<4x256xf32>
    %c0_265 = arith.constant 0 : index
    %c17_266 = arith.constant 17 : index
    %324 = vector.load %arg17[%c0_265, %c17_266] : memref<8x290xbf16, #tpu.memory_space<vmem>>, vector<4x256xbf16>
    %c4_267 = arith.constant 4 : index
    %c0_268 = arith.constant 0 : index
    %c0_269 = arith.constant 0 : index
    %325 = vector.load %arg13[%c4_267, %c0_268, %c0_269] : memref<9x4x4xbf16, #tpu.memory_space<vmem>>, vector<1x4x4xbf16>
    %326 = vector.shape_cast %325 : vector<1x4x4xbf16> to vector<4x4xbf16>
    %cst_270 = arith.constant dense<0.000000e+00> : vector<4x256xf32>
    %327 = tpu.matmul %326, %324, %cst_270 {dimension_numbers = #tpu.dot_dimension_numbers<[1], [0], [0], [1], [0, 0, 1, 1], [], []>} : vector<4x4xbf16>, vector<4x256xbf16>, vector<4x256xf32> -> vector<4x256xf32>
    %328 = arith.addf %323, %327 : vector<4x256xf32>
    %c0_271 = arith.constant 0 : index
    %c18_272 = arith.constant 18 : index
    %329 = vector.load %arg17[%c0_271, %c18_272] : memref<8x290xbf16, #tpu.memory_space<vmem>>, vector<4x256xbf16>
    %c1_273 = arith.constant 1 : index
    %c0_274 = arith.constant 0 : index
    %330 = vector.load %arg3[%c1_273, %c0_274] : memref<2x256xbf16, #tpu.memory_space<vmem>>, vector<1x256xbf16>
    %331 = vector.broadcast %330 : vector<1x256xbf16> to vector<4x256xbf16>
    %332 = arith.mulf %329, %331 : vector<4x256xbf16>
    %c5_275 = arith.constant 5 : index
    %c0_276 = arith.constant 0 : index
    %c0_277 = arith.constant 0 : index
    %333 = vector.load %arg13[%c5_275, %c0_276, %c0_277] : memref<9x4x4xbf16, #tpu.memory_space<vmem>>, vector<1x4x4xbf16>
    %334 = vector.shape_cast %333 : vector<1x4x4xbf16> to vector<4x4xbf16>
    %cst_278 = arith.constant dense<0.000000e+00> : vector<4x256xf32>
    %335 = tpu.matmul %334, %332, %cst_278 {dimension_numbers = #tpu.dot_dimension_numbers<[1], [0], [0], [1], [0, 0, 1, 1], [], []>} : vector<4x4xbf16>, vector<4x256xbf16>, vector<4x256xf32> -> vector<4x256xf32>
    %336 = arith.addf %328, %335 : vector<4x256xf32>
    %c0_279 = arith.constant 0 : index
    %c32_280 = arith.constant 32 : index
    %337 = vector.load %arg17[%c0_279, %c32_280] : memref<8x290xbf16, #tpu.memory_space<vmem>>, vector<4x256xbf16>
    %c0_281 = arith.constant 0 : index
    %c0_282 = arith.constant 0 : index
    %338 = vector.load %arg3[%c0_281, %c0_282] : memref<2x256xbf16, #tpu.memory_space<vmem>>, vector<1x256xbf16>
    %339 = vector.broadcast %338 : vector<1x256xbf16> to vector<4x256xbf16>
    %340 = arith.mulf %337, %339 : vector<4x256xbf16>
    %c6_283 = arith.constant 6 : index
    %c0_284 = arith.constant 0 : index
    %c0_285 = arith.constant 0 : index
    %341 = vector.load %arg13[%c6_283, %c0_284, %c0_285] : memref<9x4x4xbf16, #tpu.memory_space<vmem>>, vector<1x4x4xbf16>
    %342 = vector.shape_cast %341 : vector<1x4x4xbf16> to vector<4x4xbf16>
    %cst_286 = arith.constant dense<0.000000e+00> : vector<4x256xf32>
    %343 = tpu.matmul %342, %340, %cst_286 {dimension_numbers = #tpu.dot_dimension_numbers<[1], [0], [0], [1], [0, 0, 1, 1], [], []>} : vector<4x4xbf16>, vector<4x256xbf16>, vector<4x256xf32> -> vector<4x256xf32>
    %344 = arith.addf %336, %343 : vector<4x256xf32>
    %c0_287 = arith.constant 0 : index
    %c33_288 = arith.constant 33 : index
    %345 = vector.load %arg17[%c0_287, %c33_288] : memref<8x290xbf16, #tpu.memory_space<vmem>>, vector<4x256xbf16>
    %c7_289 = arith.constant 7 : index
    %c0_290 = arith.constant 0 : index
    %c0_291 = arith.constant 0 : index
    %346 = vector.load %arg13[%c7_289, %c0_290, %c0_291] : memref<9x4x4xbf16, #tpu.memory_space<vmem>>, vector<1x4x4xbf16>
    %347 = vector.shape_cast %346 : vector<1x4x4xbf16> to vector<4x4xbf16>
    %cst_292 = arith.constant dense<0.000000e+00> : vector<4x256xf32>
    %348 = tpu.matmul %347, %345, %cst_292 {dimension_numbers = #tpu.dot_dimension_numbers<[1], [0], [0], [1], [0, 0, 1, 1], [], []>} : vector<4x4xbf16>, vector<4x256xbf16>, vector<4x256xf32> -> vector<4x256xf32>
    %349 = arith.addf %344, %348 : vector<4x256xf32>
    %c0_293 = arith.constant 0 : index
    %c34_294 = arith.constant 34 : index
    %350 = vector.load %arg17[%c0_293, %c34_294] : memref<8x290xbf16, #tpu.memory_space<vmem>>, vector<4x256xbf16>
    %c1_295 = arith.constant 1 : index
    %c0_296 = arith.constant 0 : index
    %351 = vector.load %arg3[%c1_295, %c0_296] : memref<2x256xbf16, #tpu.memory_space<vmem>>, vector<1x256xbf16>
    %352 = vector.broadcast %351 : vector<1x256xbf16> to vector<4x256xbf16>
    %353 = arith.mulf %350, %352 : vector<4x256xbf16>
    %c8_297 = arith.constant 8 : index
    %c0_298 = arith.constant 0 : index
    %c0_299 = arith.constant 0 : index
    %354 = vector.load %arg13[%c8_297, %c0_298, %c0_299] : memref<9x4x4xbf16, #tpu.memory_space<vmem>>, vector<1x4x4xbf16>
    %355 = vector.shape_cast %354 : vector<1x4x4xbf16> to vector<4x4xbf16>
    %cst_300 = arith.constant dense<0.000000e+00> : vector<4x256xf32>
    %356 = tpu.matmul %355, %353, %cst_300 {dimension_numbers = #tpu.dot_dimension_numbers<[1], [0], [0], [1], [0, 0, 1, 1], [], []>} : vector<4x4xbf16>, vector<4x256xbf16>, vector<4x256xf32> -> vector<4x256xf32>
    %357 = arith.addf %349, %356 : vector<4x256xf32>
    %358 = vector.shape_cast %357 : vector<4x256xf32> to vector<1x4x256xf32>
    %cst_301 = arith.constant dense<0.000000e+00> : vector<1xf32>
    %359 = vector.multi_reduction <add>, %358, %cst_301 [1, 2] : vector<1x4x256xf32> to vector<1xf32>
    %360 = vector.shape_cast %359 : vector<1xf32> to vector<1x1x1xf32>
    %361 = vector.extract %360[0, 0, 0] : f32 from vector<1x1x1xf32>
    %cst_302 = arith.constant 9.765625E-4 : f32
    %362 = arith.mulf %361, %cst_302 : f32
    %363 = vector.broadcast %362 : f32 to vector<4x256xf32>
    %364 = arith.subf %357, %363 : vector<4x256xf32>
    %365 = arith.mulf %364, %364 : vector<4x256xf32>
    %366 = vector.shape_cast %365 : vector<4x256xf32> to vector<1x4x256xf32>
    %cst_303 = arith.constant dense<0.000000e+00> : vector<1xf32>
    %367 = vector.multi_reduction <add>, %366, %cst_303 [1, 2] : vector<1x4x256xf32> to vector<1xf32>
    %368 = vector.shape_cast %367 : vector<1xf32> to vector<1x1x1xf32>
    %369 = vector.extract %368[0, 0, 0] : f32 from vector<1x1x1xf32>
    %cst_304 = arith.constant 9.765625E-4 : f32
    %370 = arith.mulf %369, %cst_304 : f32
    %c0_305 = arith.constant 0 : index
    %c0_306 = arith.constant 0 : index
    %371 = vector.load %arg14[%c0_305, %c0_306] : memref<4x1xf32, #tpu.memory_space<vmem>>, vector<4x1xf32>
    %cst_307 = arith.constant 9.99999974E-6 : f32
    %372 = arith.addf %370, %cst_307 : f32
    %373 = math.rsqrt %372 : f32
    %374 = vector.broadcast %373 : f32 to vector<4x1xf32>
    %375 = arith.mulf %371, %374 : vector<4x1xf32>
    %376 = vector.broadcast %375 : vector<4x1xf32> to vector<4x256xf32>
    %377 = arith.mulf %364, %376 : vector<4x256xf32>
    %c0_308 = arith.constant 0 : index
    %c0_309 = arith.constant 0 : index
    %378 = vector.load %arg15[%c0_308, %c0_309] : memref<4x1xf32, #tpu.memory_space<vmem>>, vector<4x1xf32>
    %379 = vector.broadcast %378 : vector<4x1xf32> to vector<4x256xf32>
    %380 = arith.addf %377, %379 : vector<4x256xf32>
    %cst_310 = arith.constant 2.500000e+01 : f32
    %381 = vector.broadcast %cst_310 : f32 to vector<4x256xf32>
    %382 = arith.minimumf %380, %381 : vector<4x256xf32>
    %383 = math.exp %382 : vector<4x256xf32>
    %cst_311 = arith.constant 2.000000e+00 : f32
    %384 = vector.broadcast %cst_311 : f32 to vector<4x256xf32>
    %385 = arith.addf %383, %384 : vector<4x256xf32>
    %386 = arith.mulf %383, %385 : vector<4x256xf32>
    %cst_312 = arith.constant 2.500000e+01 : f32
    %387 = vector.broadcast %cst_312 : f32 to vector<4x256xf32>
    %388 = arith.cmpf ogt, %380, %387 : vector<4x256xf32>
    %389 = arith.mulf %380, %386 : vector<4x256xf32>
    %cst_313 = arith.constant 2.000000e+00 : f32
    %390 = vector.broadcast %cst_313 : f32 to vector<4x256xf32>
    %391 = arith.addf %386, %390 : vector<4x256xf32>
    %392 = tpu.reciprocal %391 {approx = true} : vector<4x256xf32> -> vector<4x256xf32>
    %393 = arith.mulf %389, %392 : vector<4x256xf32>
    %394 = arith.select %388, %380, %393 : vector<4x256xi1>, vector<4x256xf32>
    %c0_314 = arith.constant 0 : index
    %c0_315 = arith.constant 0 : index
    %c0_316 = arith.constant 0 : index
    %395 = vector.load %arg16[%c0_314, %c0_315, %c0_316] : memref<1x4x256xf32, #tpu.memory_space<vmem>>, vector<1x4x256xf32>
    %396 = vector.shape_cast %395 : vector<1x4x256xf32> to vector<4x256xf32>
    %397 = vector.shape_cast %394 : vector<4x256xf32> to vector<1x4x256xf32>
    tpu.vector_store %arg16[%c0_314, %c0_315, %c0_316], %397 {strides = array<i32>} : memref<1x4x256xf32, #tpu.memory_space<vmem>>, vector<1x4x256xf32>,
    return
  }
  func.func @transform_0(%arg0: i32) -> (i32, i32, i32) {
    %c0_i32 = arith.constant 0 : i32
    %c0_i32_0 = arith.constant 0 : i32
    %c0_i32_1 = arith.constant 0 : i32
    return %arg0, %c0_i32, %c0_i32_0 : i32, i32, i32
  }
  func.func @transform_1(%arg0: i32) -> (i32, i32, i32) {
    %c0_i32 = arith.constant 0 : i32
    %c0_i32_0 = arith.constant 0 : i32
    %c0_i32_1 = arith.constant 0 : i32
    return %arg0, %c0_i32, %c0_i32_0 : i32, i32, i32
  }
  func.func @transform_2(%arg0: i32) -> (i32, i32) {
    %c0_i32 = arith.constant 0 : i32
    %c0_i32_0 = arith.constant 0 : i32
    %c0_i32_1 = arith.constant 0 : i32
    return %c0_i32, %c0_i32_0 : i32, i32
  }
  func.func @transform_3(%arg0: i32) -> (i32, i32, i32) {
    %c0_i32 = arith.constant 0 : i32
    %c0_i32_0 = arith.constant 0 : i32
    %c0_i32_1 = arith.constant 0 : i32
    %c0_i32_2 = arith.constant 0 : i32
    return %c0_i32, %c0_i32_0, %c0_i32_1 : i32, i32, i32
  }
  func.func @transform_4(%arg0: i32) -> (i32, i32) {
    %c0_i32 = arith.constant 0 : i32
    %c0_i32_0 = arith.constant 0 : i32
    %c0_i32_1 = arith.constant 0 : i32
    return %c0_i32, %c0_i32_0 : i32, i32
  }
  func.func @transform_5(%arg0: i32) -> (i32, i32) {
    %c0_i32 = arith.constant 0 : i32
    %c0_i32_0 = arith.constant 0 : i32
    %c0_i32_1 = arith.constant 0 : i32
    return %c0_i32, %c0_i32_0 : i32, i32
  }
  func.func @transform_6(%arg0: i32) -> (i32, i32, i32) {
    %c0_i32 = arith.constant 0 : i32
    %c0_i32_0 = arith.constant 0 : i32
    %c0_i32_1 = arith.constant 0 : i32
    %c0_i32_2 = arith.constant 0 : i32
    return %c0_i32, %c0_i32_0, %c0_i32_1 : i32, i32, i32
  }
  func.func @transform_7(%arg0: i32) -> (i32, i32) {
    %c0_i32 = arith.constant 0 : i32
    %c0_i32_0 = arith.constant 0 : i32
    %c0_i32_1 = arith.constant 0 : i32
    return %c0_i32, %c0_i32_0 : i32, i32
  }
  func.func @transform_8(%arg0: i32) -> (i32, i32) {
    %c0_i32 = arith.constant 0 : i32
    %c0_i32_0 = arith.constant 0 : i32
    %c0_i32_1 = arith.constant 0 : i32
    return %c0_i32, %c0_i32_0 : i32, i32
  }
  func.func @transform_9(%arg0: i32) -> (i32, i32, i32) {
    %c0_i32 = arith.constant 0 : i32
    %c0_i32_0 = arith.constant 0 : i32
    %c0_i32_1 = arith.constant 0 : i32
    %c0_i32_2 = arith.constant 0 : i32
    return %c0_i32, %c0_i32_0, %c0_i32_1 : i32, i32, i32
  }
  func.func @transform_10(%arg0: i32) -> (i32, i32) {
    %c0_i32 = arith.constant 0 : i32
    %c0_i32_0 = arith.constant 0 : i32
    %c0_i32_1 = arith.constant 0 : i32
    return %c0_i32, %c0_i32_0 : i32, i32
  }
  func.func @transform_11(%arg0: i32) -> (i32, i32) {
    %c0_i32 = arith.constant 0 : i32
    %c0_i32_0 = arith.constant 0 : i32
    %c0_i32_1 = arith.constant 0 : i32
    return %c0_i32, %c0_i32_0 : i32, i32
  }
  func.func @transform_12(%arg0: i32) -> (i32, i32, i32) {
    %c0_i32 = arith.constant 0 : i32
    %c0_i32_0 = arith.constant 0 : i32
    %c0_i32_1 = arith.constant 0 : i32
    %c0_i32_2 = arith.constant 0 : i32
    return %c0_i32, %c0_i32_0, %c0_i32_1 : i32, i32, i32
  }
  func.func @transform_13(%arg0: i32) -> (i32, i32) {
    %c0_i32 = arith.constant 0 : i32
    %c0_i32_0 = arith.constant 0 : i32
    %c0_i32_1 = arith.constant 0 : i32
    return %c0_i32, %c0_i32_0 : i32, i32
  }
  func.func @transform_14(%arg0: i32) -> (i32, i32) {
    %c0_i32 = arith.constant 0 : i32
    %c0_i32_0 = arith.constant 0 : i32
    %c0_i32_1 = arith.constant 0 : i32
    return %c0_i32, %c0_i32_0 : i32, i32
  }
  func.func @transform_15(%arg0: i32) -> (i32, i32, i32) {
    %c0_i32 = arith.constant 0 : i32
    %c0_i32_0 = arith.constant 0 : i32
    %c0_i32_1 = arith.constant 0 : i32
    return %arg0, %c0_i32, %c0_i32_0 : i32, i32, i32
  }
}

</mosaic_0001>

<bundles_post_ra>
// kernel: tpu_custom_call.1
= control target key start
LH: loop header
LB: loop body
LE: loop exit
PB: predicated region body
PF: predicated region fallthrough
CT: control target
= control target key end

     0   :  { %s5391_s0 = inlined_call_operand.vmem [shape: bf16[2,4,256], index: 0, kind: input, shape index: {}]   ;;  %s5392_s1 = inlined_call_operand.vmem [shape: bf16[2,4,256], index: 1, kind: input, shape index: {}]   ;;  %s5393_s2 = inlined_call_operand.vmem [shape: bf16[2,256], index: 2, kind: input, shape index: {}]   ;;  %s5394_s3 = inlined_call_operand.vmem [shape: bf16[9,8,8], index: 3, kind: input, shape index: {}]   ;;  %s5395_s4 = inlined_call_operand.vmem [shape: f32[8,1], index: 4, kind: input, shape index: {}]   ;;  %s5396_s5 = inlined_call_operand.vmem [shape: f32[8,1], index: 5, kind: input, shape index: {}]   ;;  %s5397_s6 = inlined_call_operand.vmem [shape: bf16[9,8,8], index: 6, kind: input, shape index: {}]   ;;  %s5398_s7 = inlined_call_operand.vmem [shape: f32[8,1], index: 7, kind: input, shape index: {}]   ;;  %s5399_s8 = inlined_call_operand.vmem [shape: f32[8,1], index: 8, kind: input, shape index: {}]   ;;  %s5400_s9 = inlined_call_operand.vmem [shape: bf16[9,4,8], index: 9, kind: input, shape index: {}]   ;;  %s5401_s10 = inlined_call_operand.vmem [shape: f32[4,1], index: 10, kind: input, shape index: {}]   ;;  %s5402_s11 = inlined_call_operand.vmem [shape: f32[4,1], index: 11, kind: input, shape index: {}]   ;;  %s5403_s12 = inlined_call_operand.vmem [shape: bf16[9,4,4], index: 12, kind: input, shape index: {}]   ;;  %s5404_s13 = inlined_call_operand.vmem [shape: f32[4,1], index: 13, kind: input, shape index: {}]   ;;  %s5405_s14 = inlined_call_operand.vmem [shape: f32[4,1], index: 14, kind: input, shape index: {}]   ;;  %s5406_s15 = inlined_call_operand.hbm [shape: f32[2,4,256], index: 15, kind: output, shape index: {}]  }
   0x1   :  { %5452 = sst [smem:[#allocation14_spill]] %s5391_s0 }
   0x2   :  { %5453 = sst [smem:[#allocation15_spill]] %s5392_s1 }
   0x3   :  { %5454 = sst [smem:[#allocation16_spill]] %s5394_s3 }
   0x4   :  { %5455 = sst [smem:[#allocation17_spill]] %s5395_s4 }
   0x5   :  { %5456 = sst [smem:[#allocation18_spill]] %s5396_s5 }
   0x6   :  { %5457 = sst [smem:[#allocation19_spill]] %s5397_s6 }
   0x7   :  { %5458 = sst [smem:[#allocation20_spill]] %s5399_s8 }
   0x8   :  { %5459 = sst [smem:[#allocation21_spill]] %s5406_s15 }
   0x9   :  { %20 = vsyncpa [#allocation4], 0 }
   0xa   :  { %22 = vsyncpa [#allocation4 + $0x1], 0  ;;  %s4625_s18 = smov 0   ;;  %s4627_s19 = smov 0  }
   0xb   :  { %s4629_s20 = smov 0   ;;  %s4631_s21 = smov 0  }
   0xc LB: > { %5460 = sst [smem:[#allocation6_spill]] %s4513_s18  ;;  %s4646_s22 = sadd.s32 4294967295, %s4525_s21   ;;  %s4525_s21 = sphi %s4631_s21, %s5533_s21   ;;  %s4521_s20 = sphi %s4629_s20, %s5535_s20   ;;  %s4517_s19 = sphi %s4627_s19, %s5537_s19   ;;  %s4513_s18 = sphi %s4625_s18, %s5536_s18  }
   0xd   : > { %5461 = sst [smem:[#allocation7_spill]] %s4521_s20  ;;  %s3954_s23 = sadd.s32 4294967294, %s4525_s21  }
   0xe   : > { %5462 = sst [smem:[#allocation8_spill]] %s4525_s21  ;;  %s4650_s24 = sadd.s32 1, %s4525_s21  }
   0xf   : > { %5463 = sst [smem:[#allocation9_spill]] %s4646_s22  ;;  %s360_s25 = sadd.s32 1, %s4521_s20 }
  0x10   : > { %5464 = sst [smem:[#allocation10_spill]] %s4650_s24  ;;  %s357_s26 = ssub.s32 %s4525_s21, %s4650_s24 }
  0x11   : > { %p370_p0 = scmp.ne.s32.totalorder %s4521_s20, %s4517_s19  ;;  %p358_p1 = scmp.eq.s32.totalorder %s357_s26, 0 }
  0x12   : > { %p371_p2 = scmp.eq.s32.totalorder %s4646_s22, 1  ;;  %p376_p3 = scmp.ne.s32.totalorder %s4517_s19, %s4513_s18 }
  0x13   : > { %p377_p4 = scmp.eq.s32.totalorder %s3954_s23, 1  ;;  %p3957_p7 = scmp.ge.s32.totalorder %s4525_s21, 1 }
  0x14   : > { %s4661_s27 = scalar_select %p358_p1, %s4521_s20, %s360_s25  }
  0x15   : > { %p4663_p5 = por %p371_p2, %p370_p0  ;;  %p4667_p6 = por %p377_p4, %p376_p3 }
  0x16   : > { %5465 = sst [smem:[#allocation11_spill]] %s4661_s27  ;;  %p450_p8 = scmp.lt.s32.totalorder %s4525_s21, 3 }
  0x17   : > { %s5466_s28 = scalar_select %p4663_p5, 1, 0 }
  0x18   : > { %s5468_s29 = scalar_select %p4667_p6, 1, 0 }
  0x19   : > { %5467 = sst [smem:[#allocation12_spill]] %s5466_s28  ;;  %p451_p9 = pnand %p3957_p7, %p450_p8 }
  0x1a   : > { %5469 = sst [smem:[#allocation13_spill]] %s5468_s29  ;;  %p503_p10 = scmp.lt.s32.totalorder (!%p451_p9), %s4646_s22, 1  ;;  %v546_v0 = vlaneseq (!%p451_p9)  ;;  %v4527_v1 = vmov (!%p451_p9), 1983009808   ;;  %v4528_v3 = vmov (!%p451_p9), 1966171168  }
  0x1b   : > { %454 = sbr.rel (%p451_p9) target bundleno = 5117 (0x13fd), region = 80  ;;  %v544_v2 = vunpack.c.l.s4 (!%p451_p9), %v4527_v1  ;;  %v574_v4 = vunpack.c.l.s4 (!%p451_p9), %v4528_v3  ;;  %v3976_v5 = vld.sshfl [vmem:[%s5393_s2] sm:$0x11 pattern:$0x75316420] (!%p451_p9)  ;;  %vm514_vm0 = vcmask (!%p451_p9), 134144  }
  0x1c   : > { %v547_v6 = vshrl.u32 (!%p451_p9), %v546_v0, 7  ;;  %v745_v9 = vcombine.high (!%p451_p9), %v3976_v5, %v3976_v5  ;;  %v4529_v10 = vmov (!%p451_p9), 0   ;;  %vm516_vm1 = vcmask (!%p451_p9), 273544   ;;  %s5470_s0 = sld [smem:[#allocation14_spill]] (!%p451_p9)  ;;  %s5471_s1 = sld [smem:[#allocation15_spill]] (!%p451_p9) }
  0x1d   : > { %v545_v7 = vunpack.c.0.s8 (!%p451_p9), %v544_v2  ;;  %v575_v8 = vunpack.c.0.s8 (!%p451_p9), %v574_v4  ;;  %515 = vst.msk [vmem:[#allocation2] sm:$0xf] (!%p451_p9), %vm514_vm0, %v4529_v10  ;;  %672 = vmatprep.mubr.bf16.mxu0 (!%p451_p9), %v4529_v10  ;;  %4402 = vset.pattern.permute.xlu0 (!%p451_p9), %v4529_v10  ;;  %s5410_s27 = smov (!%p451_p9), 18   ;;  %vm534_vm2 = vcmask (!%p451_p9), 1041544   ;;  %vm535_vm3 = vcmask (!%p451_p9), 1045508   ;;  %s5408_s25 = smov (!%p451_p9), 127  }
  0x1e   : > { %517 = vst.msk [vmem:[#allocation2 + $0x8] sm:$0xf] (!%p451_p9), %vm516_vm1, %v4529_v10  ;;  %4403 = vset.pattern.permute.xlu1 (!%p451_p9), %v4529_v10  ;;  %1505 = vmatprep.mubr.bf16.mxu1 (!%p451_p9), %v4529_v10  ;;  %v4696_v17 = vsub.s32 (!%p451_p9), 0, %v547_v6  ;;  %vm530_vm4 = vcmask (!%p451_p9), 138240   ;;  %vm5428_vm5 = vcmask (!%p451_p9), 132096   ;;  %vm4713_vm6 = vmor (!%p451_p9), %vm535_vm3, %vm534_vm2  ;;  %vm556_vm7 = vcmask (!%p451_p9), 1043594  }
  0x1f   : > { %v548_v11 = vsub.s32 (!%p451_p9), %v545_v7, %v547_v6  ;;  %v4691_v12 = vsub.s32 (!%p451_p9), %v575_v8, %v547_v6  ;;  %vm557_vm8 = vcmask (!%p451_p9), 1047558   ;;  %vm560_vm9 = vcmask (!%p451_p9), 134146   ;;  %s5437_s26 = smov (!%p451_p9), 32   ;;  %s5412_s16 = smov (!%p451_p9), 34  }
  0x20   : > { %vm558_vm10 = vmor (!%p451_p9), %vm557_vm8, %vm556_vm7  ;;  %vm784_vm11 = vcmask (!%p451_p9), 15360   ;;  %vm866_vm12 = vcmask (!%p451_p9), 130048   ;;  %vm1017_vm13 = vcmask (!%p451_p9), 146432   ;;  %vm626_vm14 = vcmask (!%p451_p9), 1039360   ;;  %s5474_s3 = sld [smem:[#allocation16_spill]] (!%p451_p9)  ;;  %s5475_s5 = sld [smem:[#allocation18_spill]] (!%p451_p9) }
  0x21   : > { %v752_v15 = vrot.slane (!%p451_p9), %v3976_v5, %v4691_v12  ;;  %v759_v16 = vrot.slane (!%p451_p9), %v745_v9, %v4691_v12  ;;  %vm1097_vm15 = vcmask (!%p451_p9), 261120   ;;  %vm633_vm1 = vcmask (!%p451_p9), 1043456   ;;  %s5476_s4 = sld [smem:[#allocation17_spill]] (!%p451_p9)  ;;  %s5492_s6 = sld [smem:[#allocation19_spill]] (!%p451_p9) }
  0x22   : > { %s504_s17 = scalar_select %p503_p10, %s4646_s22, 1  ;;  %vm629_vm2 = vcmask 64512   ;;  %vm806_vm3 = vcmask 1031168   ;;  %vm1240_vm7 = vcmask 277504   ;;  %vm5448_vm8 = vcmask 916480  }
  0x23   : > { %v761_v19 = vshrl.u32 %v752_v15, 16  ;;  %v769_v20 = vshrl.u32 %v759_v16, 16  ;;  %v588_v21 = vpack.i.b16 %v752_v15, %v752_v15  ;;  %v595_v22 = vpack.i.b16 %v759_v16, %v759_v16  ;;  %s5493_s18 = smov 94   ;;  %s5504_s8 = sld [smem:[#allocation20_spill]] }
  0x24   : > { %s4188_s23 = sshll.u32 %s504_s17, 2  ;;  %s5435_s17 = smov 17  }
  0x25   : > { %s507_s30 = scalar_lea.vmem %s5470_s0, %s4188_s23  ;;  %s512_s20 = scalar_lea.vmem %s5471_s1, %s4188_s23  ;;  %v762_v23 = vpack.i.b16 %v761_v19, %v761_v19  ;;  %v770_v24 = vpack.i.b16 %v769_v20, %v769_v20  ;;  %v593_v27 = vrot.slane %v588_v21, %v4696_v17  ;;  %v600_v28 = vrot.slane %v595_v22, %v4696_v17 }
  0x26   : > { %v3963_v13 = vld.sshfl [vmem:[%s507_s30] sm:$0x33 pattern:$0x76325410]  ;;  %s5431_s23 = smov 16   ;;  %s5420_s30 = smov 126  }
  0x27   : > { %v4404_v14 = vld [vmem:[%s512_s20] ss:$0 sps:$4 sm:$0xff]   ;;  %527 = vrot.lane.b32.xlu0 %v3963_v13, %s5435_s17  ;;  %v767_v25 = vrot.slane %v762_v23, %v4696_v17  ;;  %v775_v26 = vrot.slane %v770_v24, %v4696_v17  ;;  %s5433_s20 = smov 2   ;;  %v4709_v30 = vcombine.low %v593_v27, %v600_v28  ;;  %v3966_v20 = vld [vmem:[%s5474_s3 + $0x4] sm:$0xf]  ;;  %s5487_s0 = smov 112  }
  0x28   : > { %v549_v18 = vrot.slane %v4404_v14, %v548_v11  ;;  %s5488_s1 = smov 111  }
  0x29   : > { %v4703_v29 = vcombine.low %v767_v25, %v775_v26 }
  0x2b   : > { %550 = vrot.lane.b32.xlu0 %v549_v18, %s5435_s17  ;;  %781 = vrot.lane.b32.xlu1 %v4703_v29, %s5433_s20  ;;  %s5478_s17 = smov 17   ;;  %s5479_s20 = smov 2  }
  0x2f   : > { %1014 = vrot.lane.b32.xlu0 %v4703_v29, %s5410_s27  ;;  %863 = vrot.lane.b32.xlu1 %v4709_v30, %s5431_s23  ;;  %s5416_s27 = smov 111  }
  0x99   : > { %v528_v31 = vpop.permute.xlu0 %527 }
  0x9a   : > { %v529_v33 = vrot.slane %v528_v31, 4 }
  0x9c   : > { %v531_v34 = vsel %vm530_vm4, %v529_v33, %v528_v31  ;;  %539 = vst.msk [vmem:[#allocation2 + $0x8] sm:$0x3] %vm5428_vm5, %v529_v33  ;;  %vm5430_vm5 = vcmask 785408  }
  0x9d   : > { %537 = vst.msk [vmem:[#allocation2] sm:$0x33] %vm4713_vm6, %v531_v34  ;;  %v551_v35 = vpop.permute.xlu0 %550  ;;  %v782_v38 = vpop.permute.xlu1 %781 }
  0x9e   : > { %v552_v36 = vrot.slane %v551_v35, 4  ;;  %v783_v39 = vrot.slane %v782_v38, 4 }
  0xa0   : > { %v553_v37 = vsel %vm530_vm4, %v552_v36, %v551_v35  ;;  %561 = vst.msk [vmem:[#allocation2 + $0x8] sm:$0xc] %vm560_vm9, %v552_v36  ;;  %v785_v43 = vsel %vm784_vm11, %v783_v39, %v782_v38  ;;  %vm5441_vm9 = vcmask 908288  }
  0xa1   : > { %559 = vst.msk [vmem:[#allocation2] sm:$0xcc] %vm558_vm10, %v553_v37  ;;  %v864_v45 = vpop.permute.xlu1 %863  ;;  %v1015_v55 = vpop.permute.xlu0 %1014  ;;  %vm5429_vm10 = vcmask 900096  }
  0xa2   : > { %v865_v48 = vrot.slane %v864_v45, 4  ;;  %v1016_v60 = vrot.slane %v1015_v55, 4 }
  0xa4   : > { %v867_v52 = vsel %vm866_vm12, %v865_v48, %v864_v45  ;;  %v1018_v62 = vsel %vm1017_vm13, %v1016_v60, %v1015_v55 }
  0xa7   : > { %v609_v44 = vld [vmem:[#allocation2 + $0x8] sm:$0xf] }
  0xa8   : > { %v4722_v40 = vld [vmem:[#allocation2] sm:$0xff]  ;;  %v3969_v47 = vcombine.low %v609_v44, %v609_v44  ;;  %v789_v51 = vmul.bf16 %v783_v39, %v609_v44  ;;  %v4748_v56 = vld [vmem:[#allocation2 + $0x8] sm:$0xf] }
  0xa9   : > { %v4726_v41 = vcombine.high %v4722_v40, %v4722_v40  ;;  %v4730_v42 = vcombine.low %v4722_v40, %v4722_v40  ;;  %v788_v46 = vmul.bf16 %v785_v43, %v4722_v40  ;;  %v870_v53 = vmul.bf16 %v867_v52, %v4722_v40  ;;  %v608_v43 = vld [vmem:[%s5474_s3] sm:$0xf] }
  0xaa   : > { %v3981_v54 = vcombine.low %v789_v51, %v789_v51  ;;  %v871_v59 = vmul.bf16 %v865_v48, %v4748_v56  ;;  %v1021_v63 = vmul.bf16 %v1018_v62, %v4722_v40  ;;  %v3993_v0 = vcombine.low %v4748_v56, %v4748_v56  ;;  %v3978_v51 = vld [vmem:[%s5474_s3 + $0x8] sm:$0xf] }
  0xab   : > { %622 = vrot.lane.b32.xlu0 %v4726_v41, %s5408_s25  ;;  %620 = vrot.lane.b32.xlu1 %v4730_v42, %s5408_s25  ;;  %v3980_v49 = vcombine.high %v788_v46, %v788_v46  ;;  %v3979_v50 = vcombine.low %v788_v46, %v788_v46  ;;  %v3986_v57 = vcombine.high %v870_v53, %v870_v53 }
  0xac   : > { %v3985_v58 = vcombine.low %v870_v53, %v870_v53  ;;  %v3987_v61 = vcombine.low %v871_v59, %v871_v59  ;;  %v3998_v1 = vcombine.high %v1021_v63, %v1021_v63  ;;  %v3997_v2 = vcombine.low %v1021_v63, %v1021_v63 }
  0xad   : > { %v1022_v3 = vmul.bf16 %v1016_v60, %v4748_v56  ;;  %v607_v7 = vmul.bf16 %v4709_v30, %v4722_v40 }
  0xaf   : > { %1094 = vrot.lane.b32.xlu0 %v4709_v30, %s5437_s26  ;;  %624 = vrot.lane.b32.xlu1 %v3969_v47, %s5408_s25  ;;  %s5418_s25 = smov 112   ;;  %v3999_v4 = vcombine.low %v1022_v3, %v1022_v3  ;;  %v3973_v16 = vcombine.high %v607_v7, %v607_v7  ;;  %v3972_v18 = vcombine.low %v607_v7, %v607_v7 }
  0xb1   : > { %v690_v24 = vsel %vm633_vm1, %v3972_v18, 0 }
  0xb3   : > { %802 = vrot.lane.b32.xlu0 %v3980_v49, %s5420_s30  ;;  %800 = vrot.lane.b32.xlu1 %v3979_v50, %s5420_s30 }
  0xb7   : > { %1237 = vrot.lane.b32.xlu0 %v4703_v29, %s5412_s16  ;;  %804 = vrot.lane.b32.xlu1 %v3981_v54, %s5420_s30  ;;  %s5414_s16 = smov 110   ;;  %s5484_s30 = smov 127  }
  0xbb   : > { %884 = vrot.lane.b32.xlu0 %v3986_v57, %s5418_s25  ;;  %882 = vrot.lane.b32.xlu1 %v3985_v58, %s5418_s25  ;;  %v3984_v58 = vld [vmem:[%s5474_s3 + $0xc] sm:$0xf] }
  0xbf   : > { %953 = vrot.lane.b32.xlu0 %v4730_v42, %s5416_s27  ;;  %886 = vrot.lane.b32.xlu1 %v3987_v61, %s5418_s25  ;;  %s5424_s25 = smov 94  }
  0xc3   : > { %957 = vrot.lane.b32.xlu0 %v3993_v0, %s5416_s27  ;;  %955 = vrot.lane.b32.xlu1 %v4726_v41, %s5416_s27  ;;  %s5426_s27 = smov 96  }
  0xc7   : > { %1035 = vrot.lane.b32.xlu0 %v3998_v1, %s5414_s16  ;;  %1033 = vrot.lane.b32.xlu1 %v3997_v2, %s5414_s16  ;;  %v3996_v2 = vld [vmem:[%s5474_s3 + $0x14] sm:$0xf] }
  0xcb   : > { %1037 = vrot.lane.b32.xlu1 %v3999_v4, %s5414_s16  ;;  %s5422_s16 = smov 95  }
 0x11d   : > { %v621_v5 = vpop.permute.xlu1 %620  ;;  %v623_v6 = vpop.permute.xlu0 %622 }
 0x11e   : > { %v627_v8 = vsel %vm626_vm14, %v621_v5, %v623_v6 }
 0x11f   : > { %v635_v15 = vsel %vm633_vm1, %v627_v8, 0 }
 0x121   : > { %v625_v9 = vpop.permute.xlu1 %624  ;;  %v1095_v11 = vpop.permute.xlu0 %1094 }
 0x122   : > { %v1096_v13 = vrot.slane %v1095_v11, 4  ;;  %v628_v14 = vsel %vm626_vm14, %v623_v6, %v625_v9 }
 0x123   : > { %3970 = vmatprep.subr.msk.bf16.mxu0 %vm633_vm1, %v628_v14 }
 0x124   : > { %v1098_v19 = vsel %vm1097_vm15, %v1096_v13, %v1095_v11  ;;  %641 = vmatpush1.bf16.msra.mxu0 %v635_v15  ;;  %v1102_v27 = vmul.bf16 %v1096_v13, %v4748_v56  ;;  %v4002_v11 = vld [vmem:[%s5474_s3 + $0x18] sm:$0xf] }
 0x125   : > { %v1101_v21 = vmul.bf16 %v1098_v19, %v4722_v40  ;;  %v801_v22 = vpop.permute.xlu1 %800  ;;  %3974 = vmatprep.subr.msk.bf16.mxu0 %vm633_vm1, %v3973_v16  ;;  %v803_v23 = vpop.permute.xlu0 %802 }
 0x126   : > { %v4005_v35 = vcombine.low %v1102_v27, %v1102_v27  ;;  %v807_v39 = vsel %vm806_vm3, %v801_v22, %v803_v23 }
 0x127   : > { %3971 = vmatmul.mubr.msk.bf16.vlgmr.msra.gmra.mrb[0].mxu0 %vm629_vm2, %v3966_v20  ;;  %v4004_v25 = vcombine.high %v1101_v21, %v1101_v21  ;;  %v4003_v26 = vcombine.low %v1101_v21, %v1101_v21 }
 0x128   : > { %696 = vmatpush1.bf16.msra.mxu0 %v690_v24  ;;  %727 = vmatprep.mubr.bf16.mxu0 %v4529_v10  ;;  %v4008_v24 = vld [vmem:[%s5474_s3 + $0x1c] sm:$0xf] }
 0x129   : > { %v805_v28 = vpop.permute.xlu1 %804  ;;  %1115 = vrot.lane.b32.xlu1 %v4004_v25, %s5426_s27  ;;  %1113 = vrot.lane.b32.xlu0 %v4003_v26, %s5426_s27  ;;  %v1238_v31 = vpop.permute.xlu0 %1237  ;;  %v4011_v26 = vld [vmem:[%s5474_s3 + $0x20] sm:$0xf] }
 0x12a   : > { %v808_v33 = vsel %vm806_vm3, %v803_v23, %v805_v28  ;;  %v1239_v34 = vrot.slane %v1238_v31, 4 }
 0x12b   : > { %3982 = vmatprep.subr.msk.bf16.mxu0 %vm633_vm1, %v808_v33 }
 0x12c   : > { %v1241_v36 = vsel %vm1240_vm7, %v1239_v34, %v1238_v31  ;;  %v1245_v48 = vmul.bf16 %v1239_v34, %v4748_v56 }
 0x12d   : > { %v883_v37 = vpop.permute.xlu1 %882  ;;  %1176 = vrot.lane.b32.xlu1 %v4730_v42, %s5422_s16  ;;  %1117 = vrot.lane.b32.xlu0 %v4005_v35, %s5426_s27  ;;  %v1244_v38 = vmul.bf16 %v1241_v36, %v4722_v40  ;;  %v885_v44 = vpop.permute.xlu0 %884  ;;  %v813_v40 = vsel %vm633_vm1, %v807_v39, 0  ;;  %s5477_s27 = smov 32  }
 0x12e   : > { %v4014_v49 = vcombine.low %v1245_v48, %v1245_v48  ;;  %v889_v50 = vsel %vm5448_vm8, %v883_v37, %v885_v44 }
 0x12f   : > { %v4013_v46 = vcombine.high %v1244_v38, %v1244_v38  ;;  %v4012_v47 = vcombine.low %v1244_v38, %v1244_v38  ;;  %v895_v54 = vsel %vm633_vm1, %v889_v50, 0 }
 0x131   : > { %v887_v45 = vpop.permute.xlu1 %886  ;;  %1180 = vrot.lane.b32.xlu1 %v3993_v0, %s5422_s16  ;;  %1178 = vrot.lane.b32.xlu0 %v4726_v41, %s5422_s16  ;;  %v954_v41 = vpop.permute.xlu0 %953  ;;  %v3990_v0 = vld [vmem:[%s5474_s3 + $0x10] sm:$0xf]  ;;  %s5489_s3 = smov 110  }
 0x132   : > { %v890_v42 = vsel %vm5448_vm8, %v885_v44, %v887_v45 }
 0x133   : > { %3975 = vmatmul.mubr.msk.bf16.vlgmr.msra.gmra.mrb[0].mxu0 %vm629_vm2, %v608_v43 }
 0x134   : > { %819 = vmatpush1.bf16.msra.mxu0 %v813_v40  ;;  %850 = vmatprep.mubr.bf16.mxu0 %v4529_v10 }
 0x135   : > { %3988 = vmatprep.subr.msk.bf16.mxu0 %vm633_vm1, %v890_v42  ;;  %1258 = vrot.lane.b32.xlu1 %v4013_v46, %s5424_s25  ;;  %v956_v52 = vpop.permute.xlu1 %955  ;;  %v958_v53 = vpop.permute.xlu0 %957 }
 0x136   : > { %1256 = vrot.lane.b32.xlu0 %v4012_v47, %s5424_s25  ;;  %v961_v55 = vsel %vm5441_vm9, %v956_v52, %v958_v53  ;;  %v960_v57 = vsel %vm5441_vm9, %v954_v41, %v956_v52 }
 0x137   : > { %v966_v61 = vsel %vm633_vm1, %v960_v57, 0 }
 0x139   : > { %v1034_v56 = vpop.permute.xlu1 %1033  ;;  %v1036_v60 = vpop.permute.xlu0 %1035 }
 0x13a   : > { %1260 = vrot.lane.b32.xlu0 %v4014_v49, %s5424_s25  ;;  %v1040_v63 = vsel %vm5429_vm10, %v1034_v56, %v1036_v60 }
 0x13b   : > { %v1046_v1 = vsel %vm633_vm1, %v1040_v63, 0 }
 0x13d   : > { %v1038_v59 = vpop.permute.xlu1 %1037 }
 0x13e   : > { %v1041_v62 = vsel %vm5429_vm10, %v1036_v60, %v1038_v59  ;;  %vm5440_vm10 = vcmask 777216  }
 0x13f   : > { %3983 = vmatmul.mubr.msk.bf16.vlgmr.msra.gmra.mrb[0].mxu0 %vm629_vm2, %v3978_v51  ;;  %v1358_v51 = vld [vmem:[%s5475_s5] sm:$0xff]  ;;  %s5491_s5 = smov 95  }
 0x140   : > { %901 = vmatpush1.bf16.msra.mxu0 %v895_v54  ;;  %932 = vmatprep.mubr.bf16.mxu0 %v4529_v10 }
 0x141   : > { %3994 = vmatprep.subr.msk.bf16.mxu0 %vm633_vm1, %v961_v55 }
 0x14b   : > { %3989 = vmatmul.mubr.msk.bf16.vlgmr.msra.gmra.mrb[0].mxu0 %vm629_vm2, %v3984_v58  ;;  %v1344_v58 = vld [vmem:[%s5476_s4] sm:$0xff]  ;;  %s5490_s4 = smov 96  }
 0x14c   : > { %972 = vmatpush1.bf16.msra.mxu0 %v966_v61  ;;  %1003 = vmatprep.mubr.bf16.mxu0 %v4529_v10 }
 0x14d   : > { %4000 = vmatprep.subr.msk.bf16.mxu0 %vm633_vm1, %v1041_v62 }
 0x157   : > { %3995 = vmatmul.mubr.msk.bf16.vlgmr.msra.gmra.mrb[0].mxu0 %vm629_vm2, %v3990_v0 }
 0x158   : > { %1052 = vmatpush1.bf16.msra.mxu0 %v1046_v1  ;;  %1083 = vmatprep.mubr.bf16.mxu0 %v4529_v10 }
 0x163   : > { %4001 = vmatmul.mubr.msk.bf16.vlgmr.msra.gmra.mrb[0].mxu0 %vm629_vm2, %v3996_v2 }
 0x164   : > { %1163 = vmatprep.mubr.bf16.mxu0 %v4529_v10 }
 0x19b   : > { %v1116_v3 = vpop.permute.xlu1 %1115  ;;  %v1114_v4 = vpop.permute.xlu0 %1113 }
 0x19c   : > { %v1120_v5 = vsel %vm5430_vm5, %v1114_v4, %v1116_v3 }
 0x19d   : > { %v1126_v9 = vsel %vm633_vm1, %v1120_v5, 0 }
 0x19f   : > { %v1177_v6 = vpop.permute.xlu1 %1176  ;;  %v1118_v7 = vpop.permute.xlu0 %1117 }
 0x1a0   : > { %v1121_v8 = vsel %vm5430_vm5, %v1116_v3, %v1118_v7  ;;  %vm5439_vm5 = vcmask 769024  }
 0x1a1   : > { %4006 = vmatprep.subr.msk.bf16.mxu0 %vm633_vm1, %v1121_v8 }
 0x1a2   : > { %1132 = vmatpush1.bf16.msra.mxu0 %v1126_v9 }
 0x1a3   : > { %v1181_v13 = vpop.permute.xlu1 %1180  ;;  %v1179_v14 = vpop.permute.xlu0 %1178 }
 0x1a4   : > { %v1183_v15 = vsel %vm5440_vm10, %v1177_v6, %v1179_v14  ;;  %v1184_v16 = vsel %vm5440_vm10, %v1179_v14, %v1181_v13  ;;  %vm1394_vm10 = vcmask 1047556  }
 0x1a5   : > { %4007 = vmatmul.mubr.msk.bf16.vlgmr.msra.gmra.mrb[0].mxu0 %vm629_vm2, %v4002_v11  ;;  %4009 = vmatprep.subr.msk.bf16.mxu0 %vm633_vm1, %v1184_v16  ;;  %v1189_v18 = vsel %vm633_vm1, %v1183_v15, 0 }
 0x1a6   : > { %1195 = vmatpush1.bf16.msra.mxu0 %v1189_v18  ;;  %1226 = vmatprep.mubr.bf16.mxu0 %v4529_v10 }
 0x1a7   : > { %v1259_v20 = vpop.permute.xlu1 %1258 }
 0x1a8   : > { %v1257_v19 = vpop.permute.xlu0 %1256 }
 0x1a9   : > { %v1263_v23 = vsel %vm5439_vm5, %v1257_v19, %v1259_v20 }
 0x1aa   : > { %v1269_v25 = vsel %vm633_vm1, %v1263_v23, 0 }
 0x1ac   : > { %v1261_v21 = vpop.permute.xlu0 %1260 }
 0x1ad   : > { %v1264_v22 = vsel %vm5439_vm5, %v1259_v20, %v1261_v21  ;;  %vm1393_vm5 = vcmask 1043592  }
 0x1ae   : > { %4015 = vmatprep.subr.msk.bf16.mxu0 %vm633_vm1, %v1264_v22  ;;  %vm4880_vm9 = vmor %vm1394_vm10, %vm1393_vm5  ;;  %vm5494_vm5 = vcmask 908288  }
 0x1af   : > { %vm5495_vm10 = vmmov %vm5494_vm5 }
 0x1b1   : > { %4010 = vmatmul.mubr.msk.bf16.vlgmr.msra.gmra.mrb[0].mxu0 %vm629_vm2, %v4008_v24 }
 0x1b2   : > { %1275 = vmatpush1.bf16.msra.mxu0 %v1269_v25  ;;  %1306 = vmatprep.mubr.bf16.mxu0 %v4529_v10 }
 0x1bd   : > { %4016 = vmatmul.mubr.msk.bf16.vlgmr.msra.gmra.mrb[0].mxu0 %vm629_vm2, %v4011_v26 }
 0x1be   : > { %2331 = vmatprep.mubr.bf16.mxu0 %v4529_v10 }
 0x290   : > { %v1308_v27 = vpop.f32.mrb[0].mxu0 }
 0x291   : > { %v1310_v28 = vpop.f32.mrb[1].mxu0 }
 0x292   : > { %v1312_v31 = vpop.f32.mrb[2].mxu0  ;;  %v1317_v33 = vadd.f32 %v1310_v28, %v1308_v27 }
 0x293   : > { %v1313_v34 = vpop.f32.mrb[3].mxu0 }
 0x294   : > { %1318 = vadd.xlane.f32.xlu1 %v1317_v33 }
 0x2a5   : > { %1361 = vperm.xlu1 %4403, %v1358_v51  }
 0x321   : > { %v1319_v35 = vpop.xlane.xlu1 %1318 }
 0x322   : > { %v1320_v36 = vrot.slane %v1319_v35, 4 }
 0x324   : > { %v1321_v37 = vadd.f32 %v1320_v36, %v1319_v35 }
 0x325   : > { %v1362_v62 = vpop.permute.xlu1 %1361 }
 0x326   : > { %v1322_v38 = vrot.slane %v1321_v37, 2 }
 0x328   : > { %v1323_v39 = vadd.f32 %v1322_v38, %v1321_v37 }
 0x32a   : > { %v1324_v43 = vrot.slane %v1323_v39, 1 }
 0x32c   : > { %v1325_v44 = vadd.f32 %v1324_v43, %v1323_v39 }
 0x32e   : > { %4322 = vpush %v1325_v44 }
 0x35f   : > { %s4323_s25 = spop %4322 }
 0x360   : > { %s1327_s16 = smul.f32 0.00048828125, %s4323_s25 }
 0x362   : > { %v1328_v45 = vstv %s1327_s16 }
 0x363   : > { %v1329_v42 = vsub.f32 %v1308_v27, %v1328_v45  ;;  %v1330_v40 = vsub.f32 %v1310_v28, %v1328_v45 }
 0x365   : > { %v1331_v46 = vmul.f32 %v1329_v42, %v1329_v42  ;;  %v1332_v47 = vmul.f32 %v1330_v40, %v1330_v40 }
 0x367   : > { %v1333_v48 = vadd.f32 %v1332_v47, %v1331_v46 }
 0x369   : > { %1334 = vadd.xlane.f32.xlu0 %v1333_v48 }
 0x3f6   : > { %v1335_v41 = vpop.xlane.xlu0 %1334 }
 0x3f7   : > { %v1336_v49 = vrot.slane %v1335_v41, 4 }
 0x3f9   : > { %v1337_v50 = vadd.f32 %v1336_v49, %v1335_v41 }
 0x3fb   : > { %v1338_v52 = vrot.slane %v1337_v50, 2 }
 0x3fd   : > { %v1339_v53 = vadd.f32 %v1338_v52, %v1337_v50 }
 0x3ff   : > { %v1340_v54 = vrot.slane %v1339_v53, 1 }
 0x401   : > { %v1341_v55 = vadd.f32 %v1340_v54, %v1339_v53 }
 0x403   : > { %4324 = vpush %v1341_v55 }
 0x434   : > { %s4325_s25 = spop %4324 }
 0x435   : > { %s1343_s16 = smul.f32 0.00048828125, %s4325_s25  ;;  %s5485_s25 = smov 126  }
 0x437   : > { %s1345_s23 = sadd.f32 1e-05, %s1343_s16  ;;  %s5486_s16 = smov 34  }
 0x439   : > { %v1346_v56 = vstv %s1345_s23  ;;  %s5480_s23 = smov 16  }
 0x43a   : > { %4423 = vrsqrt.f32 %v1346_v56 }
 0x444   : > { %v4424_v57 = vpop.eup %4423 }
 0x445   : > { %4326 = vpush %v4424_v57 }
 0x476   : > { %s4327_s26 = spop %4326 }
 0x477   : > { %v1349_v59 = vstv %s4327_s26  ;;  %s5481_s26 = smov 18  }
 0x478   : > { %v1350_v60 = vmul.f32 %v1349_v59, %v1344_v58 }
 0x47a   : > { %1353 = vperm.xlu0 %4402, %v1350_v60  }
 0x47e   : > { %1920 = vrot.lane.b32.xlu0 %v4709_v30, %s5477_s27 }
 0x4f9   : > { %v1354_v61 = vpop.permute.xlu0 %1353 }
 0x4fa   : > { %v1356_v63 = vmul.f32 %v1354_v61, %v1329_v42  ;;  %v1357_v0 = vmul.f32 %v1354_v61, %v1330_v40 }
 0x4fc   : > { %v1364_v1 = vadd.f32 %v1362_v62, %v1356_v63  ;;  %v1365_v2 = vadd.f32 %v1362_v62, %v1357_v0 }
 0x4fd   : > { %v1921_v44 = vpop.permute.xlu0 %1920 }
 0x4fe   : > { %v4017_v3 = vmul.f32 -1.442695, %v1364_v1  ;;  %v4018_v4 = vmul.f32 -1.442695, %v1365_v2  ;;  %v1922_v46 = vrot.slane %v1921_v44, 4 }
 0x500   : > { %4425 = vpow2.f32 %v4017_v3  ;;  %v1923_v49 = vsel %vm1097_vm15, %v1922_v46, %v1921_v44 }
 0x501   : > { %4427 = vpow2.f32 %v4018_v4 }
 0x50a   : > { %v4426_v5 = vpop.eup %4425 }
 0x50b   : > { %v4428_v6 = vpop.eup %4427  ;;  %v1372_v7 = vadd.f32 1.0, %v4426_v5 }
 0x50c   : > { %v1373_v8 = vadd.f32 1.0, %v4428_v6 }
 0x50d   : > { %4429 = vrcp.f32 %v1372_v7 }
 0x50e   : > { %4431 = vrcp.f32 %v1373_v8 }
 0x517   : > { %v4430_v9 = vpop.eup %4429 }
 0x518   : > { %v4432_v11 = vpop.eup %4431  ;;  %v1378_v13 = vmul.f32 %v4430_v9, %v1364_v1 }
 0x519   : > { %v1379_v14 = vmul.f32 %v4432_v11, %v1365_v2 }
 0x51b   : > { %v4190_v15 = vpack.c.bf16 %v1379_v14, %v1378_v13 }
 0x51d   : > { %1387 = vrot.lane.b32.xlu1 %v4190_v15, %s5478_s17 }
 0x521   : > { %1614 = vrot.lane.b32.xlu1 %v4703_v29, %s5479_s20 }
 0x525   : > { %1694 = vrot.lane.b32.xlu1 %v4709_v30, %s5480_s23 }
 0x529   : > { %1842 = vrot.lane.b32.xlu1 %v4703_v29, %s5481_s26 }
 0x58f   : > { %v1388_v16 = vpop.permute.xlu1 %1387 }
 0x590   : > { %v1389_v19 = vrot.slane %v1388_v16, 4 }
 0x592   : > { %v1390_v20 = vsel %vm530_vm4, %v1389_v19, %v1388_v16  ;;  %1397 = vst.msk [vmem:[#allocation2 + $0x8] sm:$0xf] %vm514_vm0, %v1389_v19  ;;  %v4022_v19 = vld [vmem:[%s5492_s6 + $0x4] sm:$0xf] }
 0x593   : > { %1396 = vst.msk [vmem:[#allocation2] sm:$0xff] %vm4880_vm9, %v1390_v20  ;;  %v1615_v21 = vpop.permute.xlu1 %1614 }
 0x594   : > { %v1616_v22 = vrot.slane %v1615_v21, 4 }
 0x596   : > { %v1617_v25 = vsel %vm784_vm11, %v1616_v22, %v1615_v21 }
 0x597   : > { %v1695_v23 = vpop.permute.xlu1 %1694 }
 0x598   : > { %v1696_v26 = vrot.slane %v1695_v23, 4 }
 0x599   : > { %v1445_v35 = vld [vmem:[#allocation2 + $0x8] sm:$0xf] }
 0x59a   : > { %v4888_v24 = vld [vmem:[#allocation2] sm:$0xff]  ;;  %v1697_v33 = vsel %vm866_vm12, %v1696_v26, %v1695_v23  ;;  %v4025_v38 = vcombine.low %v1445_v35, %v1445_v35  ;;  %v1621_v42 = vmul.bf16 %v1616_v22, %v1445_v35  ;;  %v1693_v40 = vld [vmem:[#allocation2 + $0x8] sm:$0xf] }
 0x59b   : > { %v1620_v27 = vmul.bf16 %v1617_v25, %v4888_v24  ;;  %v4023_v28 = vcombine.low %v4888_v24, %v4888_v24  ;;  %v4024_v34 = vcombine.high %v4888_v24, %v4888_v24  ;;  %v1700_v36 = vmul.bf16 %v1697_v33, %v4888_v24  ;;  %v1843_v37 = vpop.permute.xlu1 %1842 }
 0x59c   : > { %v1844_v43 = vrot.slane %v1843_v37, 4  ;;  %v4037_v48 = vcombine.low %v1621_v42, %v1621_v42  ;;  %v4049_v41 = vcombine.low %v1693_v40, %v1693_v40  ;;  %v1701_v51 = vmul.bf16 %v1696_v26, %v1693_v40  ;;  %v4040_v42 = vld [vmem:[%s5492_s6 + $0xc] sm:$0xf] }
 0x59d   : > { %1456 = vrot.lane.b32.xlu1 %v4023_v28, %s5484_s30  ;;  %v4036_v31 = vcombine.high %v1620_v27, %v1620_v27  ;;  %v4042_v39 = vcombine.high %v1700_v36, %v1700_v36  ;;  %v4035_v45 = vcombine.low %v1620_v27, %v1620_v27  ;;  %v4041_v50 = vcombine.low %v1700_v36, %v1700_v36  ;;  %v1444_v27 = vld [vmem:[%s5492_s6] sm:$0xf]  ;;  %v4034_v36 = vld [vmem:[%s5492_s6 + $0x8] sm:$0xf] }
 0x59e   : > { %v1845_v47 = vsel %vm1017_vm13, %v1844_v43, %v1843_v37  ;;  %v1926_v52 = vmul.bf16 %v1923_v49, %v4888_v24  ;;  %v4043_v54 = vcombine.low %v1701_v51, %v1701_v51  ;;  %v1927_v55 = vmul.bf16 %v1922_v46, %v1693_v40  ;;  %v4046_v49 = vld [vmem:[%s5492_s6 + $0x10] sm:$0xf] }
 0x59f   : > { %1634 = vrot.lane.b32.xlu0 %v4036_v31, %s5485_s25  ;;  %v1849_v59 = vmul.bf16 %v1844_v43, %v1693_v40  ;;  %v1443_v2 = vmul.bf16 %v4709_v30, %v4888_v24 }
 0x5a0   : > { %v4059_v56 = vcombine.low %v1926_v52, %v1926_v52  ;;  %v4061_v57 = vcombine.low %v1927_v55, %v1927_v55  ;;  %v4060_v61 = vcombine.high %v1926_v52, %v1926_v52 }
 0x5a1   : > { %1458 = vrot.lane.b32.xlu1 %v4024_v34, %s5484_s30  ;;  %v4055_v60 = vcombine.low %v1849_v59, %v1849_v59  ;;  %v4029_v11 = vcombine.high %v1443_v2, %v1443_v2  ;;  %v4028_v13 = vcombine.low %v1443_v2, %v1443_v2 }
 0x5a3   : > { %2060 = vrot.lane.b32.xlu0 %v4703_v29, %s5486_s16  ;;  %v1848_v29 = vmul.bf16 %v1845_v47, %v4888_v24  ;;  %v1523_v20 = vsel %vm633_vm1, %v4028_v13, 0 }
 0x5a5   : > { %1460 = vrot.lane.b32.xlu1 %v4025_v38, %s5484_s30  ;;  %v4054_v53 = vcombine.high %v1848_v29, %v1848_v29  ;;  %v4053_v58 = vcombine.low %v1848_v29, %v1848_v29 }
 0x5a7   : > { %1714 = vrot.lane.b32.xlu0 %v4042_v39, %s5487_s0 }
 0x5a9   : > { %1632 = vrot.lane.b32.xlu1 %v4035_v45, %s5485_s25 }
 0x5ab   : > { %1782 = vrot.lane.b32.xlu0 %v4023_v28, %s5488_s1 }
 0x5ad   : > { %1636 = vrot.lane.b32.xlu1 %v4037_v48, %s5485_s25 }
 0x5af   : > { %1786 = vrot.lane.b32.xlu0 %v4049_v41, %s5488_s1 }
 0x5b1   : > { %1712 = vrot.lane.b32.xlu1 %v4041_v50, %s5487_s0 }
 0x5b3   : > { %1862 = vrot.lane.b32.xlu0 %v4054_v53, %s5489_s3 }
 0x5b5   : > { %1716 = vrot.lane.b32.xlu1 %v4043_v54, %s5487_s0 }
 0x5b7   : > { %1938 = vrot.lane.b32.xlu0 %v4059_v56, %s5490_s4  ;;  %v4052_v56 = vld [vmem:[%s5492_s6 + $0x14] sm:$0xf] }
 0x5b9   : > { %1784 = vrot.lane.b32.xlu1 %v4024_v34, %s5488_s1 }
 0x5bb   : > { %1942 = vrot.lane.b32.xlu0 %v4061_v57, %s5490_s4 }
 0x5bd   : > { %1860 = vrot.lane.b32.xlu1 %v4053_v58, %s5489_s3 }
 0x5bf   : > { %2002 = vrot.lane.b32.xlu0 %v4024_v34, %s5491_s5 }
 0x5c1   : > { %1864 = vrot.lane.b32.xlu1 %v4055_v60, %s5489_s3 }
 0x5c5   : > { %1940 = vrot.lane.b32.xlu1 %v4060_v61, %s5490_s4 }
 0x5c9   : > { %2000 = vrot.lane.b32.xlu1 %v4023_v28, %s5491_s5 }
 0x5cd   : > { %2004 = vrot.lane.b32.xlu1 %v4049_v41, %s5491_s5 }
 0x60f   : > { %v1457_v62 = vpop.permute.xlu1 %1456 }
 0x611   : > { %v1635_v63 = vpop.permute.xlu0 %1634 }
 0x613   : > { %v1459_v0 = vpop.permute.xlu1 %1458 }
 0x614   : > { %v1462_v4 = vsel %vm626_vm14, %v1457_v62, %v1459_v0  ;;  %v4058_v62 = vld [vmem:[%s5492_s6 + $0x18] sm:$0xf] }
 0x615   : > { %v2061_v1 = vpop.permute.xlu0 %2060  ;;  %v1468_v9 = vsel %vm633_vm1, %v1462_v4, 0 }
 0x616   : > { %v2062_v3 = vrot.slane %v2061_v1, 4 }
 0x617   : > { %v1461_v5 = vpop.permute.xlu1 %1460 }
 0x618   : > { %v2063_v6 = vsel %vm1240_vm7, %v2062_v3, %v2061_v1  ;;  %v1463_v7 = vsel %vm626_vm14, %v1459_v0, %v1461_v5  ;;  %v2067_v14 = vmul.bf16 %v2062_v3, %v1693_v40  ;;  %v4064_v0 = vld [vmem:[%s5492_s6 + $0x1c] sm:$0xf] }
 0x619   : > { %v2066_v8 = vmul.bf16 %v2063_v6, %v4888_v24  ;;  %4026 = vmatprep.subr.msk.bf16.mxu1 %vm633_vm1, %v1463_v7  ;;  %v1715_v28 = vpop.permute.xlu0 %1714  ;;  %v4067_v7 = vld [vmem:[%s5492_s6 + $0x20] sm:$0xf] }
 0x61a   : > { %1474 = vmatpush1.bf16.msra.mxu1 %v1468_v9  ;;  %v4070_v22 = vcombine.low %v2067_v14, %v2067_v14 }
 0x61b   : > { %4030 = vmatprep.subr.msk.bf16.mxu1 %vm633_vm1, %v4029_v11  ;;  %v1633_v30 = vpop.permute.xlu1 %1632  ;;  %v4068_v15 = vcombine.low %v2066_v8, %v2066_v8  ;;  %v4069_v16 = vcombine.high %v2066_v8, %v2066_v8 }
 0x61c   : > { %v1638_v25 = vsel %vm806_vm3, %v1633_v30, %v1635_v63  ;;  %v2179_v30 = vld [vmem:[%s5504_s8] sm:$0xff] }
 0x61d   : > { %2078 = vrot.lane.b32.xlu0 %v4068_v15, %s5493_s18  ;;  %2080 = vrot.lane.b32.xlu1 %v4069_v16, %s5493_s18  ;;  %v1644_v33 = vsel %vm633_vm1, %v1638_v25, 0  ;;  %v1783_v34 = vpop.permute.xlu0 %1782 }
 0x61e   : > { %4027 = vmatmul.mubr.msk.bf16.vlgmr.msra.gmra.mrb[0].mxu1 %vm629_vm2, %v4022_v19 }
 0x61f   : > { %1529 = vmatpush1.bf16.msra.mxu1 %v1523_v20  ;;  %v1637_v21 = vpop.permute.xlu1 %1636  ;;  %1560 = vmatprep.mubr.bf16.mxu1 %v4529_v10 }
 0x620   : > { %v1639_v23 = vsel %vm806_vm3, %v1635_v63, %v1637_v21 }
 0x621   : > { %2082 = vrot.lane.b32.xlu0 %v4070_v22, %s5493_s18  ;;  %4038 = vmatprep.subr.msk.bf16.mxu1 %vm633_vm1, %v1639_v23  ;;  %v1787_v38 = vpop.permute.xlu0 %1786 }
 0x623   : > { %v1713_v24 = vpop.permute.xlu1 %1712 }
 0x624   : > { %v1718_v35 = vsel %vm5448_vm8, %v1713_v24, %v1715_v28 }
 0x625   : > { %v1724_v39 = vsel %vm633_vm1, %v1718_v35, 0  ;;  %v1863_v46 = vpop.permute.xlu0 %1862 }
 0x627   : > { %v1717_v26 = vpop.permute.xlu1 %1716 }
 0x628   : > { %v1719_v31 = vsel %vm5448_vm8, %v1715_v28, %v1717_v26  ;;  %vm5496_vm8 = vcmask 900096  }
 0x629   : > { %v1939_v29 = vpop.permute.xlu0 %1938 }
 0x62a   : > { %4031 = vmatmul.mubr.msk.bf16.vlgmr.msra.gmra.mrb[0].mxu1 %vm629_vm2, %v1444_v27 }
 0x62b   : > { %1650 = vmatpush1.bf16.msra.mxu1 %v1644_v33  ;;  %1681 = vmatprep.mubr.bf16.mxu1 %v4529_v10  ;;  %v1785_v37 = vpop.permute.xlu1 %1784 }
 0x62c   : > { %4044 = vmatprep.subr.msk.bf16.mxu1 %vm633_vm1, %v1719_v31  ;;  %v1789_v43 = vsel %vm5494_vm5, %v1785_v37, %v1787_v38  ;;  %v1788_v45 = vsel %vm5495_vm10, %v1783_v34, %v1785_v37  ;;  %vm5497_vm5 = vmmov %vm5496_vm8  ;;  %vm5498_vm10 = vcmask 785408  }
 0x62d   : > { %v1794_v47 = vsel %vm633_vm1, %v1788_v45, 0  ;;  %v1943_v51 = vpop.permute.xlu0 %1942  ;;  %v2165_v45 = vld [vmem:[%s5398_s7] sm:$0xff] }
 0x62f   : > { %v1861_v44 = vpop.permute.xlu1 %1860 }
 0x630   : > { %v1866_v41 = vsel %vm5497_vm5, %v1861_v44, %v1863_v46  ;;  %vm5500_vm5 = vcmask 777216  }
 0x631   : > { %v1872_v52 = vsel %vm633_vm1, %v1866_v41, 0  ;;  %v2003_v58 = vpop.permute.xlu0 %2002 }
 0x633   : > { %v1865_v40 = vpop.permute.xlu1 %1864 }
 0x634   : > { %v1867_v48 = vsel %vm5496_vm8, %v1863_v46, %v1865_v40  ;;  %vm5499_vm8 = vmmov %vm5498_vm10  ;;  %v4086_v46 = vld.sshfl [vmem:[%s5393_s2] sm:$0x11 pattern:$0x75316420] }
 0x636   : > { %4039 = vmatmul.mubr.msk.bf16.vlgmr.msra.gmra.mrb[0].mxu1 %vm629_vm2, %v4034_v36 }
 0x637   : > { %1730 = vmatpush1.bf16.msra.mxu1 %v1724_v39  ;;  %1761 = vmatprep.mubr.bf16.mxu1 %v4529_v10  ;;  %v1941_v50 = vpop.permute.xlu1 %1940 }
 0x638   : > { %4050 = vmatprep.subr.msk.bf16.mxu1 %vm633_vm1, %v1789_v43  ;;  %v1945_v53 = vsel %vm5498_vm10, %v1941_v50, %v1943_v51  ;;  %v1944_v55 = vsel %vm5499_vm8, %v1939_v29, %v1941_v50  ;;  %vm5501_vm10 = vmmov %vm5500_vm5  ;;  %vm5502_vm8 = vcmask 769024  }
 0x639   : > { %v1950_v59 = vsel %vm633_vm1, %v1944_v55, 0 }
 0x63b   : > { %v2001_v54 = vpop.permute.xlu1 %2000 }
 0x63c   : > { %v2006_v61 = vsel %vm5501_vm10, %v2001_v54, %v2003_v58 }
 0x63d   : > { %v2012_v63 = vsel %vm633_vm1, %v2006_v61, 0 }
 0x63f   : > { %v2005_v57 = vpop.permute.xlu1 %2004 }
 0x640   : > { %v2007_v60 = vsel %vm5500_vm5, %v2003_v58, %v2005_v57  ;;  %vm5503_vm5 = vmmov %vm5502_vm8 }
 0x642   : > { %4045 = vmatmul.mubr.msk.bf16.vlgmr.msra.gmra.mrb[0].mxu1 %vm629_vm2, %v4040_v42 }
 0x643   : > { %1800 = vmatpush1.bf16.msra.mxu1 %v1794_v47  ;;  %1831 = vmatprep.mubr.bf16.mxu1 %v4529_v10  ;;  %v2404_v47 = vcombine.high %v4086_v46, %v4086_v46 }
 0x644   : > { %4056 = vmatprep.subr.msk.bf16.mxu1 %vm633_vm1, %v1867_v48  ;;  %v2411_v48 = vrot.slane %v4086_v46, %v4691_v12 }
 0x645   : > { %v2418_v29 = vrot.slane %v2404_v47, %v4691_v12 }
 0x646   : > { %v2420_v41 = vshrl.u32 %v2411_v48, 16 }
 0x648   : > { %v2421_v50 = vpack.i.b16 %v2420_v41, %v2420_v41 }
 0x64e   : > { %4051 = vmatmul.mubr.msk.bf16.vlgmr.msra.gmra.mrb[0].mxu1 %vm629_vm2, %v4046_v49  ;;  %v2428_v49 = vshrl.u32 %v2418_v29, 16 }
 0x64f   : > { %1878 = vmatpush1.bf16.msra.mxu1 %v1872_v52  ;;  %1909 = vmatprep.mubr.bf16.mxu1 %v4529_v10  ;;  %v2426_v52 = vrot.slane %v2421_v50, %v4696_v17 }
 0x650   : > { %4062 = vmatprep.subr.msk.bf16.mxu1 %vm633_vm1, %v1945_v53  ;;  %v2429_v51 = vpack.i.b16 %v2428_v49, %v2428_v49 }
 0x652   : > { %v2434_v53 = vrot.slane %v2429_v51, %v4696_v17 }
 0x654   : > { %v5024_v54 = vcombine.low %v2426_v52, %v2434_v53 }
 0x65a   : > { %4057 = vmatmul.mubr.msk.bf16.vlgmr.msra.gmra.mrb[0].mxu1 %vm629_vm2, %v4052_v56 }
 0x65b   : > { %1956 = vmatpush1.bf16.msra.mxu1 %v1950_v59  ;;  %1987 = vmatprep.mubr.bf16.mxu1 %v4529_v10 }
 0x65c   : > { %4065 = vmatprep.subr.msk.bf16.mxu1 %vm633_vm1, %v2007_v60 }
 0x666   : > { %4063 = vmatmul.mubr.msk.bf16.vlgmr.msra.gmra.mrb[0].mxu1 %vm629_vm2, %v4058_v62 }
 0x667   : > { %2018 = vmatpush1.bf16.msra.mxu1 %v2012_v63  ;;  %2049 = vmatprep.mubr.bf16.mxu1 %v4529_v10 }
 0x672   : > { %4066 = vmatmul.mubr.msk.bf16.vlgmr.msra.gmra.mrb[0].mxu1 %vm629_vm2, %v4064_v0 }
 0x673   : > { %2127 = vmatprep.mubr.bf16.mxu1 %v4529_v10 }
 0x68f   : > { %v2079_v1 = vpop.permute.xlu0 %2078  ;;  %v2081_v2 = vpop.permute.xlu1 %2080 }
 0x690   : > { %v2084_v3 = vsel %vm5502_vm8, %v2079_v1, %v2081_v2 }
 0x691   : > { %v2090_v6 = vsel %vm633_vm1, %v2084_v3, 0 }
 0x693   : > { %v2083_v4 = vpop.permute.xlu0 %2082 }
 0x694   : > { %v2085_v5 = vsel %vm5503_vm5, %v2081_v2, %v2083_v4  ;;  %vm5507_vm5 = vcmask 908288  }
 0x695   : > { %4071 = vmatprep.subr.msk.bf16.mxu1 %vm633_vm1, %v2085_v5 }
 0x696   : > { %2096 = vmatpush1.bf16.msra.mxu1 %v2090_v6 }
 0x699   : > { %4072 = vmatmul.mubr.msk.bf16.vlgmr.msra.gmra.mrb[0].mxu1 %vm629_vm2, %v4067_v7 }
 0x69a   : > { %3155 = vmatprep.mubr.bf16.mxu1 %v4529_v10 }
 0x76c   : > { %v2129_v8 = vpop.f32.mrb[0].mxu1 }
 0x76d   : > { %v2131_v9 = vpop.f32.mrb[1].mxu1 }
 0x76e   : > { %v2133_v11 = vpop.f32.mrb[2].mxu1  ;;  %v2138_v13 = vadd.f32 %v2131_v9, %v2129_v8 }
 0x76f   : > { %v2134_v14 = vpop.f32.mrb[3].mxu1  ;;  %v2257_v11 = vpack.i.b16 %v2418_v29, %v2418_v29 }
 0x770   : > { %2139 = vadd.xlane.f32.xlu1 %v2138_v13 }
 0x781   : > { %2182 = vperm.xlu1 %4403, %v2179_v30  }
 0x7fd   : > { %v2140_v15 = vpop.xlane.xlu1 %2139 }
 0x7fe   : > { %v2141_v16 = vrot.slane %v2140_v15, 4 }
 0x800   : > { %v2142_v19 = vadd.f32 %v2141_v16, %v2140_v15 }
 0x801   : > { %v2183_v12 = vpop.permute.xlu1 %2182 }
 0x802   : > { %v2143_v20 = vrot.slane %v2142_v19, 2 }
 0x804   : > { %v2144_v21 = vadd.f32 %v2143_v20, %v2142_v19 }
 0x806   : > { %v2145_v22 = vrot.slane %v2144_v21, 1 }
 0x808   : > { %v2146_v23 = vadd.f32 %v2145_v22, %v2144_v21  ;;  %v2262_v21 = vrot.slane %v2257_v11, %v4696_v17 }
 0x80a   : > { %4328 = vpush %v2146_v23 }
 0x83b   : > { %s4329_s15 = spop %4328 }
 0x83c   : > { %s2148_s21 = smul.f32 0.00048828125, %s4329_s15 }
 0x83e   : > { %v2149_v24 = vstv %s2148_s21 }
 0x83f   : > { %v2150_v25 = vsub.f32 %v2129_v8, %v2149_v24  ;;  %v2151_v26 = vsub.f32 %v2131_v9, %v2149_v24  ;;  %v2250_v9 = vpack.i.b16 %v2411_v48, %v2411_v48 }
 0x841   : > { %v2152_v27 = vmul.f32 %v2150_v25, %v2150_v25  ;;  %v2153_v28 = vmul.f32 %v2151_v26, %v2151_v26  ;;  %v2255_v20 = vrot.slane %v2250_v9, %v4696_v17  ;;  %v4076_v9 = vld [vmem:[%s5400_s9 + $0x2] sm:$0x3] }
 0x843   : > { %v2154_v31 = vadd.f32 %v2153_v28, %v2152_v27  ;;  %v5033_v24 = vcombine.low %v2255_v20, %v2262_v21 }
 0x845   : > { %2155 = vadd.xlane.f32.xlu0 %v2154_v31 }
 0x8d2   : > { %v2156_v33 = vpop.xlane.xlu0 %2155 }
 0x8d3   : > { %v2157_v34 = vrot.slane %v2156_v33, 4 }
 0x8d5   : > { %v2158_v35 = vadd.f32 %v2157_v34, %v2156_v33 }
 0x8d7   : > { %v2159_v36 = vrot.slane %v2158_v35, 2 }
 0x8d9   : > { %v2160_v37 = vadd.f32 %v2159_v36, %v2158_v35 }
 0x8db   : > { %v2161_v38 = vrot.slane %v2160_v37, 1 }
 0x8dd   : > { %v2162_v39 = vadd.f32 %v2161_v38, %v2160_v37 }
 0x8df   : > { %4330 = vpush %v2162_v39 }
 0x910   : > { %s4331_s24 = spop %4330 }
 0x911   : > { %s2164_s29 = smul.f32 0.00048828125, %s4331_s24 }
 0x913   : > { %s2166_s6 = sadd.f32 1e-05, %s2164_s29 }
 0x915   : > { %v2167_v43 = vstv %s2166_s6 }
 0x916   : > { %4433 = vrsqrt.f32 %v2167_v43 }
 0x920   : > { %v4434_v44 = vpop.eup %4433 }
 0x921   : > { %4332 = vpush %v4434_v44 }
 0x952   : > { %s4333_s8 = spop %4332 }
 0x953   : > { %v2170_v42 = vstv %s4333_s8  ;;  %s4544_s8 = smov [#allocation3]  }
 0x954   : > { %v2171_v40 = vmul.f32 %v2170_v42, %v2165_v45 }
 0x956   : > { %2174 = vperm.xlu0 %4402, %v2171_v40  }
 0x95a   : > { %2440 = vrot.lane.b32.xlu0 %v5024_v54, %s5479_s20 }
 0x95e   : > { %2668 = vrot.lane.b32.xlu0 %v5024_v54, %s5481_s26 }
 0x9d5   : > { %v2175_v55 = vpop.permute.xlu0 %2174 }
 0x9d6   : > { %v2177_v56 = vmul.f32 %v2175_v55, %v2150_v25  ;;  %v2178_v57 = vmul.f32 %v2175_v55, %v2151_v26 }
 0x9d8   : > { %v2185_v58 = vadd.f32 %v2183_v12, %v2177_v56  ;;  %v2186_v59 = vadd.f32 %v2183_v12, %v2178_v57 }
 0x9d9   : > { %v2441_v28 = vpop.permute.xlu0 %2440 }
 0x9da   : > { %v2187_v60 = vmin.f32 %v2185_v58, 25.0  ;;  %v2188_v61 = vmin.f32 %v2186_v59, 25.0  ;;  %vm2197_vm10 = vcmp.gt.f32.partialorder %v2185_v58, 25.0  ;;  %vm2198_vm8 = vcmp.gt.f32.partialorder %v2186_v59, 25.0 }
 0x9db   : > { %v2442_v17 = vrot.slane %v2441_v28, 4 }
 0x9dc   : > { %v2189_v62 = vmul.f32 1.442695, %v2187_v60  ;;  %v2191_v63 = vmul.f32 1.442695, %v2188_v61 }
 0x9dd   : > { %v2443_v34 = vsel %vm784_vm11, %v2442_v17, %v2441_v28  ;;  %v2669_v47 = vpop.permute.xlu0 %2668  ;;  %v2270_v28 = vld [vmem:[%s5400_s9] sm:$0x3] }
 0x9de   : > { %4435 = vpow2.f32 %v2189_v62  ;;  %v2670_v41 = vrot.slane %v2669_v47, 4 }
 0x9df   : > { %4437 = vpow2.f32 %v2191_v63 }
 0x9e0   : > { %v2671_v51 = vsel %vm1017_vm13, %v2670_v41, %v2669_v47 }
 0x9e8   : > { %v4436_v0 = vpop.eup %4435 }
 0x9e9   : > { %v4438_v1 = vpop.eup %4437  ;;  %v2193_v2 = vadd.f32 2.0, %v4436_v0 }
 0x9ea   : > { %v2194_v3 = vadd.f32 2.0, %v4438_v1 }
 0x9eb   : > { %v2195_v4 = vmul.f32 %v4436_v0, %v2193_v2 }
 0x9ec   : > { %v2196_v5 = vmul.f32 %v4438_v1, %v2194_v3 }
 0x9ed   : > { %v2201_v6 = vadd.f32 2.0, %v2195_v4  ;;  %v2199_v8 = vmul.f32 %v2195_v4, %v2185_v58 }
 0x9ee   : > { %v2202_v7 = vadd.f32 2.0, %v2196_v5  ;;  %v2200_v14 = vmul.f32 %v2196_v5, %v2186_v59 }
 0x9ef   : > { %4439 = vrcp.f32 %v2201_v6 }
 0x9f0   : > { %4441 = vrcp.f32 %v2202_v7 }
 0x9f9   : > { %v4440_v13 = vpop.eup %4439 }
 0x9fa   : > { %v4442_v30 = vpop.eup %4441  ;;  %v2205_v15 = vmul.f32 %v4440_v13, %v2199_v8 }
 0x9fb   : > { %v2206_v16 = vmul.f32 %v4442_v30, %v2200_v14 }
 0x9fc   : > { %v2207_v19 = vsel %vm2197_vm10, %v2185_v58, %v2205_v15  ;;  %vm5508_vm10 = vmmov %vm5507_vm5 }
 0x9fd   : > { %v2208_v22 = vsel %vm2198_vm8, %v2186_v59, %v2206_v16  ;;  %vm5509_vm8 = vcmask 900096  }
 0x9fe   : > { %v4191_v23 = vpack.c.bf16 %v2208_v22, %v2207_v19 }
 0xa00   : > { %2216 = vrot.lane.b32.xlu1 %v4191_v23, %s5478_s17 }
 0xa04   : > { %2520 = vrot.lane.b32.xlu1 %v5033_v24, %s5480_s23 }
 0xa72   : > { %v2217_v25 = vpop.permute.xlu1 %2216 }
 0xa73   : > { %v2218_v26 = vrot.slane %v2217_v25, 4 }
 0xa75   : > { %v2219_v27 = vsel %vm530_vm4, %v2218_v26, %v2217_v25  ;;  %2223 = vst.msk [vmem:[#allocation2 + $0x8] sm:$0xf] %vm514_vm0, %v2218_v26  ;;  %vm5505_vm0 = vcmask 916480  }
 0xa76   : > { %2222 = vst.msk [vmem:[#allocation2] sm:$0xff] %vm4880_vm9, %v2219_v27  ;;  %v2521_v37 = vpop.permute.xlu1 %2520  ;;  %vm5506_vm9 = vmmov %vm5505_vm0 }
 0xa77   : > { %v2522_v38 = vrot.slane %v2521_v37, 4 }
 0xa79   : > { %v2523_v45 = vsel %vm866_vm12, %v2522_v38, %v2521_v37 }
 0xa7c   : > { %v2271_v36 = vld [vmem:[#allocation2 + $0x8] sm:$0xf] }
 0xa7d   : > { %v5041_v31 = vld [vmem:[#allocation2] sm:$0xff]  ;;  %v4079_v39 = vcombine.low %v2271_v36, %v2271_v36  ;;  %v2447_v44 = vmul.bf16 %v2442_v17, %v2271_v36  ;;  %v5064_v48 = vld [vmem:[#allocation2 + $0x8] sm:$0xf] }
 0xa7e   : > { %v5045_v33 = vcombine.high %v5041_v31, %v5041_v31  ;;  %v5050_v35 = vcombine.low %v5041_v31, %v5041_v31  ;;  %v2446_v18 = vmul.bf16 %v2443_v34, %v5041_v31  ;;  %v2526_v40 = vmul.bf16 %v2523_v45, %v5041_v31 }
 0xa7f   : > { %v4091_v46 = vcombine.low %v2447_v44, %v2447_v44  ;;  %v2527_v49 = vmul.bf16 %v2522_v38, %v5064_v48  ;;  %v2674_v53 = vmul.bf16 %v2671_v51, %v5041_v31  ;;  %v4103_v55 = vcombine.low %v5064_v48, %v5064_v48 }
 0xa80   : > { %2284 = vrot.lane.b32.xlu0 %v5045_v33, %s5484_s30  ;;  %2282 = vrot.lane.b32.xlu1 %v5050_v35, %s5484_s30  ;;  %v4090_v43 = vcombine.high %v2446_v18, %v2446_v18  ;;  %v4089_v42 = vcombine.low %v2446_v18, %v2446_v18  ;;  %v4096_v29 = vcombine.high %v2526_v40, %v2526_v40 }
 0xa81   : > { %v4095_v50 = vcombine.low %v2526_v40, %v2526_v40  ;;  %v4097_v52 = vcombine.low %v2527_v49, %v2527_v49  ;;  %v4108_v56 = vcombine.high %v2674_v53, %v2674_v53  ;;  %v2675_v57 = vmul.bf16 %v2670_v41, %v5064_v48 }
 0xa82   : > { %v4107_v12 = vcombine.low %v2674_v53, %v2674_v53  ;;  %v2269_v61 = vmul.bf16 %v5033_v24, %v5041_v31 }
 0xa83   : > { %v4109_v58 = vcombine.low %v2675_v57, %v2675_v57 }
 0xa84   : > { %2746 = vrot.lane.b32.xlu0 %v5033_v24, %s5477_s27  ;;  %2286 = vrot.lane.b32.xlu1 %v4079_v39, %s5484_s30  ;;  %v4083_v5 = vcombine.high %v2269_v61, %v2269_v61  ;;  %v4082_v6 = vcombine.low %v2269_v61, %v2269_v61 }
 0xa86   : > { %v2349_v15 = vsel %vm633_vm1, %v4082_v6, 0 }
 0xa88   : > { %2460 = vrot.lane.b32.xlu0 %v4090_v43, %s5485_s25  ;;  %2458 = vrot.lane.b32.xlu1 %v4089_v42, %s5485_s25  ;;  %v4088_v43 = vld [vmem:[%s5400_s9 + $0x4] sm:$0x3] }
 0xa8c   : > { %2886 = vrot.lane.b32.xlu0 %v5024_v54, %s5486_s16  ;;  %2462 = vrot.lane.b32.xlu1 %v4091_v46, %s5485_s25 }
 0xa90   : > { %2540 = vrot.lane.b32.xlu0 %v4096_v29, %s5487_s0  ;;  %2538 = vrot.lane.b32.xlu1 %v4095_v50, %s5487_s0 }
 0xa94   : > { %2608 = vrot.lane.b32.xlu0 %v5050_v35, %s5488_s1  ;;  %2542 = vrot.lane.b32.xlu1 %v4097_v52, %s5487_s0  ;;  %v4100_v52 = vld [vmem:[%s5400_s9 + $0x8] sm:$0x3] }
 0xa98   : > { %2612 = vrot.lane.b32.xlu0 %v4103_v55, %s5488_s1  ;;  %2610 = vrot.lane.b32.xlu1 %v5045_v33, %s5488_s1 }
 0xa9c   : > { %2688 = vrot.lane.b32.xlu0 %v4108_v56, %s5489_s3  ;;  %2686 = vrot.lane.b32.xlu1 %v4107_v12, %s5489_s3 }
 0xaa0   : > { %2690 = vrot.lane.b32.xlu1 %v4109_v58, %s5489_s3 }
 0xaf2   : > { %v2285_v59 = vpop.permute.xlu0 %2284  ;;  %v2283_v60 = vpop.permute.xlu1 %2282 }
 0xaf3   : > { %v2288_v62 = vsel %vm626_vm14, %v2283_v60, %v2285_v59 }
 0xaf4   : > { %v2294_v3 = vsel %vm633_vm1, %v2288_v62, 0  ;;  %v4112_v62 = vld [vmem:[%s5400_s9 + $0xc] sm:$0x3] }
 0xaf6   : > { %v2747_v63 = vpop.permute.xlu0 %2746  ;;  %v2287_v1 = vpop.permute.xlu1 %2286 }
 0xaf7   : > { %v2748_v0 = vrot.slane %v2747_v63, 4  ;;  %v2289_v2 = vsel %vm626_vm14, %v2285_v59, %v2287_v1 }
 0xaf8   : > { %4080 = vmatprep.subr.msk.bf16.mxu0 %vm633_vm1, %v2289_v2 }
 0xaf9   : > { %v2749_v4 = vsel %vm1097_vm15, %v2748_v0, %v2747_v63  ;;  %2300 = vmatpush1.bf16.msra.mxu0 %v2294_v3  ;;  %v2753_v13 = vmul.bf16 %v2748_v0, %v5064_v48 }
 0xafa   : > { %v2752_v7 = vmul.bf16 %v2749_v4, %v5041_v31  ;;  %v2461_v8 = vpop.permute.xlu0 %2460  ;;  %4084 = vmatprep.subr.msk.bf16.mxu0 %vm633_vm1, %v4083_v5  ;;  %v2459_v11 = vpop.permute.xlu1 %2458 }
 0xafb   : > { %v4115_v22 = vcombine.low %v2753_v13, %v2753_v13  ;;  %v2464_v27 = vsel %vm806_vm3, %v2459_v11, %v2461_v8  ;;  %v4121_v13 = vld [vmem:[%s5400_s9 + $0x10] sm:$0x3] }
 0xafc   : > { %v4113_v14 = vcombine.low %v2752_v7, %v2752_v7  ;;  %v4114_v30 = vcombine.high %v2752_v7, %v2752_v7  ;;  %4081 = vmatmul.mubr.msk.bf16.vlgmr.msra.gmra.mrb[4].mxu0 %vm629_vm2, %v4076_v9  ;;  %v4118_v9 = vld [vmem:[%s5400_s9 + $0xe] sm:$0x3] }
 0xafd   : > { %2355 = vmatpush1.bf16.msra.mxu0 %v2349_v15  ;;  %2386 = vmatprep.mubr.bf16.mxu0 %v4529_v10 }
 0xafe   : > { %v2887_v16 = vpop.permute.xlu0 %2886  ;;  %2764 = vrot.lane.b32.xlu0 %v4113_v14, %s5490_s4  ;;  %2766 = vrot.lane.b32.xlu1 %v4114_v30, %s5490_s4  ;;  %v2463_v20 = vpop.permute.xlu1 %2462 }
 0xaff   : > { %v2888_v19 = vrot.slane %v2887_v16, 4  ;;  %v2465_v21 = vsel %vm806_vm3, %v2461_v8, %v2463_v20 }
 0xb00   : > { %4092 = vmatprep.subr.msk.bf16.mxu0 %vm633_vm1, %v2465_v21 }
 0xb01   : > { %v2889_v23 = vsel %vm1240_vm7, %v2888_v19, %v2887_v16  ;;  %v2893_v36 = vmul.bf16 %v2888_v19, %v5064_v48  ;;  %v4094_v48 = vld [vmem:[%s5400_s9 + $0x6] sm:$0x3] }
 0xb02   : > { %2768 = vrot.lane.b32.xlu0 %v4115_v22, %s5490_s4  ;;  %2826 = vrot.lane.b32.xlu1 %v5050_v35, %s5491_s5  ;;  %v2539_v25 = vpop.permute.xlu1 %2538  ;;  %v2892_v26 = vmul.bf16 %v2889_v23, %v5041_v31  ;;  %v2541_v17 = vpop.permute.xlu0 %2540  ;;  %v2470_v31 = vsel %vm633_vm1, %v2464_v27, 0  ;;  %v3009_v22 = vld [vmem:[%s5402_s11] sm:$0xf] }
 0xb03   : > { %v2544_v39 = vsel %vm5506_vm9, %v2539_v25, %v2541_v17  ;;  %vm5511_vm9 = vcmask 785408  }
 0xb04   : > { %v4122_v37 = vcombine.low %v2892_v26, %v2892_v26  ;;  %v4123_v18 = vcombine.high %v2892_v26, %v2892_v26  ;;  %v2550_v42 = vsel %vm633_vm1, %v2544_v39, 0 }
 0xb06   : > { %2828 = vrot.lane.b32.xlu0 %v5045_v33, %s5491_s5  ;;  %2830 = vrot.lane.b32.xlu1 %v4103_v55, %s5491_s5  ;;  %v2543_v34 = vpop.permute.xlu1 %2542  ;;  %v4124_v33 = vcombine.low %v2893_v36, %v2893_v36  ;;  %v2609_v38 = vpop.permute.xlu0 %2608  ;;  %v4106_v55 = vld [vmem:[%s5400_s9 + $0xa] sm:$0x3] }
 0xb07   : > { %v2545_v35 = vsel %vm5505_vm0, %v2541_v17, %v2543_v34  ;;  %vm5510_vm0 = vmmov %vm5509_vm8 }
 0xb08   : > { %4085 = vmatmul.mubr.msk.bf16.vlgmr.msra.gmra.mrb[4].mxu0 %vm629_vm2, %v2270_v28 }
 0xb09   : > { %2476 = vmatpush1.bf16.msra.mxu0 %v2470_v31  ;;  %2507 = vmatprep.mubr.bf16.mxu0 %v4529_v10 }
 0xb0a   : > { %2904 = vrot.lane.b32.xlu0 %v4122_v37, %s5493_s18  ;;  %4098 = vmatprep.subr.msk.bf16.mxu0 %vm633_vm1, %v2545_v35  ;;  %v2613_v44 = vpop.permute.xlu0 %2612  ;;  %v2611_v45 = vpop.permute.xlu1 %2610 }
 0xb0b   : > { %2906 = vrot.lane.b32.xlu1 %v4123_v18, %s5493_s18  ;;  %v2615_v40 = vsel %vm5507_vm5, %v2611_v45, %v2613_v44  ;;  %v2614_v47 = vsel %vm5508_vm10, %v2609_v38, %v2611_v45  ;;  %vm5512_vm5 = vmmov %vm5511_vm9  ;;  %vm5513_vm10 = vcmask 777216  }
 0xb0c   : > { %v2620_v41 = vsel %vm633_vm1, %v2614_v47, 0 }
 0xb0e   : > { %2908 = vrot.lane.b32.xlu0 %v4124_v33, %s5493_s18  ;;  %v2687_v46 = vpop.permute.xlu1 %2686  ;;  %v2689_v49 = vpop.permute.xlu0 %2688 }
 0xb0f   : > { %v2692_v51 = vsel %vm5510_vm0, %v2687_v46, %v2689_v49  ;;  %vm5515_vm0 = vcmask 769024  }
 0xb10   : > { %v2698_v53 = vsel %vm633_vm1, %v2692_v51, 0 }
 0xb12   : > { %v2691_v29 = vpop.permute.xlu1 %2690 }
 0xb13   : > { %v2693_v50 = vsel %vm5509_vm8, %v2689_v49, %v2691_v29  ;;  %vm5514_vm8 = vmmov %vm5513_vm10 }
 0xb14   : > { %4093 = vmatmul.mubr.msk.bf16.vlgmr.msra.gmra.mrb[4].mxu0 %vm629_vm2, %v4088_v43 }
 0xb15   : > { %2556 = vmatpush1.bf16.msra.mxu0 %v2550_v42  ;;  %2587 = vmatprep.mubr.bf16.mxu0 %v4529_v10 }
 0xb16   : > { %4104 = vmatprep.subr.msk.bf16.mxu0 %vm633_vm1, %v2615_v40 }
 0xb20   : > { %4099 = vmatmul.mubr.msk.bf16.vlgmr.msra.gmra.mrb[4].mxu0 %vm629_vm2, %v4094_v48 }
 0xb21   : > { %2626 = vmatpush1.bf16.msra.mxu0 %v2620_v41  ;;  %2657 = vmatprep.mubr.bf16.mxu0 %v4529_v10  ;;  %v2995_v41 = vld [vmem:[%s5401_s10] sm:$0xf] }
 0xb22   : > { %4110 = vmatprep.subr.msk.bf16.mxu0 %vm633_vm1, %v2693_v50 }
 0xb2c   : > { %4105 = vmatmul.mubr.msk.bf16.vlgmr.msra.gmra.mrb[4].mxu0 %vm629_vm2, %v4100_v52 }
 0xb2d   : > { %2704 = vmatpush1.bf16.msra.mxu0 %v2698_v53  ;;  %2735 = vmatprep.mubr.bf16.mxu0 %v4529_v10 }
 0xb38   : > { %4111 = vmatmul.mubr.msk.bf16.vlgmr.msra.gmra.mrb[4].mxu0 %vm629_vm2, %v4106_v55 }
 0xb39   : > { %2813 = vmatprep.mubr.bf16.mxu0 %v4529_v10 }
 0xb70   : > { %v2765_v56 = vpop.permute.xlu0 %2764  ;;  %v2767_v57 = vpop.permute.xlu1 %2766 }
 0xb71   : > { %v2770_v12 = vsel %vm5511_vm9, %v2765_v56, %v2767_v57  ;;  %vm5516_vm9 = vmmov %vm5515_vm0 }
 0xb72   : > { %v2776_v61 = vsel %vm633_vm1, %v2770_v12, 0 }
 0xb74   : > { %v2769_v58 = vpop.permute.xlu0 %2768  ;;  %v2827_v60 = vpop.permute.xlu1 %2826 }
 0xb75   : > { %v2771_v59 = vsel %vm5512_vm5, %v2767_v57, %v2769_v58 }
 0xb76   : > { %4116 = vmatprep.subr.msk.bf16.mxu0 %vm633_vm1, %v2771_v59 }
 0xb77   : > { %2782 = vmatpush1.bf16.msra.mxu0 %v2776_v61 }
 0xb78   : > { %v2829_v63 = vpop.permute.xlu0 %2828  ;;  %v2831_v1 = vpop.permute.xlu1 %2830 }
 0xb79   : > { %v2832_v0 = vsel %vm5513_vm10, %v2827_v60, %v2829_v63  ;;  %v2833_v3 = vsel %vm5514_vm8, %v2829_v63, %v2831_v1  ;;  %vm5525_vm10 = vmmov %vm5514_vm8 }
 0xb7a   : > { %v2838_v2 = vsel %vm633_vm1, %v2832_v0, 0  ;;  %4117 = vmatmul.mubr.msk.bf16.vlgmr.msra.gmra.mrb[4].mxu0 %vm629_vm2, %v4112_v62  ;;  %4119 = vmatprep.subr.msk.bf16.mxu0 %vm633_vm1, %v2833_v3 }
 0xb7b   : > { %2875 = vmatprep.mubr.bf16.mxu0 %v4529_v10  ;;  %2844 = vmatpush1.bf16.msra.mxu0 %v2838_v2 }
 0xb7c   : > { %v2905_v4 = vpop.permute.xlu0 %2904 }
 0xb7d   : > { %v2907_v5 = vpop.permute.xlu1 %2906 }
 0xb7e   : > { %v2910_v8 = vsel %vm5516_vm9, %v2905_v4, %v2907_v5  ;;  %vm5526_vm9 = vmmov %vm5515_vm0 }
 0xb7f   : > { %v2916_v11 = vsel %vm633_vm1, %v2910_v8, 0 }
 0xb80   : > { %v2909_v6 = vpop.permute.xlu0 %2908 }
 0xb81   : > { %v2911_v7 = vsel %vm5515_vm0, %v2907_v5, %v2909_v6 }
 0xb82   : > { %4125 = vmatprep.subr.msk.bf16.mxu0 %vm633_vm1, %v2911_v7 }
 0xb86   : > { %4120 = vmatmul.mubr.msk.bf16.vlgmr.msra.gmra.mrb[4].mxu0 %vm629_vm2, %v4118_v9 }
 0xb87   : > { %2922 = vmatpush1.bf16.msra.mxu0 %v2916_v11  ;;  %2953 = vmatprep.mubr.bf16.mxu0 %v4529_v10 }
 0xb92   : > { %4126 = vmatmul.mubr.msk.bf16.vlgmr.msra.gmra.mrb[4].mxu0 %vm629_vm2, %v4121_v13  ;;  %vm5517_vm2 = vcmask 132096  }
 0xc65   : > { %v2955_v14 = vpop.f32.mrb[4].mxu0 }
 0xc66   : > { %v2964_v30 = vsel %vm633_vm1, %v2955_v14, 0.0  ;;  %v2957_v15 = vpop.f32.mrb[5].mxu0 }
 0xc67   : > { %v2965_v16 = vsel %vm633_vm1, %v2957_v15, 0.0  ;;  %v2959_v19 = vpop.f32.mrb[6].mxu0 }
 0xc68   : > { %v2966_v20 = vadd.f32 %v2965_v16, %v2964_v30  ;;  %v2960_v21 = vpop.f32.mrb[7].mxu0 }
 0xc6a   : > { %2967 = vadd.xlane.f32.xlu1 %v2966_v20 }
 0xc7b   : > { %3012 = vperm.xlu1 %4403, %v3009_v22  }
 0xcf7   : > { %v2968_v23 = vpop.xlane.xlu1 %2967 }
 0xcf8   : > { %v2969_v25 = vrot.slane %v2968_v23, 4 }
 0xcfa   : > { %v2970_v26 = vadd.f32 %v2969_v25, %v2968_v23 }
 0xcfb   : > { %v3013_v55 = vpop.permute.xlu1 %3012 }
 0xcfc   : > { %v2971_v27 = vrot.slane %v2970_v26, 2 }
 0xcfe   : > { %v2972_v28 = vadd.f32 %v2971_v27, %v2970_v26 }
 0xd00   : > { %v2973_v17 = vrot.slane %v2972_v28, 1 }
 0xd02   : > { %v2974_v34 = vadd.f32 %v2973_v17, %v2972_v28 }
 0xd04   : > { %4334 = vpush %v2974_v34 }
 0xd35   : > { %s4335_s24 = spop %4334 }
 0xd36   : > { %s2976_s29 = smul.f32 0.0009765625, %s4335_s24 }
 0xd38   : > { %v2977_v36 = vstv %s2976_s29  ;;  %s5529_s29 = sld [smem:[#allocation21_spill]] }
 0xd39   : > { %v2978_v35 = vsub.f32 %v2955_v14, %v2977_v36  ;;  %v2979_v37 = vsub.f32 %v2957_v15, %v2977_v36 }
 0xd3b   : > { %v2980_v31 = vmul.f32 %v2978_v35, %v2978_v35  ;;  %v2981_v18 = vmul.f32 %v2979_v37, %v2979_v37 }
 0xd3d   : > { %v2982_v33 = vsel %vm633_vm1, %v2980_v31, 0.0  ;;  %v2983_v38 = vsel %vm633_vm1, %v2981_v18, 0.0 }
 0xd3e   : > { %v2984_v39 = vadd.f32 %v2983_v38, %v2982_v33 }
 0xd40   : > { %2985 = vadd.xlane.f32.xlu0 %v2984_v39 }
 0xdcd   : > { %v2986_v43 = vpop.xlane.xlu0 %2985 }
 0xdce   : > { %v2987_v44 = vrot.slane %v2986_v43, 4 }
 0xdd0   : > { %v2988_v45 = vadd.f32 %v2987_v44, %v2986_v43 }
 0xdd2   : > { %v2989_v42 = vrot.slane %v2988_v45, 2 }
 0xdd4   : > { %v2990_v40 = vadd.f32 %v2989_v42, %v2988_v45 }
 0xdd6   : > { %v2991_v46 = vrot.slane %v2990_v40, 1 }
 0xdd8   : > { %v2992_v47 = vadd.f32 %v2991_v46, %v2990_v40 }
 0xdda   : > { %4336 = vpush %v2992_v47 }
 0xe0b   : > { %s4337_s15 = spop %4336 }
 0xe0c   : > { %s2994_s21 = smul.f32 0.0009765625, %s4337_s15 }
 0xe0e   : > { %s2996_s6 = sadd.f32 1e-05, %s2994_s21 }
 0xe10   : > { %v2997_v48 = vstv %s2996_s6 }
 0xe11   : > { %4443 = vrsqrt.f32 %v2997_v48 }
 0xe1b   : > { %v4444_v29 = vpop.eup %4443 }
 0xe1c   : > { %4338 = vpush %v4444_v29 }
 0xe4d   : > { %s4339_s28 = spop %4338 }
 0xe4e   : > { %v3000_v49 = vstv %s4339_s28 }
 0xe4f   : > { %v3001_v50 = vmul.f32 %v3000_v49, %v2995_v41 }
 0xe51   : > { %3004 = vperm.xlu0 %4402, %v3001_v50  }
 0xe55   : > { %3264 = vrot.lane.b32.xlu0 %v5024_v54, %s5479_s20 }
 0xe59   : > { %3492 = vrot.lane.b32.xlu0 %v5024_v54, %s5481_s26 }
 0xed0   : > { %v3005_v51 = vpop.permute.xlu0 %3004 }
 0xed1   : > { %v3007_v52 = vmul.f32 %v3005_v51, %v2978_v35  ;;  %v3008_v53 = vmul.f32 %v3005_v51, %v2979_v37 }
 0xed3   : > { %v3015_v56 = vadd.f32 %v3013_v55, %v3007_v52  ;;  %v3016_v57 = vadd.f32 %v3013_v55, %v3008_v53 }
 0xed4   : > { %v3265_v7 = vpop.permute.xlu0 %3264 }
 0xed5   : > { %v4127_v12 = vmul.f32 -1.442695, %v3015_v56  ;;  %v4128_v58 = vmul.f32 -1.442695, %v3016_v57  ;;  %v3266_v8 = vrot.slane %v3265_v7, 4 }
 0xed7   : > { %4445 = vpow2.f32 %v4127_v12  ;;  %v3267_v13 = vsel %vm784_vm11, %v3266_v8, %v3265_v7  ;;  %v3092_v7 = vld [vmem:[%s5403_s12] sm:$0x3]  ;;  %vm5518_vm11 = vcmask 916480  }
 0xed8   : > { %4447 = vpow2.f32 %v4128_v58  ;;  %v3493_v28 = vpop.permute.xlu0 %3492 }
 0xed9   : > { %v3494_v36 = vrot.slane %v3493_v28, 4 }
 0xedb   : > { %v3495_v18 = vsel %vm1017_vm13, %v3494_v36, %v3493_v28  ;;  %vm5520_vm13 = vcmask 908288   ;;  %v4150_v28 = vld [vmem:[%s5403_s12 + $0x6] sm:$0x3] }
 0xee1   : > { %v4446_v59 = vpop.eup %4445 }
 0xee2   : > { %v4448_v60 = vpop.eup %4447  ;;  %v3023_v61 = vadd.f32 1.0, %v4446_v59 }
 0xee3   : > { %v3024_v62 = vadd.f32 1.0, %v4448_v60 }
 0xee4   : > { %4449 = vrcp.f32 %v3023_v61 }
 0xee5   : > { %4451 = vrcp.f32 %v3024_v62 }
 0xeee   : > { %v4450_v63 = vpop.eup %4449 }
 0xeef   : > { %v4452_v0 = vpop.eup %4451  ;;  %v3029_v1 = vmul.f32 %v4450_v63, %v3015_v56 }
 0xef0   : > { %v3030_v2 = vmul.f32 %v4452_v0, %v3016_v57  ;;  %v4132_v57 = vld [vmem:[%s5403_s12 + $0x2] sm:$0x3] }
 0xef2   : > { %v4192_v3 = vpack.c.bf16 %v3030_v2, %v3029_v1 }
 0xef4   : > { %3038 = vrot.lane.b32.xlu1 %v4192_v3, %s5478_s17  ;;  %s500_s17 = sand.u32 1, %s4517_s19  }
 0xef5   : > { %s3958_s20 = sshll.u32 %s500_s17, 3  ;;  %s3869_s21 = scalar_lea.sflag [#allocation4], %s500_s17 }
 0xef8   : > { %3344 = vrot.lane.b32.xlu1 %v5033_v24, %s5480_s23 }
 0xf66   : > { %v3039_v4 = vpop.permute.xlu1 %3038 }
 0xf67   : > { %v3040_v5 = vrot.slane %v3039_v4, 4 }
 0xf69   : > { %v3041_v6 = vsel %vm530_vm4, %v3040_v5, %v3039_v4  ;;  %3045 = vst.msk [vmem:[#allocation2 + $0x8] sm:$0x3] %vm5517_vm2, %v3040_v5  ;;  %vm3116_vm4 = vcmask 1041408  }
 0xf6a   : > { %3044 = vst.msk [vmem:[#allocation2] sm:$0x33] %vm4713_vm6, %v3041_v6  ;;  %v3345_v15 = vpop.permute.xlu1 %3344  ;;  %vm3112_vm6 = vcmask 31744  }
 0xf6b   : > { %v3346_v20 = vrot.slane %v3345_v15, 4 }
 0xf6d   : > { %v3347_v25 = vsel %vm866_vm12, %v3346_v20, %v3345_v15  ;;  %vm5519_vm12 = vmmov %vm5518_vm11 }
 0xf70   : > { %v3093_v30 = vld [vmem:[#allocation2 + $0x8] sm:$0x3] }
 0xf71   : > { %v3046_v9 = vld [vmem:[#allocation2] sm:$0x33]  ;;  %v4135_v19 = vcombine.low %v3093_v30, %v3093_v30  ;;  %v3271_v21 = vmul.bf16 %v3266_v8, %v3093_v30  ;;  %v5216_v17 = vld [vmem:[#allocation2 + $0x8] sm:$0x3] }
 0xf72   : > { %v4134_v11 = vcombine.high %v3046_v9, %v3046_v9  ;;  %v4133_v14 = vcombine.low %v3046_v9, %v3046_v9  ;;  %v3270_v16 = vmul.bf16 %v3267_v13, %v3046_v9  ;;  %v5210_v23 = vld [vmem:[#allocation2] sm:$0x33]  ;;  %v3351_v35 = vmul.bf16 %v3346_v20, %v5216_v17 }
 0xf73   : > { %v3350_v26 = vmul.bf16 %v3347_v25, %v5210_v23  ;;  %v4147_v27 = vcombine.low %v3271_v21, %v3271_v21  ;;  %v4157_v31 = vcombine.low %v5210_v23, %v5210_v23  ;;  %v4159_v38 = vcombine.low %v5216_v17, %v5216_v17 }
 0xf74   : > { %3106 = vrot.lane.b32.xlu0 %v4134_v11, %s5484_s30  ;;  %3104 = vrot.lane.b32.xlu1 %v4133_v14, %s5484_s30  ;;  %v4146_v32 = vcombine.high %v3270_v16, %v3270_v16  ;;  %v4145_v22 = vcombine.low %v3270_v16, %v3270_v16  ;;  %v4153_v33 = vcombine.low %v3351_v35, %v3351_v35 }
 0xf75   : > { %v4152_v34 = vcombine.high %v3350_v26, %v3350_v26  ;;  %v4151_v37 = vcombine.low %v3350_v26, %v3350_v26  ;;  %v4158_v39 = vcombine.high %v5210_v23, %v5210_v23  ;;  %v3499_v44 = vmul.bf16 %v3494_v36, %v5216_v17 }
 0xf76   : > { %v3091_v47 = vmul.bf16 %v5033_v24, %v3046_v9 }
 0xf77   : > { %v4165_v42 = vcombine.low %v3499_v44, %v3499_v44 }
 0xf78   : > { %3570 = vrot.lane.b32.xlu0 %v5033_v24, %s5477_s27  ;;  %3108 = vrot.lane.b32.xlu1 %v4135_v19, %s5484_s30  ;;  %v4139_v53 = vcombine.high %v3091_v47, %v3091_v47  ;;  %v4138_v55 = vcombine.low %v3091_v47, %v3091_v47  ;;  %s502_s30 = scalar_lea.vmem [#allocation3], %s3958_s20 }
 0xf7a   : > { %v3173_v61 = vsel %vm3116_vm4, %v4138_v55, 0  ;;  %v4174_v55 = vld [vmem:[%s5403_s12 + $0xe] sm:$0x3] }
 0xf7c   : > { %3284 = vrot.lane.b32.xlu0 %v4146_v32, %s5485_s25  ;;  %3282 = vrot.lane.b32.xlu1 %v4145_v22, %s5485_s25  ;;  %v4144_v32 = vld [vmem:[%s5403_s12 + $0x4] sm:$0x3] }
 0xf80   : > { %3710 = vrot.lane.b32.xlu0 %v5024_v54, %s5486_s16  ;;  %3286 = vrot.lane.b32.xlu1 %v4147_v27, %s5485_s25  ;;  %v3498_v54 = vmul.bf16 %v3495_v18, %v5210_v23  ;;  %s3883_s25 = sshll.u32 %s502_s30, 4  ;;  %s5351_s25 = int_to_ptr.vmem [resolvable:$true] %s3883_s25 }
 0xf81   : > { %s4463_s6 = scalar_lea.vmem %s5351_s25, 128 }
 0xf82   : > { %v4164_v43 = vcombine.high %v3498_v54, %v3498_v54  ;;  %v4163_v45 = vcombine.low %v3498_v54, %v3498_v54  ;;  %p4464_p11 = scmp.ne.s32.totalorder %s5351_s25, %s4463_s6 }
 0xf84   : > { %3364 = vrot.lane.b32.xlu0 %v4152_v34, %s5487_s0  ;;  %3362 = vrot.lane.b32.xlu1 %v4151_v37, %s5487_s0  ;;  %p4465_p12 = pnand %p4464_p11, %p4663_p5 }
 0xf86   : > { %p4466_p13 = pneg %p4465_p12 }
 0xf88   : > { %3432 = vrot.lane.b32.xlu0 %v4157_v31, %s5488_s1  ;;  %3366 = vrot.lane.b32.xlu1 %v4153_v33, %s5487_s0  ;;  %v4162_v33 = vld [vmem:[%s5403_s12 + $0xa] sm:$0x3] }
 0xf8c   : > { %3436 = vrot.lane.b32.xlu0 %v4159_v38, %s5488_s1  ;;  %3434 = vrot.lane.b32.xlu1 %v4158_v39, %s5488_s1 }
 0xf90   : > { %3512 = vrot.lane.b32.xlu0 %v4164_v43, %s5489_s3  ;;  %3510 = vrot.lane.b32.xlu1 %v4163_v45, %s5489_s3 }
 0xf94   : > { %3514 = vrot.lane.b32.xlu1 %v4165_v42, %s5489_s3 }
 0xfe6   : > { %v3107_v40 = vpop.permute.xlu0 %3106  ;;  %v3105_v46 = vpop.permute.xlu1 %3104 }
 0xfe7   : > { %v3110_v48 = vsel %vm626_vm14, %v3105_v46, %v3107_v40 }
 0xfe8   : > { %v3118_v51 = vsel %vm3116_vm4, %v3110_v48, 0 }
 0xfea   : > { %v3571_v29 = vpop.permute.xlu0 %3570  ;;  %v3109_v49 = vpop.permute.xlu1 %3108 }
 0xfeb   : > { %v3572_v41 = vrot.slane %v3571_v29, 4  ;;  %v3111_v50 = vsel %vm626_vm14, %v3107_v40, %v3109_v49  ;;  %vm5521_vm14 = vmmov %vm5520_vm13  ;;  %v4168_v40 = vld [vmem:[%s5403_s12 + $0xc] sm:$0x3] }
 0xfec   : > { %4136 = vmatprep.subr.msk.bf16.mxu1 %vm3116_vm4, %v3111_v50 }
 0xfed   : > { %v3573_v52 = vsel %vm1097_vm15, %v3572_v41, %v3571_v29  ;;  %3124 = vmatpush1.bf16.msra.mxu1 %v3118_v51  ;;  %v3577_v58 = vmul.bf16 %v3572_v41, %v5216_v17  ;;  %vm5522_vm15 = vcmask 900096  }
 0xfee   : > { %v3576_v56 = vmul.bf16 %v3573_v52, %v5210_v23  ;;  %v3285_v24 = vpop.permute.xlu0 %3284  ;;  %4140 = vmatprep.subr.msk.bf16.mxu1 %vm3116_vm4, %v4139_v53  ;;  %v3283_v12 = vpop.permute.xlu1 %3282 }
 0xfef   : > { %v4171_v1 = vcombine.low %v3577_v58, %v3577_v58  ;;  %v3288_v6 = vsel %vm806_vm3, %v3283_v12, %v3285_v24 }
 0xff0   : > { %v4169_v59 = vcombine.low %v3576_v56, %v3576_v56  ;;  %v4170_v60 = vcombine.high %v3576_v56, %v3576_v56  ;;  %4137 = vmatmul.mubr.msk.bf16.vlgmr.msra.gmra.mrb[4].mxu1 %vm3112_vm6, %v4132_v57  ;;  %v3294_v30 = vsel %vm3116_vm4, %v3288_v6, 0 }
 0xff1   : > { %3179 = vmatpush1.bf16.msra.mxu1 %v3173_v61  ;;  %3210 = vmatprep.mubr.bf16.mxu1 %v4529_v10 }
 0xff2   : > { %v3711_v62 = vpop.permute.xlu0 %3710  ;;  %3588 = vrot.lane.b32.xlu0 %v4169_v59, %s5490_s4  ;;  %3590 = vrot.lane.b32.xlu1 %v4170_v60, %s5490_s4  ;;  %v3287_v0 = vpop.permute.xlu1 %3286 }
 0xff3   : > { %v3712_v63 = vrot.slane %v3711_v62, 4  ;;  %v3289_v2 = vsel %vm806_vm3, %v3285_v24, %v3287_v0  ;;  %vm5523_vm3 = vmmov %vm5522_vm15  ;;  %v4177_v24 = vld [vmem:[%s5403_s12 + $0x10] sm:$0x3] }
 0xff4   : > { %4148 = vmatprep.subr.msk.bf16.mxu1 %vm3116_vm4, %v3289_v2 }
 0xff5   : > { %v3713_v3 = vsel %vm1240_vm7, %v3712_v63, %v3711_v62  ;;  %v3717_v11 = vmul.bf16 %v3712_v63, %v5216_v17  ;;  %vm5524_vm7 = vmmov %vm5512_vm5 }
 0xff6   : > { %3592 = vrot.lane.b32.xlu0 %v4171_v1, %s5490_s4  ;;  %3650 = vrot.lane.b32.xlu1 %v4157_v31, %s5491_s5  ;;  %v3363_v4 = vpop.permute.xlu1 %3362  ;;  %v3716_v5 = vmul.bf16 %v3713_v3, %v5210_v23  ;;  %v3365_v8 = vpop.permute.xlu0 %3364  ;;  %v4156_v31 = vld [vmem:[%s5403_s12 + $0x8] sm:$0x3] }
 0xff7   : > { %v4180_v16 = vcombine.low %v3717_v11, %v3717_v11  ;;  %v3368_v20 = vsel %vm5519_vm12, %v3363_v4, %v3365_v8 }
 0xff8   : > { %v4178_v13 = vcombine.low %v3716_v5, %v3716_v5  ;;  %v4179_v15 = vcombine.high %v3716_v5, %v3716_v5  ;;  %v3374_v23 = vsel %vm3116_vm4, %v3368_v20, 0 }
 0xffa   : > { %3652 = vrot.lane.b32.xlu0 %v4158_v39, %s5491_s5  ;;  %3654 = vrot.lane.b32.xlu1 %v4159_v38, %s5491_s5  ;;  %v3367_v9 = vpop.permute.xlu1 %3366  ;;  %v3433_v19 = vpop.permute.xlu0 %3432 }
 0xffb   : > { %v3369_v14 = vsel %vm5518_vm11, %v3365_v8, %v3367_v9 }
 0xffc   : > { %4141 = vmatmul.mubr.msk.bf16.vlgmr.msra.gmra.mrb[4].mxu1 %vm3112_vm6, %v3092_v7 }
 0xffd   : > { %3300 = vmatpush1.bf16.msra.mxu1 %v3294_v30  ;;  %3331 = vmatprep.mubr.bf16.mxu1 %v4529_v10 }
 0xffe   : > { %3728 = vrot.lane.b32.xlu0 %v4178_v13, %s5493_s18  ;;  %4154 = vmatprep.subr.msk.bf16.mxu1 %vm3116_vm4, %v3369_v14  ;;  %v3437_v21 = vpop.permute.xlu0 %3436  ;;  %v3435_v22 = vpop.permute.xlu1 %3434 }
 0xfff   : > { %3730 = vrot.lane.b32.xlu1 %v4179_v15, %s5493_s18  ;;  %v3439_v25 = vsel %vm5520_vm13, %v3435_v22, %v3437_v21  ;;  %v3438_v27 = vsel %vm5521_vm14, %v3433_v19, %v3435_v22 }
0x1000   : > { %v3444_v34 = vsel %vm3116_vm4, %v3438_v27, 0 }
0x1002   : > { %3732 = vrot.lane.b32.xlu0 %v4180_v16, %s5493_s18  ;;  %v3511_v26 = vpop.permute.xlu1 %3510  ;;  %v3513_v36 = vpop.permute.xlu0 %3512  ;;  %s5527_s18 = sld [smem:[#allocation9_spill]] }
0x1003   : > { %v3516_v37 = vsel %vm5523_vm3, %v3511_v26, %v3513_v36  ;;  %v3819_v26 = vld [vmem:[%s5404_s13] sm:$0xf] }
0x1004   : > { %v3522_v18 = vsel %vm3116_vm4, %v3516_v37, 0 }
0x1006   : > { %v3515_v17 = vpop.permute.xlu1 %3514 }
0x1007   : > { %v3517_v35 = vsel %vm5522_vm15, %v3513_v36, %v3515_v17 }
0x1008   : > { %4149 = vmatmul.mubr.msk.bf16.vlgmr.msra.gmra.mrb[4].mxu1 %vm3112_vm6, %v4144_v32  ;;  %s4193_s26 = sshll.u32 %s5527_s18, 7 }
0x1009   : > { %3380 = vmatpush1.bf16.msra.mxu1 %v3374_v23  ;;  %3411 = vmatprep.mubr.bf16.mxu1 %v4529_v10  ;;  %s5349_s15 = scalar_lea.hbm %s5529_s29, %s4193_s26 }
0x100a   : > { %4160 = vmatprep.subr.msk.bf16.mxu1 %vm3116_vm4, %v3439_v25 }
0x1014   : > { %4155 = vmatmul.mubr.msk.bf16.vlgmr.msra.gmra.mrb[4].mxu1 %vm3112_vm6, %v4150_v28 }
0x1015   : > { %3450 = vmatpush1.bf16.msra.mxu1 %v3444_v34  ;;  %3481 = vmatprep.mubr.bf16.mxu1 %v4529_v10 }
0x1016   : > { %4166 = vmatprep.subr.msk.bf16.mxu1 %vm3116_vm4, %v3517_v35 }
0x1020   : > { %4161 = vmatmul.mubr.msk.bf16.vlgmr.msra.gmra.mrb[4].mxu1 %vm3112_vm6, %v4156_v31 }
0x1021   : > { %3528 = vmatpush1.bf16.msra.mxu1 %v3522_v18  ;;  %3559 = vmatprep.mubr.bf16.mxu1 %v4529_v10 }
0x102c   : > { %4167 = vmatmul.mubr.msk.bf16.vlgmr.msra.gmra.mrb[4].mxu1 %vm3112_vm6, %v4162_v33 }
0x102d   : > { %3637 = vmatprep.mubr.bf16.mxu1 %v4529_v10 }
0x1064   : > { %v3589_v54 = vpop.permute.xlu0 %3588  ;;  %v3591_v38 = vpop.permute.xlu1 %3590 }
0x1065   : > { %v3594_v39 = vsel %vm5524_vm7, %v3589_v54, %v3591_v38 }
0x1066   : > { %v3600_v42 = vsel %vm3116_vm4, %v3594_v39, 0 }
0x1068   : > { %v3593_v43 = vpop.permute.xlu0 %3592  ;;  %v3651_v45 = vpop.permute.xlu1 %3650 }
0x1069   : > { %v3595_v44 = vsel %vm5512_vm5, %v3591_v38, %v3593_v43 }
0x106a   : > { %4172 = vmatprep.subr.msk.bf16.mxu1 %vm3116_vm4, %v3595_v44 }
0x106b   : > { %3606 = vmatpush1.bf16.msra.mxu1 %v3600_v42 }
0x106c   : > { %v3653_v46 = vpop.permute.xlu0 %3652  ;;  %v3655_v48 = vpop.permute.xlu1 %3654 }
0x106d   : > { %v3656_v47 = vsel %vm5525_vm10, %v3651_v45, %v3653_v46  ;;  %v3657_v41 = vsel %vm5514_vm8, %v3653_v46, %v3655_v48 }
0x106e   : > { %v3662_v29 = vsel %vm3116_vm4, %v3656_v47, 0  ;;  %4173 = vmatmul.mubr.msk.bf16.vlgmr.msra.gmra.mrb[4].mxu1 %vm3112_vm6, %v4168_v40  ;;  %4175 = vmatprep.subr.msk.bf16.mxu1 %vm3116_vm4, %v3657_v41 }
0x106f   : > { %3699 = vmatprep.mubr.bf16.mxu1 %v4529_v10  ;;  %3668 = vmatpush1.bf16.msra.mxu1 %v3662_v29 }
0x1070   : > { %v3729_v49 = vpop.permute.xlu0 %3728 }
0x1071   : > { %v3731_v50 = vpop.permute.xlu1 %3730 }
0x1072   : > { %v3734_v53 = vsel %vm5526_vm9, %v3729_v49, %v3731_v50 }
0x1073   : > { %v3740_v56 = vsel %vm3116_vm4, %v3734_v53, 0 }
0x1074   : > { %v3733_v51 = vpop.permute.xlu0 %3732 }
0x1075   : > { %v3735_v52 = vsel %vm5515_vm0, %v3731_v50, %v3733_v51 }
0x1076   : > { %4181 = vmatprep.subr.msk.bf16.mxu1 %vm3116_vm4, %v3735_v52 }
0x107a   : > { %4176 = vmatmul.mubr.msk.bf16.vlgmr.msra.gmra.mrb[4].mxu1 %vm3112_vm6, %v4174_v55 }
0x107b   : > { %3746 = vmatpush1.bf16.msra.mxu1 %v3740_v56  ;;  %3777 = vmatprep.mubr.bf16.mxu1 %v4529_v10  ;;  %v3833_v10 = vld [vmem:[%s5405_s14] sm:$0xf] }
0x1086   : > { %4182 = vmatmul.mubr.msk.bf16.vlgmr.msra.gmra.mrb[4].mxu1 %vm3112_vm6, %v4177_v24 }
0x1159   : > { %v3779_v57 = vpop.f32.mrb[4].mxu1 }
0x115a   : > { %v3788_v12 = vsel %vm633_vm1, %v3779_v57, 0.0  ;;  %v3781_v58 = vpop.f32.mrb[5].mxu1 }
0x115b   : > { %v3789_v59 = vsel %vm633_vm1, %v3781_v58, 0.0  ;;  %v3783_v60 = vpop.f32.mrb[6].mxu1 }
0x115c   : > { %v3790_v61 = vadd.f32 %v3789_v59, %v3788_v12  ;;  %v3784_v62 = vpop.f32.mrb[7].mxu1 }
0x115e   : > { %3791 = vadd.xlane.f32.xlu1 %v3790_v61 }
0x116f   : > { %3836 = vperm.xlu1 %4403, %v3833_v10  }
0x11eb   : > { %v3792_v63 = vpop.xlane.xlu1 %3791 }
0x11ec   : > { %v3793_v0 = vrot.slane %v3792_v63, 4 }
0x11ee   : > { %v3794_v1 = vadd.f32 %v3793_v0, %v3792_v63 }
0x11ef   : > { %v3837_v35 = vpop.permute.xlu1 %3836 }
0x11f0   : > { %v3795_v2 = vrot.slane %v3794_v1, 2 }
0x11f2   : > { %v3796_v3 = vadd.f32 %v3795_v2, %v3794_v1 }
0x11f4   : > { %v3797_v4 = vrot.slane %v3796_v3, 1 }
0x11f6   : > { %v3798_v5 = vadd.f32 %v3797_v4, %v3796_v3 }
0x11f8   : > { %4340 = vpush %v3798_v5 }
0x1229   : > { %s4341_s22 = spop %4340 }
0x122a   : > { %s3800_s28 = smul.f32 0.0009765625, %s4341_s22  ;;  %s4467_s22 = sshll.u32 %s4544_s8, 4  ;;  %s4468_s22 = int_to_ptr.vmem [resolvable:$false] %s4467_s22 }
0x122b   : > { %p4470_p0 = scmp.lt.s32.totalorder %s5351_s25, %s4468_s22 }
0x122c   : > { %v3801_v6 = vstv %s3800_s28  ;;  %s4469_s28 = scalar_lea.vmem %s4468_s22, 256 }
0x122d   : > { %v3802_v7 = vsub.f32 %v3779_v57, %v3801_v6  ;;  %v3803_v8 = vsub.f32 %v3781_v58, %v3801_v6  ;;  %p4471_p1 = scmp.lt.s32.totalorder %s4469_s28, %s4463_s6 }
0x122f   : > { %v3804_v9 = vmul.f32 %v3802_v7, %v3802_v7  ;;  %v3805_v11 = vmul.f32 %v3803_v8, %v3803_v8  ;;  %p4472_p2 = por %p4471_p1, %p4470_p0 }
0x1231   : > { %v3806_v13 = vsel %vm633_vm1, %v3804_v9, 0.0  ;;  %v3807_v14 = vsel %vm633_vm1, %v3805_v11, 0.0  ;;  %p4473_p3 = pnand %p4472_p2, %p4466_p13 }
0x1232   : > { %v3808_v30 = vadd.f32 %v3807_v14, %v3806_v13 }
0x1234   : > { %3809 = vadd.xlane.f32.xlu0 %v3808_v30 }
0x12c1   : > { %v3810_v15 = vpop.xlane.xlu0 %3809 }
0x12c2   : > { %v3811_v16 = vrot.slane %v3810_v15, 4 }
0x12c4   : > { %v3812_v19 = vadd.f32 %v3811_v16, %v3810_v15 }
0x12c6   : > { %v3813_v20 = vrot.slane %v3812_v19, 2 }
0x12c8   : > { %v3814_v32 = vadd.f32 %v3813_v20, %v3812_v19 }
0x12ca   : > { %v3815_v21 = vrot.slane %v3814_v32, 1 }
0x12cc   : > { %v3816_v22 = vadd.f32 %v3815_v21, %v3814_v32 }
0x12ce   : > { %4342 = vpush %v3816_v22 }
0x12ff   : > { %s4343_s0 = spop %4342 }
0x1300   : > { %s3818_s1 = smul.f32 0.0009765625, %s4343_s0 }
0x1302   : > { %s3820_s3 = sadd.f32 1e-05, %s3818_s1 }
0x1304   : > { %v3821_v23 = vstv %s3820_s3 }
0x1305   : > { %4453 = vrsqrt.f32 %v3821_v23 }
0x130f   : > { %v4454_v25 = vpop.eup %4453 }
0x1310   : > { %4344 = vpush %v4454_v25 }
0x1341   : > { %s4345_s5 = spop %4344 }
0x1342   : > { %v3824_v27 = vstv %s4345_s5 }
0x1343   : > { %v3825_v28 = vmul.f32 %v3824_v27, %v3819_v26 }
0x1345   : > { %3828 = vperm.xlu0 %4402, %v3825_v28  }
0x13c4   : > { %v3829_v17 = vpop.permute.xlu0 %3828 }
0x13c5   : > { %v3831_v34 = vmul.f32 %v3829_v17, %v3802_v7  ;;  %v3832_v36 = vmul.f32 %v3829_v17, %v3803_v8 }
0x13c7   : > { %v3839_v37 = vadd.f32 %v3837_v35, %v3831_v34  ;;  %v3840_v31 = vadd.f32 %v3837_v35, %v3832_v36 }
0x13c9   : > { %v3841_v18 = vmin.f32 %v3839_v37, 25.0  ;;  %v3842_v33 = vmin.f32 %v3840_v31, 25.0  ;;  %vm3851_vm1 = vcmp.gt.f32.partialorder %v3839_v37, 25.0  ;;  %vm3852_vm2 = vcmp.gt.f32.partialorder %v3840_v31, 25.0 }
0x13cb   : > { %v3843_v54 = vmul.f32 1.442695, %v3841_v18  ;;  %v3845_v38 = vmul.f32 1.442695, %v3842_v33 }
0x13cd   : > { %4455 = vpow2.f32 %v3843_v54 }
0x13ce   : > { %4457 = vpow2.f32 %v3845_v38 }
0x13d7   : > { %v4456_v39 = vpop.eup %4455 }
0x13d8   : > { %v4458_v43 = vpop.eup %4457  ;;  %v3847_v44 = vadd.f32 2.0, %v4456_v39 }
0x13d9   : > { %v3848_v45 = vadd.f32 2.0, %v4458_v43 }
0x13da   : > { %v3849_v42 = vmul.f32 %v4456_v39, %v3847_v44 }
0x13db   : > { %v3850_v40 = vmul.f32 %v4458_v43, %v3848_v45 }
0x13dc   : > { %v3855_v46 = vadd.f32 2.0, %v3849_v42  ;;  %v3853_v48 = vmul.f32 %v3849_v42, %v3839_v37 }
0x13dd   : > { %v3856_v47 = vadd.f32 2.0, %v3850_v40  ;;  %v3854_v41 = vmul.f32 %v3850_v40, %v3840_v31 }
0x13de   : > { %4459 = vrcp.f32 %v3855_v46 }
0x13df   : > { %4461 = vrcp.f32 %v3856_v47 }
0x13e8   : > { %v4460_v29 = vpop.eup %4459 }
0x13e9   : > { %v4462_v49 = vpop.eup %4461  ;;  %v3859_v50 = vmul.f32 %v4460_v29, %v3853_v48 }
0x13ea   : > { %v3860_v51 = vmul.f32 %v4462_v49, %v3854_v41 }
0x13eb   : > { %v3861_v52 = vsel %vm3851_vm1, %v3839_v37, %v3859_v50 }
0x13ec   : > { %v3862_v53 = vsel %vm3852_vm2, %v3840_v31, %v3860_v51 }
0x13ed   : > { %v3865_v55 = vcombine.low %v3861_v52, %v3862_v53 }
0x13ef   : > { %3867 = vst [vmem:[%s502_s30] sm:$0xff] %v3865_v55 }
0x13f0   : > { %4476 = shalt.err (!%p4473_p3)
}
0x13f1   : > { %s4477_s0 = scalar_lea.hbm %s5349_s15, 128  ;;  %s4481_s27 = scalar_lea.hbm %s5529_s29, 256 }
0x13f2   : > { %p4478_p4 = scmp.ne.s32.totalorder %s5349_s15, %s4477_s0  ;;  %p4482_p9 = scmp.lt.u32.totalorder %s5349_s15, %s5529_s29 }
0x13f3   : > { %p4483_p10 = scmp.lt.u32.totalorder %s4481_s27, %s4477_s0  ;;  %p4485_p12 = scmp.lt.u32.totalorder %s4477_s0, %s5349_s15 }
0x13f4   : > { %p4479_p7 = pnand %p4478_p4, %p4663_p5 }
0x13f5   : > { %p4484_p11 = por %p4483_p10, %p4482_p9 }
0x13f6   : > { %p4480_p8 = pneg %p4479_p7 }
0x13f7   : > { %p4486_p13 = por %p4485_p12, %p4484_p11 }
0x13f9   : > { %p4487_p0 = pnand %p4486_p13, %p4480_p8 }
0x13fb   : > { %4490 = shalt.err (!%p4487_p0)
}
0x13fc   : > { %4346 = dma.vmem_to_hbm [thread:$0]  (%p4663_p5), %s5351_s25, 128, %s5349_s15, %s3869_s21  }
0x13fd PF: > { %s5530_s18 = sld [smem:[#allocation8_spill]]  ;;  %s5531_s17 = sld [smem:[#allocation6_spill]] }
0x1403   : > { %p4352_p1 = scmp.ge.s32.totalorder %s5530_s18, 2  ;;  %s3895_s26 = sand.u32 1, %s5531_s17  }
0x1404   : > { %s3896_s30 = scalar_lea.sflag [#allocation4], %s3895_s26 }
0x1405   : > { %p4349_p2 = pnand %p4352_p1, %p4667_p6 }
0x1407   : > { %4508 = dma.done.wait (!%p4349_p2), %s3896_s30, 128  }
0x1408   : > { %4510 = vsyncadd (!%p4349_p2), %s3896_s30, 4294967168  ;;  %s5533_s21 = sld [smem:[#allocation10_spill]]  ;;  %s5534_s16 = sld [smem:[#allocation7_spill]] }
0x1409   : > { %s5535_s20 = sld [smem:[#allocation11_spill]]  ;;  %s5536_s18 = smov %s4517_s19 }
0x140e   : > { %p25_p3 = scmp.ge.s32.totalorder %s5533_s21, 4   ;;  %s5537_s19 = smov %s5534_s16 }
0x1410   :  { %27 = sbr.rel (!%p25_p3) target bundleno = 12 (0xc), region = 150 }
0x1417   :  { %3901 = vsyncpa [#allocation4], 1 }
0x1418   :  { %3903 = vsyncpa [#allocation4 + $0x1], 1 }

</bundles_post_ra>
